<compile_context>
chip_gen: v5e
topology: v5e:2x2
jax: 0.10.0
libtpu: 0.0.40
codegen_flags: <defaults>
</compile_context>

<pallas_src>
import functools

import jax
import jax.numpy as jnp
from jax.experimental import pallas as pl
from jax.experimental.pallas import tpu as pltpu

# Fixed hidden sizes / slopes from the module definition.
HIDDEN = (1024, 512, 256, 128, 64)
SLOPES = (0.02, 0.02, 0.02, 0.2, 0.2)
OUT_PAD = 128          # last layer N padded 64 -> 128 for a lane-dense output store


def _leaky_relu(x, slope):
    return jnp.where(x > 0, x, slope * x)


def _disc_kernel(img_ref, feat_ref,
                 w1a_ref, w1b_ref, b1_ref,
                 w2_ref, b2_ref,
                 w3_ref, b3_ref,
                 w4_ref, b4_ref,
                 w5_ref, b5_ref,
                 o_ref):
    """Whole 5-layer MLP fused in one invocation.

    Layer 1 fuses the torch.cat: x @ W1 == img_flat @ W1[:d_img] + feat @ W1[d_img:].
    bf16 MXU matmuls with fp32 accumulation; bias + LeakyReLU in fp32.
    """
    img_lo = img_ref[...].astype(jnp.bfloat16)
    feat_lo = feat_ref[...].astype(jnp.bfloat16)
    acc = jnp.dot(img_lo, w1a_ref[...], preferred_element_type=jnp.float32)
    acc = acc + jnp.dot(feat_lo, w1b_ref[...], preferred_element_type=jnp.float32)
    acc = acc + b1_ref[...]
    h = _leaky_relu(acc, SLOPES[0])

    layers = ((w2_ref, b2_ref), (w3_ref, b3_ref), (w4_ref, b4_ref), (w5_ref, b5_ref))
    for (w_ref, b_ref), slope in zip(layers, SLOPES[1:]):
        acc = jnp.dot(h.astype(jnp.bfloat16), w_ref[...],
                      preferred_element_type=jnp.float32)
        acc = acc + b_ref[...]
        h = _leaky_relu(acc, slope)

    o_ref[...] = h.astype(o_ref.dtype)   # (block_b, 128); padded cols are exact zeros


def _pick_block_b(B, d_in, weight_bytes):
    """Batch-tile heuristic.

    * Small/medium B: ONE tile (no forced split) -- avoids per-step overhead on
      single-TC v5e/v6e and avoids duplicating the weight DMA across v7x's cores.
    * Large B: 512-row tiles (multiple of 8) so the MXU M-dim is well filled and
      per-step overhead is amortized; megacore ('parallel') shards the tiles.
    * Capped by a VMEM budget that stays comfortably inside v7x's 64 MiB.
    """
    budget = 44 * 1024 * 1024 - 2 * weight_bytes          # weights double-buffered, resident
    per_row = d_in * 4 * 2 + 20 * 1024                    # fp32 input dbl-buf + fused intermediates
    cap = max(8, min(512, (budget // per_row) // 8 * 8))
    if B <= cap:
        return B
    return int(cap)


def prepare_params(params, channels, time_steps):
    """One-time weight prep (call once; re-run after every optimizer step):
       bf16 cast, W1 split into img/feature rows, last-layer N padded 64->128."""
    d_img = channels * time_steps
    w1, b1 = params[0]
    w1 = w1.astype(jnp.bfloat16)
    flat = [w1[:d_img], w1[d_img:], b1.astype(jnp.float32).reshape(1, -1)]
    for li, (w, b) in enumerate(params[1:], start=1):
        w = w.astype(jnp.bfloat16)
        b = b.astype(jnp.float32).reshape(1, -1)
        if li == len(params) - 1:                          # last layer: pad N to 128
            w = jnp.pad(w, ((0, 0), (0, OUT_PAD - w.shape[1])))
            b = jnp.pad(b, ((0, 0), (0, OUT_PAD - b.shape[1])))
        flat += [w, b]
    return tuple(jax.device_put(a) for a in flat)


@jax.jit
def discriminator_forward(img, features, prepped):
    """img: (B, C, T) f32; features: (B, F) f32; prepped: output of prepare_params."""
    B = img.shape[0]
    img_flat = img.reshape(B, -1)                          # pure layout, no data pass
    d_img = img_flat.shape[1]
    d_feat = features.shape[1]
    assert prepped[0].shape[0] == d_img and prepped[1].shape[0] == d_feat

    weight_bytes = sum(int(a.size) * a.dtype.itemsize for a in prepped)
    block_b = _pick_block_b(B, d_img + d_feat, weight_bytes)
    grid = (pl.cdiv(B, block_b),)

    param_specs = [pl.BlockSpec(a.shape, lambda i: (0, 0)) for a in prepped]

    out = pl.pallas_call(
        _disc_kernel,
        out_shape=jax.ShapeDtypeStruct((B, OUT_PAD), jnp.float32),
        grid_spec=pltpu.PrefetchScalarGridSpec(
            num_scalar_prefetch=0,
            grid=grid,
            in_specs=[pl.BlockSpec((block_b, d_img), lambda i: (i, 0)),
                      pl.BlockSpec((block_b, d_feat), lambda i: (i, 0))]
                     + param_specs,
            out_specs=pl.BlockSpec((block_b, OUT_PAD), lambda i: (i, 0)),
        ),
        compiler_params=pltpu.CompilerParams(
            dimension_semantics=("parallel",),             # megacore split over batch tiles
            vmem_limit_bytes=48 * 1024 * 1024,             # safe under v7x's 64 MiB physical
        ),
    )(img_flat, features, *prepped)
    return out[:, :HIDDEN[-1]]


def init_params(key, feature_dim, channels, time_steps):
    """Deterministic Xavier-normal init (mirrors initialize_weights): W=(in,out), b=0."""
    d_in = channels * time_steps + feature_dim
    dims = (d_in,) + HIDDEN
    params = []
    for i in range(len(HIDDEN)):
        key, sub = jax.random.split(key)
        fan_in, fan_out = dims[i], dims[i + 1]
        std = (2.0 / (fan_in + fan_out)) ** 0.5
        w = std * jax.random.normal(sub, (fan_in, fan_out), dtype=jnp.float32)
        b = jnp.zeros((fan_out,), dtype=jnp.float32)
        params.append((w, b))
    return params


if __name__ == "__main__":
    # Small, module-consistent shapes: batch=16, channels=4, time_steps=16, feature_dim=32.
    B, C, T, F = 16, 4, 16, 32
    key = jax.random.PRNGKey(0)
    k_img, k_feat, k_par = jax.random.split(key, 3)

    img = jax.random.normal(k_img, (B, C, T), dtype=jnp.float32)
    features = jax.random.normal(k_feat, (B, F), dtype=jnp.float32)
    params = init_params(k_par, F, C, T)

    prepped = prepare_params(params, C, T)                 # one-time weight prep
    out = discriminator_forward(img, features, prepped)
    out = jax.block_until_ready(out)

    # Pure-JAX reference with the same bf16-weight / fp32-accumulate semantics.
    x_ref = jnp.concatenate([img.reshape(B, -1), features], axis=1)
    h_lo = x_ref.astype(jnp.bfloat16)
    ref = None
    for (w, b), s in zip(params, SLOPES):
        acc = jnp.dot(h_lo, w.astype(jnp.bfloat16),
                      preferred_element_type=jnp.float32) + b
        ref = jnp.where(acc > 0, acc, s * acc)
        h_lo = ref.astype(jnp.bfloat16)

    assert out.shape == (B, 64)
    assert jnp.allclose(out, ref, atol=1e-2, rtol=1e-2)

    print("KERNEL_OK")
</pallas_src>

<mosaic_0001>
module attributes {stable_mosaic.version = 11 : i64} {
  func.func @_disc_kernel(%arg0: i32, %arg1: memref<16x64xf32, #tpu.memory_space<vmem>>, %arg2: memref<16x32xf32, #tpu.memory_space<vmem>>, %arg3: memref<64x1024xbf16, #tpu.memory_space<vmem>>, %arg4: memref<32x1024xbf16, #tpu.memory_space<vmem>>, %arg5: memref<1x1024xf32, #tpu.memory_space<vmem>>, %arg6: memref<1024x512xbf16, #tpu.memory_space<vmem>>, %arg7: memref<1x512xf32, #tpu.memory_space<vmem>>, %arg8: memref<512x256xbf16, #tpu.memory_space<vmem>>, %arg9: memref<1x256xf32, #tpu.memory_space<vmem>>, %arg10: memref<256x128xbf16, #tpu.memory_space<vmem>>, %arg11: memref<1x128xf32, #tpu.memory_space<vmem>>, %arg12: memref<128x128xbf16, #tpu.memory_space<vmem>>, %arg13: memref<1x128xf32, #tpu.memory_space<vmem>>, %arg14: memref<16x128xf32, #tpu.memory_space<vmem>>) attributes {dimension_semantics = [#tpu.dimension_semantics<parallel>], iteration_bounds = array<i64: 1>, scalar_prefetch = 0 : i64, scratch_operands = 0 : i64, tpu.core_type = #tpu.core_type<tc>, window_params = [{transform_indices = @transform_0, window_bounds = array<i64: 16, 64>}, {transform_indices = @transform_1, window_bounds = array<i64: 16, 32>}, {pipeline_mode = #tpu.pipeline_mode<synchronous>, transform_indices = @transform_2, window_bounds = array<i64: 64, 1024>}, {pipeline_mode = #tpu.pipeline_mode<synchronous>, transform_indices = @transform_3, window_bounds = array<i64: 32, 1024>}, {pipeline_mode = #tpu.pipeline_mode<synchronous>, transform_indices = @transform_4, window_bounds = array<i64: 1, 1024>}, {pipeline_mode = #tpu.pipeline_mode<synchronous>, transform_indices = @transform_5, window_bounds = array<i64: 1024, 512>}, {pipeline_mode = #tpu.pipeline_mode<synchronous>, transform_indices = @transform_6, window_bounds = array<i64: 1, 512>}, {pipeline_mode = #tpu.pipeline_mode<synchronous>, transform_indices = @transform_7, window_bounds = array<i64: 512, 256>}, {pipeline_mode = #tpu.pipeline_mode<synchronous>, transform_indices = @transform_8, window_bounds = array<i64: 1, 256>}, {pipeline_mode = #tpu.pipeline_mode<synchronous>, transform_indices = @transform_9, window_bounds = array<i64: 256, 128>}, {pipeline_mode = #tpu.pipeline_mode<synchronous>, transform_indices = @transform_10, window_bounds = array<i64: 1, 128>}, {pipeline_mode = #tpu.pipeline_mode<synchronous>, transform_indices = @transform_11, window_bounds = array<i64: 128, 128>}, {pipeline_mode = #tpu.pipeline_mode<synchronous>, transform_indices = @transform_12, window_bounds = array<i64: 1, 128>}, {transform_indices = @transform_13, window_bounds = array<i64: 16, 128>}]} {
    %c0 = arith.constant 0 : index
    %c0_0 = arith.constant 0 : index
    %0 = vector.load %arg1[%c0, %c0_0] : memref<16x64xf32, #tpu.memory_space<vmem>>, vector<16x64xf32>
    %1 = arith.truncf %0 : vector<16x64xf32> to vector<16x64xbf16>
    %c0_1 = arith.constant 0 : index
    %c0_2 = arith.constant 0 : index
    %2 = vector.load %arg2[%c0_1, %c0_2] : memref<16x32xf32, #tpu.memory_space<vmem>>, vector<16x32xf32>
    %3 = arith.truncf %2 : vector<16x32xf32> to vector<16x32xbf16>
    %c0_3 = arith.constant 0 : index
    %c0_4 = arith.constant 0 : index
    %4 = vector.load %arg3[%c0_3, %c0_4] : memref<64x1024xbf16, #tpu.memory_space<vmem>>, vector<64x1024xbf16>
    %cst = arith.constant dense<0.000000e+00> : vector<16x1024xf32>
    %5 = tpu.matmul %1, %4, %cst {dimension_numbers = #tpu.dot_dimension_numbers<[1], [0], [0], [1], [0, 0, 1, 1], [], []>} : vector<16x64xbf16>, vector<64x1024xbf16>, vector<16x1024xf32> -> vector<16x1024xf32>
    %c0_5 = arith.constant 0 : index
    %c0_6 = arith.constant 0 : index
    %6 = vector.load %arg4[%c0_5, %c0_6] : memref<32x1024xbf16, #tpu.memory_space<vmem>>, vector<32x1024xbf16>
    %cst_7 = arith.constant dense<0.000000e+00> : vector<16x1024xf32>
    %7 = tpu.matmul %3, %6, %cst_7 {dimension_numbers = #tpu.dot_dimension_numbers<[1], [0], [0], [1], [0, 0, 1, 1], [], []>} : vector<16x32xbf16>, vector<32x1024xbf16>, vector<16x1024xf32> -> vector<16x1024xf32>
    %8 = arith.addf %5, %7 : vector<16x1024xf32>
    %c0_8 = arith.constant 0 : index
    %c0_9 = arith.constant 0 : index
    %9 = vector.load %arg5[%c0_8, %c0_9] : memref<1x1024xf32, #tpu.memory_space<vmem>>, vector<1x1024xf32>
    %10 = vector.broadcast %9 : vector<1x1024xf32> to vector<16x1024xf32>
    %11 = arith.addf %8, %10 : vector<16x1024xf32>
    %cst_10 = arith.constant 0.000000e+00 : f32
    %12 = vector.broadcast %cst_10 : f32 to vector<16x1024xf32>
    %13 = arith.cmpf ogt, %11, %12 : vector<16x1024xf32>
    %cst_11 = arith.constant 2.000000e-02 : f32
    %14 = vector.broadcast %cst_11 : f32 to vector<16x1024xf32>
    %15 = arith.mulf %14, %11 : vector<16x1024xf32>
    %16 = arith.select %13, %11, %15 : vector<16x1024xi1>, vector<16x1024xf32>
    %17 = arith.truncf %16 : vector<16x1024xf32> to vector<16x1024xbf16>
    %c0_12 = arith.constant 0 : index
    %c0_13 = arith.constant 0 : index
    %18 = vector.load %arg6[%c0_12, %c0_13] : memref<1024x512xbf16, #tpu.memory_space<vmem>>, vector<1024x512xbf16>
    %cst_14 = arith.constant dense<0.000000e+00> : vector<16x512xf32>
    %19 = tpu.matmul %17, %18, %cst_14 {dimension_numbers = #tpu.dot_dimension_numbers<[1], [0], [0], [1], [0, 0, 1, 1], [], []>} : vector<16x1024xbf16>, vector<1024x512xbf16>, vector<16x512xf32> -> vector<16x512xf32>
    %c0_15 = arith.constant 0 : index
    %c0_16 = arith.constant 0 : index
    %20 = vector.load %arg7[%c0_15, %c0_16] : memref<1x512xf32, #tpu.memory_space<vmem>>, vector<1x512xf32>
    %21 = vector.broadcast %20 : vector<1x512xf32> to vector<16x512xf32>
    %22 = arith.addf %19, %21 : vector<16x512xf32>
    %cst_17 = arith.constant 0.000000e+00 : f32
    %23 = vector.broadcast %cst_17 : f32 to vector<16x512xf32>
    %24 = arith.cmpf ogt, %22, %23 : vector<16x512xf32>
    %cst_18 = arith.constant 2.000000e-02 : f32
    %25 = vector.broadcast %cst_18 : f32 to vector<16x512xf32>
    %26 = arith.mulf %25, %22 : vector<16x512xf32>
    %27 = arith.select %24, %22, %26 : vector<16x512xi1>, vector<16x512xf32>
    %28 = arith.truncf %27 : vector<16x512xf32> to vector<16x512xbf16>
    %c0_19 = arith.constant 0 : index
    %c0_20 = arith.constant 0 : index
    %29 = vector.load %arg8[%c0_19, %c0_20] : memref<512x256xbf16, #tpu.memory_space<vmem>>, vector<512x256xbf16>
    %cst_21 = arith.constant dense<0.000000e+00> : vector<16x256xf32>
    %30 = tpu.matmul %28, %29, %cst_21 {dimension_numbers = #tpu.dot_dimension_numbers<[1], [0], [0], [1], [0, 0, 1, 1], [], []>} : vector<16x512xbf16>, vector<512x256xbf16>, vector<16x256xf32> -> vector<16x256xf32>
    %c0_22 = arith.constant 0 : index
    %c0_23 = arith.constant 0 : index
    %31 = vector.load %arg9[%c0_22, %c0_23] : memref<1x256xf32, #tpu.memory_space<vmem>>, vector<1x256xf32>
    %32 = vector.broadcast %31 : vector<1x256xf32> to vector<16x256xf32>
    %33 = arith.addf %30, %32 : vector<16x256xf32>
    %cst_24 = arith.constant 0.000000e+00 : f32
    %34 = vector.broadcast %cst_24 : f32 to vector<16x256xf32>
    %35 = arith.cmpf ogt, %33, %34 : vector<16x256xf32>
    %cst_25 = arith.constant 2.000000e-02 : f32
    %36 = vector.broadcast %cst_25 : f32 to vector<16x256xf32>
    %37 = arith.mulf %36, %33 : vector<16x256xf32>
    %38 = arith.select %35, %33, %37 : vector<16x256xi1>, vector<16x256xf32>
    %39 = arith.truncf %38 : vector<16x256xf32> to vector<16x256xbf16>
    %c0_26 = arith.constant 0 : index
    %c0_27 = arith.constant 0 : index
    %40 = vector.load %arg10[%c0_26, %c0_27] : memref<256x128xbf16, #tpu.memory_space<vmem>>, vector<256x128xbf16>
    %cst_28 = arith.constant dense<0.000000e+00> : vector<16x128xf32>
    %41 = tpu.matmul %39, %40, %cst_28 {dimension_numbers = #tpu.dot_dimension_numbers<[1], [0], [0], [1], [0, 0, 1, 1], [], []>} : vector<16x256xbf16>, vector<256x128xbf16>, vector<16x128xf32> -> vector<16x128xf32>
    %c0_29 = arith.constant 0 : index
    %c0_30 = arith.constant 0 : index
    %42 = vector.load %arg11[%c0_29, %c0_30] : memref<1x128xf32, #tpu.memory_space<vmem>>, vector<1x128xf32>
    %43 = vector.broadcast %42 : vector<1x128xf32> to vector<16x128xf32>
    %44 = arith.addf %41, %43 : vector<16x128xf32>
    %cst_31 = arith.constant 0.000000e+00 : f32
    %45 = vector.broadcast %cst_31 : f32 to vector<16x128xf32>
    %46 = arith.cmpf ogt, %44, %45 : vector<16x128xf32>
    %cst_32 = arith.constant 2.000000e-01 : f32
    %47 = vector.broadcast %cst_32 : f32 to vector<16x128xf32>
    %48 = arith.mulf %47, %44 : vector<16x128xf32>
    %49 = arith.select %46, %44, %48 : vector<16x128xi1>, vector<16x128xf32>
    %50 = arith.truncf %49 : vector<16x128xf32> to vector<16x128xbf16>
    %c0_33 = arith.constant 0 : index
    %c0_34 = arith.constant 0 : index
    %51 = vector.load %arg12[%c0_33, %c0_34] : memref<128x128xbf16, #tpu.memory_space<vmem>>, vector<128x128xbf16>
    %cst_35 = arith.constant dense<0.000000e+00> : vector<16x128xf32>
    %52 = tpu.matmul %50, %51, %cst_35 {dimension_numbers = #tpu.dot_dimension_numbers<[1], [0], [0], [1], [0, 0, 1, 1], [], []>} : vector<16x128xbf16>, vector<128x128xbf16>, vector<16x128xf32> -> vector<16x128xf32>
    %c0_36 = arith.constant 0 : index
    %c0_37 = arith.constant 0 : index
    %53 = vector.load %arg13[%c0_36, %c0_37] : memref<1x128xf32, #tpu.memory_space<vmem>>, vector<1x128xf32>
    %54 = vector.broadcast %53 : vector<1x128xf32> to vector<16x128xf32>
    %55 = arith.addf %52, %54 : vector<16x128xf32>
    %cst_38 = arith.constant 0.000000e+00 : f32
    %56 = vector.broadcast %cst_38 : f32 to vector<16x128xf32>
    %57 = arith.cmpf ogt, %55, %56 : vector<16x128xf32>
    %cst_39 = arith.constant 2.000000e-01 : f32
    %58 = vector.broadcast %cst_39 : f32 to vector<16x128xf32>
    %59 = arith.mulf %58, %55 : vector<16x128xf32>
    %60 = arith.select %57, %55, %59 : vector<16x128xi1>, vector<16x128xf32>
    %c0_40 = arith.constant 0 : index
    %c0_41 = arith.constant 0 : index
    %61 = vector.load %arg14[%c0_40, %c0_41] : memref<16x128xf32, #tpu.memory_space<vmem>>, vector<16x128xf32>
    tpu.vector_store %arg14[%c0_40, %c0_41], %60 {strides = array<i32>} : memref<16x128xf32, #tpu.memory_space<vmem>>, vector<16x128xf32>,
    return
  }
  func.func @transform_0(%arg0: i32) -> (i32, i32) {
    %c0_i32 = arith.constant 0 : i32
    %c0_i32_0 = arith.constant 0 : i32
    return %arg0, %c0_i32 : i32, i32
  }
  func.func @transform_1(%arg0: i32) -> (i32, i32) {
    %c0_i32 = arith.constant 0 : i32
    %c0_i32_0 = arith.constant 0 : i32
    return %arg0, %c0_i32 : i32, i32
  }
  func.func @transform_2(%arg0: i32) -> (i32, i32) {
    %c0_i32 = arith.constant 0 : i32
    %c0_i32_0 = arith.constant 0 : i32
    %c0_i32_1 = arith.constant 0 : i32
    return %c0_i32, %c0_i32_0 : i32, i32
  }
  func.func @transform_3(%arg0: i32) -> (i32, i32) {
    %c0_i32 = arith.constant 0 : i32
    %c0_i32_0 = arith.constant 0 : i32
    %c0_i32_1 = arith.constant 0 : i32
    return %c0_i32, %c0_i32_0 : i32, i32
  }
  func.func @transform_4(%arg0: i32) -> (i32, i32) {
    %c0_i32 = arith.constant 0 : i32
    %c0_i32_0 = arith.constant 0 : i32
    %c0_i32_1 = arith.constant 0 : i32
    return %c0_i32, %c0_i32_0 : i32, i32
  }
  func.func @transform_5(%arg0: i32) -> (i32, i32) {
    %c0_i32 = arith.constant 0 : i32
    %c0_i32_0 = arith.constant 0 : i32
    %c0_i32_1 = arith.constant 0 : i32
    return %c0_i32, %c0_i32_0 : i32, i32
  }
  func.func @transform_6(%arg0: i32) -> (i32, i32) {
    %c0_i32 = arith.constant 0 : i32
    %c0_i32_0 = arith.constant 0 : i32
    %c0_i32_1 = arith.constant 0 : i32
    return %c0_i32, %c0_i32_0 : i32, i32
  }
  func.func @transform_7(%arg0: i32) -> (i32, i32) {
    %c0_i32 = arith.constant 0 : i32
    %c0_i32_0 = arith.constant 0 : i32
    %c0_i32_1 = arith.constant 0 : i32
    return %c0_i32, %c0_i32_0 : i32, i32
  }
  func.func @transform_8(%arg0: i32) -> (i32, i32) {
    %c0_i32 = arith.constant 0 : i32
    %c0_i32_0 = arith.constant 0 : i32
    %c0_i32_1 = arith.constant 0 : i32
    return %c0_i32, %c0_i32_0 : i32, i32
  }
  func.func @transform_9(%arg0: i32) -> (i32, i32) {
    %c0_i32 = arith.constant 0 : i32
    %c0_i32_0 = arith.constant 0 : i32
    %c0_i32_1 = arith.constant 0 : i32
    return %c0_i32, %c0_i32_0 : i32, i32
  }
  func.func @transform_10(%arg0: i32) -> (i32, i32) {
    %c0_i32 = arith.constant 0 : i32
    %c0_i32_0 = arith.constant 0 : i32
    %c0_i32_1 = arith.constant 0 : i32
    return %c0_i32, %c0_i32_0 : i32, i32
  }
  func.func @transform_11(%arg0: i32) -> (i32, i32) {
    %c0_i32 = arith.constant 0 : i32
    %c0_i32_0 = arith.constant 0 : i32
    %c0_i32_1 = arith.constant 0 : i32
    return %c0_i32, %c0_i32_0 : i32, i32
  }
  func.func @transform_12(%arg0: i32) -> (i32, i32) {
    %c0_i32 = arith.constant 0 : i32
    %c0_i32_0 = arith.constant 0 : i32
    %c0_i32_1 = arith.constant 0 : i32
    return %c0_i32, %c0_i32_0 : i32, i32
  }
  func.func @transform_13(%arg0: i32) -> (i32, i32) {
    %c0_i32 = arith.constant 0 : i32
    %c0_i32_0 = arith.constant 0 : i32
    return %arg0, %c0_i32 : i32, i32
  }
}

</mosaic_0001>

<bundles_post_ra>
// kernel: discriminator_forward.1
= control target key start
LH: loop header
LB: loop body
LE: loop exit
PB: predicated region body
PF: predicated region fallthrough
CT: control target
= control target key end

     0   :  { %18 = vsyncpa [#allocation3], 0  ;;  %s6111_s0 = inlined_call_operand.vmem [shape: f32[16,64], index: 0, kind: input, shape index: {}]   ;;  %s6112_s1 = inlined_call_operand.vmem [shape: f32[16,32], index: 1, kind: input, shape index: {}]   ;;  %s6113_s2 = inlined_call_operand.hbm [shape: bf16[64,1024], index: 2, kind: input, shape index: {}]   ;;  %s6114_s3 = inlined_call_operand.hbm [shape: bf16[32,1024], index: 3, kind: input, shape index: {}]   ;;  %s6115_s4 = inlined_call_operand.vmem [shape: f32[1,1024], index: 4, kind: input, shape index: {}]   ;;  %s6116_s5 = inlined_call_operand.hbm [shape: bf16[1024,512], index: 5, kind: input, shape index: {}]   ;;  %s6117_s6 = inlined_call_operand.hbm [shape: f32[1,512], index: 6, kind: input, shape index: {}]   ;;  %s6118_s7 = inlined_call_operand.hbm [shape: bf16[512,256], index: 7, kind: input, shape index: {}]   ;;  %s6119_s8 = inlined_call_operand.vmem [shape: f32[1,256], index: 8, kind: input, shape index: {}]   ;;  %s6120_s9 = inlined_call_operand.hbm [shape: bf16[256,128], index: 9, kind: input, shape index: {}]   ;;  %s6121_s10 = inlined_call_operand.hbm [shape: f32[1,128], index: 10, kind: input, shape index: {}]   ;;  %s6122_s11 = inlined_call_operand.vmem [shape: bf16[128,128], index: 11, kind: input, shape index: {}]   ;;  %s6123_s12 = inlined_call_operand.vmem [shape: f32[1,128], index: 12, kind: input, shape index: {}]   ;;  %s6124_s13 = inlined_call_operand.hbm [shape: f32[16,128], index: 13, kind: output, shape index: {}]  }
   0x1   :  { %19 = vsyncpa [#allocation6], 0 }
   0x2   :  { %20 = vsyncpa [#allocation9], 0 }
   0x3   :  { %21 = vsyncpa [#allocation12], 0 }
   0x4   :  { %22 = vsyncpa [#allocation4], 0  ;;  %s44_s27 = sshll.u32 %s6114_s3, 4  ;;  %s5780_s28 = smov [#allocation5]   ;;  %s45_s27 = int_to_ptr.hbm [resolvable:$true] %s44_s27 }
   0x5   :  { %s46_s29 = sshll.u32 %s5780_s28, 4  ;;  %s73_s15 = sshll.u32 %s6117_s6, 4  ;;  %s47_s29 = int_to_ptr.vmem [resolvable:$true] %s46_s29  ;;  %s74_s15 = int_to_ptr.hbm [resolvable:$true] %s73_s15 }
   0x6   :  { %s5781_s16 = smov 512   ;;  %s5782_s17 = smov 32  }
   0x7   :  { %52 = dma.hbm_to_vmem [thread:$0]  %s45_s27, 2048, %s47_s29, [#allocation6], %s5781_s16, %s5781_s16, %s5782_s17  }
   0x8   :  { %s5783_s18 = smov [#allocation8]   ;;  %s98_s22 = sshll.u32 %s6120_s9, 4  ;;  %s99_s22 = int_to_ptr.hbm [resolvable:$true] %s98_s22 }
   0x9   :  { %s75_s19 = sshll.u32 %s5783_s18, 4  ;;  %s5784_s3 = smov [#allocation11]   ;;  %s76_s19 = int_to_ptr.vmem [resolvable:$true] %s75_s19 }
   0xa   :  { %78 = dma.hbm_to_vmem [thread:$0]  %s74_s15, 64, %s76_s19, [#allocation9]  }
   0xb   :  { %s100_s23 = sshll.u32 %s5784_s3, 4  ;;  %s31_s6 = sshll.u32 %s6113_s2, 4  ;;  %s101_s23 = int_to_ptr.vmem [resolvable:$true] %s100_s23  ;;  %s32_s6 = int_to_ptr.hbm [resolvable:$true] %s31_s6 }
   0xc   :  { %s5785_s26 = smov 64   ;;  %s5786_s28 = smov 4  }
   0xd   :  { %106 = dma.hbm_to_vmem [thread:$0]  %s99_s22, 2048, %s101_s23, [#allocation12], %s5785_s26, %s5785_s26, %s5786_s28  }
   0xe   :  { %s5787_s27 = smov [#allocation2]   ;;  %s59_s9 = sshll.u32 %s6116_s5, 4  ;;  %s60_s9 = int_to_ptr.hbm [resolvable:$true] %s59_s9 }
   0xf   :  { %s33_s29 = sshll.u32 %s5787_s27, 4  ;;  %s5788_s15 = smov [#allocation7]   ;;  %s34_s29 = int_to_ptr.vmem [resolvable:$true] %s33_s29 }
  0x10   :  { %39 = dma.hbm_to_vmem [thread:$0]  %s32_s6, 4096, %s34_s29, [#allocation3], %s5781_s16, %s5781_s16, %s5782_s17  }
  0x11   :  { %s61_s18 = sshll.u32 %s5788_s15, 4  ;;  %s83_s2 = sshll.u32 %s6118_s7, 4  ;;  %s62_s18 = int_to_ptr.vmem [resolvable:$true] %s61_s18  ;;  %s84_s2 = int_to_ptr.hbm [resolvable:$true] %s83_s2 }
  0x12   :  { %s5789_s21 = smov 256   ;;  %s5790_s3 = smov 16  }
  0x13   :  { %67 = dma.hbm_to_vmem [thread:$0]  %s60_s9, 32768, %s62_s18, [#allocation6], %s5789_s21, %s5789_s21, %s5790_s3  }
  0x14   :  { %s5791_s22 = smov [#allocation10]   ;;  %s5792_s24 = smov 128  }
  0x15   :  { %s85_s23 = sshll.u32 %s5791_s22, 4  ;;  %s5793_s25 = smov 8   ;;  %s86_s23 = int_to_ptr.vmem [resolvable:$true] %s85_s23 }
  0x16   :  { %91 = dma.hbm_to_vmem [thread:$0]  %s84_s2, 8192, %s86_s23, [#allocation9], %s5792_s24, %s5792_s24, %s5793_s25  }
  0x17   :  { %s112_s17 = sshll.u32 %s6121_s10, 4  ;;  %s5794_s6 = smov [#allocation13]   ;;  %s113_s17 = int_to_ptr.hbm [resolvable:$true] %s112_s17 }
  0x18   :  { %s114_s7 = sshll.u32 %s5794_s6, 4  ;;  %s115_s7 = int_to_ptr.vmem [resolvable:$true] %s114_s7 }
  0x19   :  { %117 = dma.hbm_to_vmem [thread:$0]  %s113_s17, 16, %s115_s7, [#allocation12]  }
  0x1a   :  { %5770 = dma.done.wait [#allocation3], 4096  }
  0x1b   :  { %5771 = vsyncadd [#allocation3], 4294963200 }
  0x1c   :  { %5772 = dma.done.wait [#allocation6], 34816  }
  0x1d   :  { %5773 = vsyncadd [#allocation6], 4294932480 }
  0x1e   :  { %5774 = dma.done.wait [#allocation9], 8256  }
  0x1f   :  { %5775 = vsyncadd [#allocation9], 4294959040 }
  0x20   :  { %5776 = dma.done.wait [#allocation12], 2064  }
  0x21   :  { %5777 = vsyncadd [#allocation12], 4294965232  ;;  %v3618_v0 = vld [vmem:[#allocation5 + $0x40] sm:$0xf]  ;;  %v5208_v2 = vld [vmem:[#allocation5 + $0x44] sm:$0xf] }
  0x22   :  { %v5212_v1 = vld [vmem:[#allocation5 + $0x5c] sm:$0xf0]  ;;  %v3620_v4 = vld [vmem:[#allocation5 + $0x60] sm:$0xf0]  ;;  %v3626_v5 = vld [vmem:[#allocation5 + $0x48] sm:$0xf] }
  0x23   :  { %v3619_v3 = vor.u32 %v5212_v1, %v3618_v0  ;;  %v5213_v6 = vld [vmem:[#allocation5 + $0x64] sm:$0xf0]  ;;  %v3623_v7 = vor.u32 %v5208_v2, %v3620_v4  ;;  %v3634_v9 = vld [vmem:[#allocation5 + $0x50] sm:$0xf]  ;;  %v3586_v11 = vld [vmem:[#allocation5] sm:$0xf] }
  0x24   :  { %v3627_v8 = vor.u32 %v5213_v6, %v3626_v5  ;;  %v5214_v10 = vld [vmem:[#allocation5 + $0x6c] sm:$0xf0]  ;;  %v5204_v13 = vld [vmem:[#allocation5 + $0x1c] sm:$0xf0]  ;;  %v5200_v14 = vld [vmem:[#allocation5 + $0x4] sm:$0xf] }
  0x25   :  { %295 = vmatpush.bf16.msra.mxu3 %v3619_v3  ;;  %v3635_v12 = vor.u32 %v5214_v10, %v3634_v9  ;;  %v3588_v15 = vld [vmem:[#allocation5 + $0x20] sm:$0xf0]  ;;  %309 = vmatpush.bf16.msra.mxu1 %v3623_v7  ;;  %v3587_v16 = vor.u32 %v5204_v13, %v3586_v11  ;;  %v3594_v18 = vld [vmem:[#allocation5 + $0x8] sm:$0xf]  ;;  %v3602_v20 = vld [vmem:[#allocation5 + $0x10] sm:$0xf] }
  0x26   :  { %323 = vmatpush.bf16.msra.mxu2 %v3627_v8  ;;  %v3591_v17 = vor.u32 %v5200_v14, %v3588_v15  ;;  %v5205_v19 = vld [vmem:[#allocation5 + $0x24] sm:$0xf0]  ;;  %v5206_v22 = vld [vmem:[#allocation5 + $0x2c] sm:$0xf0]  ;;  %v154_v23 = vld [vmem:[%s6112_s1] sm:$0xff]  ;;  %vm285_vm0 = vcmask 261120  }
  0x27   :  { %351 = vmatpush.bf16.msra.mxu0 %v3635_v12  ;;  %v3595_v21 = vor.u32 %v5205_v19, %v3594_v18  ;;  %v155_v24 = vld [vmem:[%s6112_s1 + $0x8] sm:$0xff]  ;;  %v3603_v25 = vor.u32 %v5206_v22, %v3602_v20  ;;  %v3754_v27 = vld [vmem:[#allocation2 + $0xc0] sm:$0xf]  ;;  %v5210_v35 = vld [vmem:[#allocation5 + $0x54] sm:$0xf]  ;;  %vm561_vm1 = vcmask 523264  }
  0x28   :  { %v5896_v26 = vpack.c.bf16 %v155_v24, %v154_v23  ;;  %v5196_v28 = vld [vmem:[#allocation2 + $0xdc] sm:$0xf0]  ;;  %v5209_v32 = vld [vmem:[#allocation5 + $0x4c] sm:$0xf]  ;;  %v3636_v36 = vld [vmem:[#allocation5 + $0x70] sm:$0xf0] }
  0x29   :  { %v3722_v29 = vld [vmem:[#allocation2 + $0x80] sm:$0xf]  ;;  %296 = vmatpush.bf16.msra.mxu3 %v3587_v16  ;;  %v3755_v30 = vor.u32 %v5196_v28, %v3754_v27  ;;  %v3628_v33 = vld [vmem:[#allocation5 + $0x68] sm:$0xf0]  ;;  %310 = vmatpush.bf16.msra.mxu1 %v3591_v17  ;;  %v3642_v37 = vld [vmem:[#allocation5 + $0x58] sm:$0xf]  ;;  %v3639_v38 = vor.u32 %v5210_v35, %v3636_v36 }
  0x2a   :  { %v5188_v31 = vld [vmem:[#allocation2 + $0x9c] sm:$0xf0]  ;;  %324 = vmatpush.bf16.msra.mxu2 %v3595_v21  ;;  %v3631_v34 = vor.u32 %v5209_v32, %v3628_v33  ;;  %v5215_v39 = vld [vmem:[#allocation5 + $0x74] sm:$0xf0]  ;;  %v5201_v44 = vld [vmem:[#allocation5 + $0xc] sm:$0xf] }
  0x2b   :  { %352 = vmatpush.bf16.msra.mxu0 %v3603_v25  ;;  %v3690_v40 = vld [vmem:[#allocation2 + $0x40] sm:$0xf]  ;;  %v3723_v42 = vor.u32 %v5188_v31, %v3722_v29  ;;  %v3643_v43 = vor.u32 %v5215_v39, %v3642_v37  ;;  %v3596_v45 = vld [vmem:[#allocation5 + $0x28] sm:$0xf0]  ;;  %v5202_v46 = vld [vmem:[#allocation5 + $0x14] sm:$0xf] }
  0x2c   :  { %v5180_v41 = vld [vmem:[#allocation2 + $0x5c] sm:$0xf0]  ;;  %3648 = vmatmul.msk.bf16.vlgmr.msra.gmra.mxu3 %vm285_vm0, %v5896_v26  ;;  %3649 = vmatmul.msk.bf16.vlgmr.msra.gmra.mxu1 %vm285_vm0, %v5896_v26  ;;  %v3604_v47 = vld [vmem:[#allocation5 + $0x30] sm:$0xf0]  ;;  %v3610_v48 = vld [vmem:[#allocation5 + $0x18] sm:$0xf]  ;;  %v3599_v50 = vor.u32 %v5201_v44, %v3596_v45 }
  0x2d   :  { %3650 = vmatmul.msk.bf16.vlgmr.msra.gmra.mxu2 %vm285_vm0, %v5896_v26  ;;  %v5207_v49 = vld [vmem:[#allocation5 + $0x34] sm:$0xf0]  ;;  %337 = vmatpush.bf16.msrb.mxu3 %v3631_v34  ;;  %v3607_v51 = vor.u32 %v5202_v46, %v3604_v47  ;;  %v3658_v53 = vld [vmem:[#allocation2] sm:$0xf]  ;;  %v5192_v54 = vld [vmem:[#allocation2 + $0xc4] sm:$0xf]  ;;  %v3691_v56 = vor.u32 %v5180_v41, %v3690_v40 }
  0x2e   :  { %3652 = vmatmul.msk.bf16.vlgmr.msra.gmra.mxu0 %vm285_vm0, %v5896_v26  ;;  %365 = vmatpush.bf16.msrb.mxu1 %v3639_v38  ;;  %v3611_v52 = vor.u32 %v5207_v49, %v3610_v48  ;;  %v3756_v55 = vld [vmem:[#allocation2 + $0xe0] sm:$0xf0]  ;;  %v5172_v57 = vld [vmem:[#allocation2 + $0x1c] sm:$0xf0]  ;;  %v3762_v59 = vld [vmem:[#allocation2 + $0xc8] sm:$0xf] }
  0x2f   :  { %569 = vmatpush.bf16.msrb.mxu0 %v3755_v30  ;;  %379 = vmatpush.bf16.msrb.mxu2 %v3643_v43  ;;  %v3759_v58 = vor.u32 %v5192_v54, %v3756_v55  ;;  %v5197_v60 = vld [vmem:[#allocation2 + $0xe4] sm:$0xf0]  ;;  %v3770_v62 = vld [vmem:[#allocation2 + $0xd0] sm:$0xf]  ;;  %v5184_v63 = vld [vmem:[#allocation2 + $0x84] sm:$0xf]  ;;  %v3659_v6 = vor.u32 %v5172_v57, %v3658_v53 }
  0x30   :  { %v3763_v61 = vor.u32 %v5197_v60, %v3762_v59  ;;  %v3724_v0 = vld [vmem:[#allocation2 + $0xa0] sm:$0xf0]  ;;  %v5198_v1 = vld [vmem:[#allocation2 + $0xec] sm:$0xf0]  ;;  %v3730_v2 = vld [vmem:[#allocation2 + $0x88] sm:$0xf] }
  0x31   :  { %338 = vmatpush.bf16.msrb.mxu3 %v3599_v50  ;;  %v5189_v3 = vld [vmem:[#allocation2 + $0xa4] sm:$0xf0]  ;;  %v5211_v4 = vld [vmem:[#allocation5 + $0x5c] sm:$0xf]  ;;  %v3727_v7 = vor.u32 %v5184_v63, %v3724_v0  ;;  %v3771_v9 = vor.u32 %v5198_v1, %v3770_v62  ;;  %v5176_v11 = vld [vmem:[#allocation2 + $0x44] sm:$0xf] }
  0x32   :  { %366 = vmatpush.bf16.msrb.mxu1 %v3607_v51  ;;  %v3644_v5 = vld [vmem:[#allocation5 + $0x78] sm:$0xf0]  ;;  %v3731_v10 = vor.u32 %v5189_v3, %v3730_v2  ;;  %v3692_v12 = vld [vmem:[#allocation2 + $0x60] sm:$0xf0]  ;;  %v152_v16 = vld [vmem:[%s6111_s0 + $0x8] sm:$0xff]  ;;  %s5795_s27 = smov [#allocation14]  }
  0x33   :  { %570 = vmatpush.bf16.msrb.mxu0 %v3723_v42  ;;  %380 = vmatpush.bf16.msrb.mxu2 %v3611_v52  ;;  %v3647_v8 = vor.u32 %v5211_v4, %v3644_v5  ;;  %v151_v13 = vld [vmem:[%s6111_s0] sm:$0xff]  ;;  %v5203_v14 = vld [vmem:[#allocation5 + $0x1c] sm:$0xf]  ;;  %v3698_v17 = vld [vmem:[#allocation2 + $0x48] sm:$0xf]  ;;  %v3695_v22 = vor.u32 %v5176_v11, %v3692_v12  ;;  %s3566_s1 = sshll.u32 %s5795_s27, 4  ;;  %s3567_s1 = int_to_ptr.vmem [resolvable:$true] %s3566_s1 }
  0x34   :  { %v3612_v15 = vld [vmem:[#allocation5 + $0x38] sm:$0xf0]  ;;  %v5181_v18 = vld [vmem:[#allocation2 + $0x64] sm:$0xf0]  ;;  %v3738_v20 = vld [vmem:[#allocation2 + $0x90] sm:$0xf]  ;;  %v5912_v28 = vpack.c.bf16 %v152_v16, %v151_v13 }
  0x35   :  { %393 = vmatpush.bf16.msra.mxu3 %v3647_v8  ;;  %v3615_v19 = vor.u32 %v5203_v14, %v3612_v15  ;;  %v5190_v21 = vld [vmem:[#allocation2 + $0xac] sm:$0xf0]  ;;  %v5193_v23 = vld [vmem:[#allocation2 + $0xcc] sm:$0xf]  ;;  %v5168_v24 = vld [vmem:[#allocation2 + $0x4] sm:$0xf]  ;;  %v3699_v29 = vor.u32 %v5181_v18, %v3698_v17 }
  0x36   :  { %583 = vmatpush.bf16.msra.mxu1 %v3759_v58  ;;  %v3660_v25 = vld [vmem:[#allocation2 + $0x20] sm:$0xf0]  ;;  %v3764_v27 = vld [vmem:[#allocation2 + $0xe8] sm:$0xf0]  ;;  %v5194_v30 = vld [vmem:[#allocation2 + $0xd4] sm:$0xf]  ;;  %v3739_v32 = vor.u32 %v5190_v21, %v3738_v20 }
  0x37   :  { %571 = vmatpush.bf16.msrb.mxu0 %v3691_v56  ;;  %597 = vmatpush.bf16.msra.mxu2 %v3763_v61  ;;  %v3772_v31 = vld [vmem:[#allocation2 + $0xf0] sm:$0xf0]  ;;  %v3706_v33 = vld [vmem:[#allocation2 + $0x50] sm:$0xf]  ;;  %v3666_v34 = vld [vmem:[#allocation2 + $0x8] sm:$0xf]  ;;  %v3767_v36 = vor.u32 %v5193_v23, %v3764_v27  ;;  %v3663_v38 = vor.u32 %v5168_v24, %v3660_v25 }
  0x38   :  { %v5173_v35 = vld [vmem:[#allocation2 + $0x24] sm:$0xf0]  ;;  %v5182_v37 = vld [vmem:[#allocation2 + $0x6c] sm:$0xf0]  ;;  %v3778_v39 = vld [vmem:[#allocation2 + $0xd8] sm:$0xf]  ;;  %v3775_v41 = vor.u32 %v5194_v30, %v3772_v31 }
  0x39   :  { %394 = vmatpush.bf16.msra.mxu3 %v3615_v19  ;;  %v5199_v40 = vld [vmem:[#allocation2 + $0xf4] sm:$0xf0]  ;;  %v5185_v42 = vld [vmem:[#allocation2 + $0x8c] sm:$0xf]  ;;  %v3667_v44 = vor.u32 %v5173_v35, %v3666_v34  ;;  %v5186_v45 = vld [vmem:[#allocation2 + $0x94] sm:$0xf]  ;;  %v3707_v47 = vor.u32 %v5182_v37, %v3706_v33 }
  0x3a   :  { %584 = vmatpush.bf16.msra.mxu1 %v3727_v7  ;;  %v3732_v43 = vld [vmem:[#allocation2 + $0xa8] sm:$0xf0]  ;;  %v3740_v46 = vld [vmem:[#allocation2 + $0xb0] sm:$0xf0]  ;;  %v3674_v48 = vld [vmem:[#allocation2 + $0x10] sm:$0xf]  ;;  %v3779_v49 = vor.u32 %v5199_v40, %v3778_v39 }
  0x3b   :  { %572 = vmatpush.bf16.msrb.mxu0 %v3659_v6  ;;  %598 = vmatpush.bf16.msra.mxu2 %v3731_v10  ;;  %v5174_v50 = vld [vmem:[#allocation2 + $0x2c] sm:$0xf0]  ;;  %v3735_v51 = vor.u32 %v5185_v42, %v3732_v43  ;;  %v3746_v52 = vld [vmem:[#allocation2 + $0x98] sm:$0xf]  ;;  %v3743_v54 = vor.u32 %v5186_v45, %v3740_v46  ;;  %v5177_v55 = vld [vmem:[#allocation2 + $0x4c] sm:$0xf] }
  0x3c   :  { %3651 = vmatmul.msk.bf16.vlgmr.msrb.gmra.mxu3 %vm285_vm0, %v5896_v26  ;;  %3653 = vmatmul.msk.bf16.vlgmr.msrb.gmra.mxu1 %vm285_vm0, %v5896_v26  ;;  %v5191_v53 = vld [vmem:[#allocation2 + $0xb4] sm:$0xf0]  ;;  %v3700_v56 = vld [vmem:[#allocation2 + $0x68] sm:$0xf0]  ;;  %v5178_v57 = vld [vmem:[#allocation2 + $0x54] sm:$0xf]  ;;  %v3675_v59 = vor.u32 %v5174_v50, %v3674_v48 }
  0x3d   :  { %3654 = vmatmul.msk.bf16.vlgmr.msrb.gmra.mxu2 %vm285_vm0, %v5896_v26  ;;  %611 = vmatpush.bf16.msrb.mxu3 %v3767_v36  ;;  %v3708_v58 = vld [vmem:[#allocation2 + $0x70] sm:$0xf0]  ;;  %v3747_v60 = vor.u32 %v5191_v53, %v3746_v52  ;;  %v3703_v61 = vor.u32 %v5177_v55, %v3700_v56  ;;  %v3714_v62 = vld [vmem:[#allocation2 + $0x58] sm:$0xf]  ;;  %v5169_v2 = vld [vmem:[#allocation2 + $0xc] sm:$0xf] }
  0x3e   :  { %585 = vmatpush.bf16.msra.mxu1 %v3695_v22  ;;  %3784 = vmatmul.msk.bf16.vlgmr.msrb.gmra.mxu0 %vm561_vm1, %v5912_v28  ;;  %v5183_v63 = vld [vmem:[#allocation2 + $0x74] sm:$0xf0]  ;;  %v3711_v0 = vor.u32 %v5178_v57, %v3708_v58  ;;  %v3668_v3 = vld [vmem:[#allocation2 + $0x28] sm:$0xf0]  ;;  %v5170_v4 = vld [vmem:[#allocation2 + $0x14] sm:$0xf] }
  0x3f   :  { %625 = vmatpush.bf16.msra.mxu0 %v3771_v9  ;;  %599 = vmatpush.bf16.msra.mxu2 %v3699_v29  ;;  %v3715_v1 = vor.u32 %v5183_v63, %v3714_v62  ;;  %v3676_v5 = vld [vmem:[#allocation2 + $0x30] sm:$0xf0]  ;;  %v3682_v6 = vld [vmem:[#allocation2 + $0x18] sm:$0xf]  ;;  %v5195_v8 = vld [vmem:[#allocation2 + $0xdc] sm:$0xf]  ;;  %v3671_v10 = vor.u32 %v5169_v2, %v3668_v3 }
  0x40   :  { %v5175_v7 = vld [vmem:[#allocation2 + $0x34] sm:$0xf0]  ;;  %v3780_v9 = vld [vmem:[#allocation2 + $0xf8] sm:$0xf0]  ;;  %v3679_v11 = vor.u32 %v5170_v4, %v3676_v5  ;;  %v3906_v15 = vld [vmem:[#allocation7 + $0xe0] sm:$0xf] }
  0x41   :  { %612 = vmatpush.bf16.msrb.mxu3 %v3735_v51  ;;  %v3683_v12 = vor.u32 %v5175_v7, %v3682_v6  ;;  %v3783_v13 = vor.u32 %v5195_v8, %v3780_v9  ;;  %v5187_v14 = vld [vmem:[#allocation2 + $0x9c] sm:$0xf]  ;;  %v5246_v16 = vld [vmem:[#allocation7 + $0xec] sm:$0xf0]  ;;  %v3890_v19 = vld [vmem:[#allocation7 + $0xc0] sm:$0xf] }
  0x42   :  { %586 = vmatpush.bf16.msra.mxu1 %v3663_v38  ;;  %v3748_v17 = vld [vmem:[#allocation2 + $0xb8] sm:$0xf0]  ;;  %v3907_v18 = vor.u32 %v5246_v16, %v3906_v15  ;;  %v5242_v20 = vld [vmem:[#allocation7 + $0xcc] sm:$0xf0]  ;;  %v4034_v22 = vld [vmem:[#allocation7 + $0x1e0] sm:$0xf] }
  0x43   :  { %626 = vmatpush.bf16.msra.mxu0 %v3739_v32  ;;  %600 = vmatpush.bf16.msra.mxu2 %v3667_v44  ;;  %v3716_v21 = vld [vmem:[#allocation2 + $0x78] sm:$0xf0]  ;;  %v5278_v23 = vld [vmem:[#allocation7 + $0x1ec] sm:$0xf0]  ;;  %v3751_v24 = vor.u32 %v5187_v14, %v3748_v17  ;;  %v3891_v25 = vor.u32 %v5242_v20, %v3890_v19  ;;  %v3874_v27 = vld [vmem:[#allocation7 + $0xa0] sm:$0xf] }
  0x44   :  { %v5238_v29 = vld [vmem:[#allocation7 + $0xac] sm:$0xf0]  ;;  %v4035_v30 = vor.u32 %v5278_v23, %v4034_v22  ;;  %v4018_v31 = vld [vmem:[#allocation7 + $0x1c0] sm:$0xf]  ;;  %v3684_v42 = vld [vmem:[#allocation2 + $0x38] sm:$0xf0] }
  0x45   :  { %613 = vmatpush.bf16.msrb.mxu3 %v3703_v61  ;;  %v5274_v32 = vld [vmem:[#allocation7 + $0x1cc] sm:$0xf0]  ;;  %v4162_v33 = vld [vmem:[#allocation7 + $0x2e0] sm:$0xf]  ;;  %v3875_v38 = vor.u32 %v5238_v29, %v3874_v27  ;;  %s3568_s14 = sshll.u32 %s6124_s13, 4  ;;  %s3569_s14 = int_to_ptr.hbm [resolvable:$true] %s3568_s14 }
  0x46   :  { %639 = vmatpush.bf16.msrb.mxu1 %v3775_v41  ;;  %v5310_v34 = vld [vmem:[#allocation7 + $0x2ec] sm:$0xf0]  ;;  %v4019_v35 = vor.u32 %v5274_v32, %v4018_v31  ;;  %v3858_v39 = vld [vmem:[#allocation7 + $0x80] sm:$0xf]  ;;  %v5171_v41 = vld [vmem:[#allocation2 + $0x1c] sm:$0xf] }
  0x47   :  { %627 = vmatpush.bf16.msra.mxu0 %v3707_v47  ;;  %653 = vmatpush.bf16.msrb.mxu2 %v3779_v49  ;;  %v4163_v36 = vor.u32 %v5310_v34, %v4162_v33  ;;  %v5234_v40 = vld [vmem:[#allocation7 + $0x8c] sm:$0xf0]  ;;  %v3842_v44 = vld [vmem:[#allocation7 + $0x60] sm:$0xf]  ;;  %v3687_v46 = vor.u32 %v5171_v41, %v3684_v42 }
  0x48   :  { %v3859_v43 = vor.u32 %v5234_v40, %v3858_v39  ;;  %v5230_v45 = vld [vmem:[#allocation7 + $0x6c] sm:$0xf0]  ;;  %v3826_v48 = vld [vmem:[#allocation7 + $0x40] sm:$0xf] }
  0x49   :  { %614 = vmatpush.bf16.msrb.mxu3 %v3671_v10  ;;  %v3843_v47 = vor.u32 %v5230_v45, %v3842_v44  ;;  %v5226_v49 = vld [vmem:[#allocation7 + $0x4c] sm:$0xf0]  ;;  %v3810_v51 = vld [vmem:[#allocation7 + $0x20] sm:$0xf] }
  0x4a   :  { %640 = vmatpush.bf16.msrb.mxu1 %v3743_v54  ;;  %v3827_v50 = vor.u32 %v5226_v49, %v3826_v48  ;;  %v5222_v52 = vld [vmem:[#allocation7 + $0x2c] sm:$0xf0]  ;;  %v4002_v53 = vld [vmem:[#allocation7 + $0x1a0] sm:$0xf] }
  0x4b   :  { %628 = vmatpush.bf16.msra.mxu0 %v3675_v59  ;;  %654 = vmatpush.bf16.msrb.mxu2 %v3747_v60  ;;  %v3811_v54 = vor.u32 %v5222_v52, %v3810_v51  ;;  %v5270_v55 = vld [vmem:[#allocation7 + $0x1ac] sm:$0xf0]  ;;  %v4146_v57 = vld [vmem:[#allocation7 + $0x2c0] sm:$0xf] }
  0x4c   :  { %3655 = vmatmul.msk.bf16.vlgmr.msra.gmra.mxu3 %vm285_vm0, %v5896_v26  ;;  %3785 = vmatmul.msk.bf16.vlgmr.msra.gmra.mxu1 %vm561_vm1, %v5912_v28  ;;  %v5179_v26 = vld [vmem:[#allocation2 + $0x5c] sm:$0xf]  ;;  %v4003_v56 = vor.u32 %v5270_v55, %v4002_v53  ;;  %v5306_v58 = vld [vmem:[#allocation7 + $0x2cc] sm:$0xf0]  ;;  %v3794_v60 = vld [vmem:[#allocation7] sm:$0xf] }
  0x4d   :  { %3786 = vmatmul.msk.bf16.vlgmr.msra.gmra.mxu2 %vm561_vm1, %v5912_v28  ;;  %667 = vmatpush.bf16.msra.mxu3 %v3783_v13  ;;  %v3719_v37 = vor.u32 %v5179_v26, %v3716_v21  ;;  %v4147_v59 = vor.u32 %v5306_v58, %v4146_v57  ;;  %v5218_v61 = vld [vmem:[#allocation7 + $0xc] sm:$0xf0]  ;;  %v3986_v62 = vld [vmem:[#allocation7 + $0x180] sm:$0xf] }
  0x4e   :  { %641 = vmatpush.bf16.msrb.mxu1 %v3711_v0  ;;  %3788 = vmatmul.msk.bf16.vlgmr.msra.gmra.mxu0 %vm561_vm1, %v5912_v28  ;;  %v3795_v63 = vor.u32 %v5218_v61, %v3794_v60  ;;  %v5266_v0 = vld [vmem:[#allocation7 + $0x18c] sm:$0xf0]  ;;  %v4130_v4 = vld [vmem:[#allocation7 + $0x2a0] sm:$0xf] }
  0x4f   :  { %655 = vmatpush.bf16.msrb.mxu2 %v3715_v1  ;;  %2313 = vmatpush.bf16.msrb.mxu0 %v3907_v18  ;;  %v4418_v1 = vld [vmem:[#allocation7 + $0x4e0] sm:$0xf]  ;;  %v5374_v2 = vld [vmem:[#allocation7 + $0x4ec] sm:$0xf0] }
  0x50   :  { %v4419_v3 = vor.u32 %v5374_v2, %v4418_v1  ;;  %v5302_v5 = vld [vmem:[#allocation7 + $0x2ac] sm:$0xf0]  ;;  %v3970_v7 = vld [vmem:[#allocation7 + $0x160] sm:$0xf] }
  0x51   :  { %668 = vmatpush.bf16.msra.mxu3 %v3751_v24  ;;  %v4131_v6 = vor.u32 %v5302_v5, %v4130_v4  ;;  %v5262_v8 = vld [vmem:[#allocation7 + $0x16c] sm:$0xf0]  ;;  %v4402_v10 = vld [vmem:[#allocation7 + $0x4c0] sm:$0xf] }
  0x52   :  { %642 = vmatpush.bf16.msrb.mxu1 %v3679_v11  ;;  %v3971_v9 = vor.u32 %v5262_v8, %v3970_v7  ;;  %v5370_v11 = vld [vmem:[#allocation7 + $0x4cc] sm:$0xf0]  ;;  %v4114_v13 = vld [vmem:[#allocation7 + $0x280] sm:$0xf] }
  0x53   :  { %656 = vmatpush.bf16.msrb.mxu2 %v3683_v12  ;;  %2314 = vmatpush.bf16.msrb.mxu0 %v3891_v25  ;;  %v4403_v12 = vor.u32 %v5370_v11, %v4402_v10  ;;  %v5298_v14 = vld [vmem:[#allocation7 + $0x28c] sm:$0xf0]  ;;  %v3954_v16 = vld [vmem:[#allocation7 + $0x140] sm:$0xf] }
  0x54   :  { %v4115_v15 = vor.u32 %v5298_v14, %v4114_v13  ;;  %v5258_v17 = vld [vmem:[#allocation7 + $0x14c] sm:$0xf0]  ;;  %v4386_v18 = vld [vmem:[#allocation7 + $0x4a0] sm:$0xf] }
  0x55   :  { %669 = vmatpush.bf16.msra.mxu3 %v3719_v37  ;;  %v3955_v19 = vor.u32 %v5258_v17, %v3954_v16  ;;  %v5366_v20 = vld [vmem:[#allocation7 + $0x4ac] sm:$0xf0]  ;;  %v4098_v21 = vld [vmem:[#allocation7 + $0x260] sm:$0xf] }
  0x56   :  { %2327 = vmatpush.bf16.msra.mxu1 %v4035_v30  ;;  %v4387_v26 = vor.u32 %v5366_v20, %v4386_v18  ;;  %v5294_v22 = vld [vmem:[#allocation7 + $0x26c] sm:$0xf0]  ;;  %v4290_v23 = vld [vmem:[#allocation7 + $0x3e0] sm:$0xf] }
  0x57   :  { %2341 = vmatpush.bf16.msra.mxu2 %v4163_v36  ;;  %2315 = vmatpush.bf16.msrb.mxu0 %v3875_v38  ;;  %v4099_v24 = vor.u32 %v5294_v22, %v4098_v21  ;;  %v5342_v25 = vld [vmem:[#allocation7 + $0x3ec] sm:$0xf0]  ;;  %v3938_v29 = vld [vmem:[#allocation7 + $0x120] sm:$0xf] }
  0x58   :  { %v4291_v27 = vor.u32 %v5342_v25, %v4290_v23  ;;  %v5254_v30 = vld [vmem:[#allocation7 + $0x12c] sm:$0xf0]  ;;  %v4370_v32 = vld [vmem:[#allocation7 + $0x480] sm:$0xf] }
  0x59   :  { %670 = vmatpush.bf16.msra.mxu3 %v3687_v46  ;;  %v3939_v31 = vor.u32 %v5254_v30, %v3938_v29  ;;  %v5362_v33 = vld [vmem:[#allocation7 + $0x48c] sm:$0xf0]  ;;  %v4274_v37 = vld [vmem:[#allocation7 + $0x3c0] sm:$0xf] }
  0x5a   :  { %2328 = vmatpush.bf16.msra.mxu1 %v4019_v35  ;;  %v4371_v34 = vor.u32 %v5362_v33, %v4370_v32  ;;  %v4082_v35 = vld [vmem:[#allocation7 + $0x240] sm:$0xf]  ;;  %v5290_v36 = vld [vmem:[#allocation7 + $0x24c] sm:$0xf0] }
  0x5b   :  { %2316 = vmatpush.bf16.msrb.mxu0 %v3859_v43  ;;  %2342 = vmatpush.bf16.msra.mxu2 %v4147_v59  ;;  %v4083_v38 = vor.u32 %v5290_v36, %v4082_v35  ;;  %v5338_v39 = vld [vmem:[#allocation7 + $0x3cc] sm:$0xf0]  ;;  %v3922_v41 = vld [vmem:[#allocation7 + $0x100] sm:$0xf] }
  0x5c   :  { %3787 = vmatmul.msk.bf16.vlgmr.msrb.gmra.mxu3 %vm561_vm1, %v5912_v28  ;;  %3789 = vmatmul.msk.bf16.vlgmr.msrb.gmra.mxu1 %vm561_vm1, %v5912_v28  ;;  %v4275_v40 = vor.u32 %v5338_v39, %v4274_v37  ;;  %v5250_v42 = vld [vmem:[#allocation7 + $0x10c] sm:$0xf0]  ;;  %v4354_v44 = vld [vmem:[#allocation7 + $0x460] sm:$0xf] }
  0x5d   :  { %3790 = vmatmul.msk.bf16.vlgmr.msrb.gmra.mxu2 %vm561_vm1, %v5912_v28  ;;  %2355 = vmatpush.bf16.msrb.mxu3 %v4291_v27  ;;  %v3923_v43 = vor.u32 %v5250_v42, %v3922_v41  ;;  %v5358_v45 = vld [vmem:[#allocation7 + $0x46c] sm:$0xf0]  ;;  %v4546_v46 = vld [vmem:[#allocation7 + $0x5e0] sm:$0xf] }
  0x5e   :  { %2329 = vmatpush.bf16.msra.mxu1 %v4003_v56  ;;  %v5406_v48 = vld [vmem:[#allocation7 + $0x5ec] sm:$0xf0]  ;;  %v4066_v49 = vld [vmem:[#allocation7 + $0x220] sm:$0xf] }
  0x5f   :  { %2317 = vmatpush.bf16.msrb.mxu0 %v3843_v47  ;;  %2343 = vmatpush.bf16.msra.mxu2 %v4131_v6  ;;  %v4355_v47 = vor.u32 %v5358_v45, %v4354_v44  ;;  %v4547_v51 = vor.u32 %v5406_v48, %v4546_v46  ;;  %v4258_v53 = vld [vmem:[#allocation7 + $0x3a0] sm:$0xf]  ;;  %v5354_v57 = vld [vmem:[#allocation7 + $0x44c] sm:$0xf0] }
  0x60   :  { %v4338_v56 = vld [vmem:[#allocation7 + $0x440] sm:$0xf]  ;;  %v5402_v60 = vld [vmem:[#allocation7 + $0x5cc] sm:$0xf0] }
  0x61   :  { %2356 = vmatpush.bf16.msrb.mxu3 %v4275_v40  ;;  %v4530_v58 = vld [vmem:[#allocation7 + $0x5c0] sm:$0xf]  ;;  %v4339_v59 = vor.u32 %v5354_v57, %v4338_v56  ;;  %v5330_v2 = vld [vmem:[#allocation7 + $0x38c] sm:$0xf0] }
  0x62   :  { %v4050_v61 = vld [vmem:[#allocation7 + $0x200] sm:$0xf]  ;;  %v5438_v4 = vld [vmem:[#allocation7 + $0x6ec] sm:$0xf0] }
  0x63   :  { %2318 = vmatpush.bf16.msrb.mxu0 %v3827_v50  ;;  %2344 = vmatpush.bf16.msra.mxu2 %v4115_v15  ;;  %v5286_v50 = vld [vmem:[#allocation7 + $0x22c] sm:$0xf0]  ;;  %v4242_v1 = vld [vmem:[#allocation7 + $0x380] sm:$0xf] }
  0x64   :  { %v4067_v52 = vor.u32 %v5286_v50, %v4066_v49  ;;  %v4322_v6 = vld [vmem:[#allocation7 + $0x420] sm:$0xf]  ;;  %v5350_v7 = vld [vmem:[#allocation7 + $0x42c] sm:$0xf0] }
  0x65   :  { %v4514_v8 = vld [vmem:[#allocation7 + $0x5a0] sm:$0xf]  ;;  %v5398_v10 = vld [vmem:[#allocation7 + $0x5ac] sm:$0xf0] }
  0x66   :  { %v4226_v11 = vld [vmem:[#allocation7 + $0x360] sm:$0xf]  ;;  %v4515_v13 = vor.u32 %v5398_v10, %v4514_v8  ;;  %v5434_v16 = vld [vmem:[#allocation7 + $0x6cc] sm:$0xf0] }
  0x67   :  { %2319 = vmatpush.bf16.msrb.mxu0 %v3811_v54  ;;  %2345 = vmatpush.bf16.msra.mxu2 %v4099_v24  ;;  %v5334_v54 = vld [vmem:[#allocation7 + $0x3ac] sm:$0xf0]  ;;  %v4658_v15 = vld [vmem:[#allocation7 + $0x6c0] sm:$0xf] }
  0x68   :  { %v4259_v55 = vor.u32 %v5334_v54, %v4258_v53  ;;  %v4659_v17 = vor.u32 %v5434_v16, %v4658_v15  ;;  %v4306_v18 = vld [vmem:[#allocation7 + $0x400] sm:$0xf]  ;;  %v5394_v22 = vld [vmem:[#allocation7 + $0x58c] sm:$0xf0] }
  0x69   :  { %v4498_v20 = vld [vmem:[#allocation7 + $0x580] sm:$0xf]  ;;  %v5322_v24 = vld [vmem:[#allocation7 + $0x34c] sm:$0xf0] }
  0x6a   :  { %2357 = vmatpush.bf16.msrb.mxu3 %v4259_v55  ;;  %v4210_v23 = vld [vmem:[#allocation7 + $0x340] sm:$0xf]  ;;  %v4499_v27 = vor.u32 %v5394_v22, %v4498_v20  ;;  %v5426_v42 = vld [vmem:[#allocation7 + $0x68c] sm:$0xf0] }
  0x6b   :  { %2320 = vmatpush.bf16.msrb.mxu0 %v3795_v63  ;;  %2346 = vmatpush.bf16.msra.mxu2 %v4083_v38  ;;  %v4531_v63 = vor.u32 %v5402_v60, %v4530_v58  ;;  %v4211_v29 = vor.u32 %v5322_v24, %v4210_v23  ;;  %v4642_v30 = vld [vmem:[#allocation7 + $0x6a0] sm:$0xf]  ;;  %v5318_v38 = vld [vmem:[#allocation7 + $0x32c] sm:$0xf0] }
  0x6c   :  { %3791 = vmatmul.msk.bf16.vlgmr.msra.gmra.mxu3 %vm561_vm1, %v5912_v28  ;;  %v3987_v28 = vor.u32 %v5266_v0, %v3986_v62  ;;  %v5282_v62 = vld [vmem:[#allocation7 + $0x20c] sm:$0xf0]  ;;  %v4482_v33 = vld [vmem:[#allocation7 + $0x560] sm:$0xf] }
  0x6d   :  { %v4051_v0 = vor.u32 %v5282_v62, %v4050_v61  ;;  %v4194_v37 = vld [vmem:[#allocation7 + $0x320] sm:$0xf]  ;;  %v5386_v46 = vld [vmem:[#allocation7 + $0x54c] sm:$0xf0] }
  0x6e   :  { %2330 = vmatpush.bf16.msra.mxu1 %v3987_v28  ;;  %v4674_v28 = vld [vmem:[#allocation7 + $0x6e0] sm:$0xf]  ;;  %v4195_v40 = vor.u32 %v5318_v38, %v4194_v37  ;;  %v5314_v50 = vld [vmem:[#allocation7 + $0x30c] sm:$0xf0] }
  0x6f   :  { %2369 = vmatpush.bf16.msra.mxu0 %v4419_v3  ;;  %2347 = vmatpush.bf16.msra.mxu2 %v4067_v52  ;;  %v4243_v3 = vor.u32 %v5330_v2, %v4242_v1  ;;  %v4675_v5 = vor.u32 %v5438_v4, %v4674_v28  ;;  %v4626_v41 = vld [vmem:[#allocation7 + $0x680] sm:$0xf]  ;;  %v5422_v53 = vld [vmem:[#allocation7 + $0x66c] sm:$0xf0] }
  0x70   :  { %v4627_v44 = vor.u32 %v5426_v42, %v4626_v41  ;;  %v4466_v45 = vld [vmem:[#allocation7 + $0x540] sm:$0xf]  ;;  %v5470_v56 = vld [vmem:[#allocation7 + $0x7ec] sm:$0xf0]  ;;  %v3908_v41 = vld [vmem:[#allocation7 + $0xf0] sm:$0xf0] }
  0x71   :  { %2358 = vmatpush.bf16.msrb.mxu3 %v4243_v3  ;;  %v4467_v48 = vor.u32 %v5386_v46, %v4466_v45  ;;  %v4178_v49 = vld [vmem:[#allocation7 + $0x300] sm:$0xf]  ;;  %v5466_v28 = vld [vmem:[#allocation7 + $0x7cc] sm:$0xf0] }
  0x72   :  { %2331 = vmatpush.bf16.msra.mxu1 %v3971_v9  ;;  %v4323_v9 = vor.u32 %v5350_v7, %v4322_v6  ;;  %v4610_v52 = vld [vmem:[#allocation7 + $0x660] sm:$0xf]  ;;  %v5378_v6 = vld [vmem:[#allocation7 + $0x50c] sm:$0xf0] }
  0x73   :  { %2370 = vmatpush.bf16.msra.mxu0 %v4403_v12  ;;  %2348 = vmatpush.bf16.msra.mxu2 %v4051_v0  ;;  %v5326_v12 = vld [vmem:[#allocation7 + $0x36c] sm:$0xf0]  ;;  %v4611_v54 = vor.u32 %v5422_v53, %v4610_v52  ;;  %v4802_v55 = vld [vmem:[#allocation7 + $0x7e0] sm:$0xf] }
  0x74   :  { %v4227_v14 = vor.u32 %v5326_v12, %v4226_v11  ;;  %v4803_v57 = vor.u32 %v5470_v56, %v4802_v55  ;;  %v4450_v58 = vld [vmem:[#allocation7 + $0x520] sm:$0xf]  ;;  %v5418_v0 = vld [vmem:[#allocation7 + $0x64c] sm:$0xf0]  ;;  %v5240_v55 = vld [vmem:[#allocation7 + $0xc4] sm:$0xf] }
  0x75   :  { %v4786_v1 = vld [vmem:[#allocation7 + $0x7c0] sm:$0xf]  ;;  %v5414_v11 = vld [vmem:[#allocation7 + $0x62c] sm:$0xf0]  ;;  %v3892_v56 = vld [vmem:[#allocation7 + $0xd0] sm:$0xf0] }
  0x76   :  { %2332 = vmatpush.bf16.msra.mxu1 %v3955_v19  ;;  %v5346_v19 = vld [vmem:[#allocation7 + $0x40c] sm:$0xf0]  ;;  %2359 = vmatpush.bf16.msrb.mxu3 %v4227_v14  ;;  %v4787_v4 = vor.u32 %v5466_v28, %v4786_v1  ;;  %v5955_v8 = vld [vmem:[%s6115_s4] sm:$0xff]  ;;  %v3895_v1 = vor.u32 %v5240_v55, %v3892_v56 }
  0x77   :  { %2371 = vmatpush.bf16.msra.mxu0 %v4387_v26  ;;  %2397 = vmatpush.bf16.msrb.mxu2 %v4675_v5  ;;  %v4307_v21 = vor.u32 %v5346_v19, %v4306_v18  ;;  %v4434_v5 = vld [vmem:[#allocation7 + $0x500] sm:$0xf]  ;;  %v5462_v14 = vld [vmem:[#allocation7 + $0x7ac] sm:$0xf0]  ;;  %v679_v16 = vperm.slane %v5955_v8, 0 }
  0x78   :  { %v4578_v10 = vld [vmem:[#allocation7 + $0x620] sm:$0xf]  ;;  %v5450_v46 = vld [vmem:[#allocation7 + $0x74c] sm:$0xf0]  ;;  %v5236_v28 = vld [vmem:[#allocation7 + $0xa4] sm:$0xf] }
  0x79   :  { %v4579_v12 = vor.u32 %v5414_v11, %v4578_v10  ;;  %v4562_v20 = vld [vmem:[#allocation7 + $0x600] sm:$0xf]  ;;  %v5224_v56 = vld [vmem:[#allocation7 + $0x44] sm:$0xf] }
  0x7a   :  { %2333 = vmatpush.bf16.msra.mxu1 %v3939_v31  ;;  %v5430_v31 = vld [vmem:[#allocation7 + $0x6ac] sm:$0xf0]  ;;  %2360 = vmatpush.bf16.msrb.mxu3 %v4211_v29  ;;  %v4722_v45 = vld [vmem:[#allocation7 + $0x740] sm:$0xf] }
  0x7b   :  { %2372 = vmatpush.bf16.msra.mxu0 %v4371_v34  ;;  %2398 = vmatpush.bf16.msrb.mxu2 %v4659_v17  ;;  %v4643_v32 = vor.u32 %v5430_v31, %v4642_v30  ;;  %v5390_v34 = vld [vmem:[#allocation7 + $0x56c] sm:$0xf0]  ;;  %v4723_v52 = vor.u32 %v5450_v46, %v4722_v45 }
  0x7c   :  { %v4483_v36 = vor.u32 %v5390_v34, %v4482_v33  ;;  %v5458_v29 = vld [vmem:[#allocation7 + $0x78c] sm:$0xf0]  ;;  %v4738_v33 = vld [vmem:[#allocation7 + $0x760] sm:$0xf] }
  0x7d   :  { %v5454_v34 = vld [vmem:[#allocation7 + $0x76c] sm:$0xf0] }
  0x7e   :  { %2334 = vmatpush.bf16.msra.mxu1 %v3923_v43  ;;  %2361 = vmatpush.bf16.msrb.mxu3 %v4195_v40  ;;  %v4739_v37 = vor.u32 %v5454_v34, %v4738_v33  ;;  %v5244_v40 = vld [vmem:[#allocation7 + $0xe4] sm:$0xf]  ;;  %v3844_v34 = vld [vmem:[#allocation7 + $0x70] sm:$0xf0] }
  0x7f   :  { %2373 = vmatpush.bf16.msra.mxu0 %v4355_v47  ;;  %2399 = vmatpush.bf16.msrb.mxu2 %v4643_v32 }
  0x82   :  { %2383 = vmatpush.bf16.msrb.mxu1 %v4547_v51  ;;  %v4179_v51 = vor.u32 %v5314_v50, %v4178_v49 }
  0x83   :  { %2374 = vmatpush.bf16.msra.mxu0 %v4339_v59  ;;  %2400 = vmatpush.bf16.msrb.mxu2 %v4627_v44  ;;  %v5382_v59 = vld [vmem:[#allocation7 + $0x52c] sm:$0xf0] }
  0x84   :  { %2362 = vmatpush.bf16.msrb.mxu3 %v4179_v51  ;;  %v4451_v61 = vor.u32 %v5382_v59, %v4450_v58  ;;  %v3911_v51 = vor.u32 %v5244_v40, %v3908_v41  ;;  %v5446_v58 = vld [vmem:[#allocation7 + $0x72c] sm:$0xf0] }
  0x86   :  { %2384 = vmatpush.bf16.msrb.mxu1 %v4531_v63  ;;  %v4594_v63 = vld [vmem:[#allocation7 + $0x640] sm:$0xf] }
  0x87   :  { %2375 = vmatpush.bf16.msra.mxu0 %v4323_v9  ;;  %2401 = vmatpush.bf16.msrb.mxu2 %v4611_v54  ;;  %v4595_v2 = vor.u32 %v5418_v0, %v4594_v63  ;;  %v4435_v9 = vor.u32 %v5378_v6, %v4434_v5  ;;  %v683_v0 = vperm.slane %v5955_v8, 4 }
  0x88   :  { %2411 = vmatpush.bf16.msra.mxu3 %v4803_v57  ;;  %v4706_v57 = vld [vmem:[#allocation7 + $0x720] sm:$0xf] }
  0x8a   :  { %2385 = vmatpush.bf16.msrb.mxu1 %v4515_v13  ;;  %v4770_v13 = vld [vmem:[#allocation7 + $0x7a0] sm:$0xf] }
  0x8b   :  { %2376 = vmatpush.bf16.msra.mxu0 %v4307_v21  ;;  %2402 = vmatpush.bf16.msrb.mxu2 %v4595_v2  ;;  %v4771_v17 = vor.u32 %v5462_v14, %v4770_v13  ;;  %v5410_v21 = vld [vmem:[#allocation7 + $0x60c] sm:$0xf0]  ;;  %v681_v13 = vperm.slane %v5955_v8, 2 }
  0x8c   :  { %2412 = vmatpush.bf16.msra.mxu3 %v4787_v4  ;;  %v4563_v24 = vor.u32 %v5410_v21, %v4562_v20  ;;  %v3876_v4 = vld [vmem:[#allocation7 + $0xb0] sm:$0xf0] }
  0x8d   :  { %v3879_v11 = vor.u32 %v5236_v28, %v3876_v4  ;;  %v4004_v28 = vld [vmem:[#allocation7 + $0x1b0] sm:$0xf0] }
  0x8e   :  { %2386 = vmatpush.bf16.msrb.mxu1 %v4499_v27  ;;  %v4754_v27 = vld [vmem:[#allocation7 + $0x780] sm:$0xf] }
  0x8f   :  { %2403 = vmatpush.bf16.msrb.mxu2 %v4579_v12  ;;  %v4755_v31 = vor.u32 %v5458_v29, %v4754_v27  ;;  %v5276_v27 = vld [vmem:[#allocation7 + $0x1e4] sm:$0xf] }
  0x90   :  { %2413 = vmatpush.bf16.msra.mxu3 %v4771_v17  ;;  %v3860_v17 = vld [vmem:[#allocation7 + $0x90] sm:$0xf0] }
  0x92   :  { %2387 = vmatpush.bf16.msrb.mxu1 %v4483_v36 }
  0x93   :  { %2404 = vmatpush.bf16.msrb.mxu2 %v4563_v24  ;;  %v5228_v24 = vld [vmem:[#allocation7 + $0x64] sm:$0xf] }
  0x94   :  { %2414 = vmatpush.bf16.msra.mxu3 %v4755_v31 }
  0x96   :  { %2388 = vmatpush.bf16.msrb.mxu1 %v4467_v48 }
  0x98   :  { %2415 = vmatpush.bf16.msra.mxu3 %v4739_v37 }
  0x9a   :  { %2389 = vmatpush.bf16.msrb.mxu1 %v4451_v61  ;;  %v4707_v61 = vor.u32 %v5446_v58, %v4706_v57  ;;  %v3828_v57 = vld [vmem:[#allocation7 + $0x50] sm:$0xf0]  ;;  %v684_v58 = vperm.slane %v5955_v8, 5 }
  0x9c   :  { %2416 = vmatpush.bf16.msra.mxu3 %v4723_v52 }
  0x9e   :  { %2390 = vmatpush.bf16.msrb.mxu1 %v4435_v9 }
  0xa0   :  { %2417 = vmatpush.bf16.msra.mxu3 %v4707_v61 }
  0xa9   :  { %v5938_v26 = vpop.f32.mrf.mxu1 }
  0xab   :  { %v5940_v25 = vpop.f32.mrf.mxu0 }
  0xaf   :  { %v298_v35 = vpop.f32.mrf.mxu3 }
  0xb0   :  { %v5942_v39 = vpop.f32.mrf.mxu2 }
  0xb1   :  { %v5944_v43 = vpop.f32.mrf.mxu1 }
  0xb3   :  { %v5946_v47 = vpop.f32.mrf.mxu0 }
  0xb7   :  { %v300_v60 = vpop.f32.mrf.mxu3 }
  0xb8   :  { %v5948_v62 = vpop.f32.mrf.mxu2 }
  0xb9   :  { %v5950_v3 = vpop.f32.mrf.mxu1 }
  0xbb   :  { %v574_v7 = vpop.f32.mrf.mxu0 }
  0xbc   :  { %v575_v15 = vadd.f32 %v574_v7, %v298_v35  ;;  %v5442_v7 = vld [vmem:[#allocation7 + $0x70c] sm:$0xf0] }
  0xbe   :  { %v695_v22 = vadd.f32 %v679_v16, %v575_v15 }
  0xbf   :  { %v5958_v18 = vpop.f32.mrf.mxu3 }
  0xc0   :  { %v5960_v19 = vpop.f32.mrf.mxu2  ;;  %v727_v35 = vmul.f32 0.02, %v695_v22  ;;  %vm711_vm2 = vcmp.gt.f32.partialorder %v695_v22, 0.0 }
  0xc1   :  { %v5962_v23 = vpop.f32.mrf.mxu1 }
  0xc2   :  { %v743_v48 = vsel %vm711_vm2, %v695_v22, %v727_v35 }
  0xc3   :  { %v576_v30 = vpop.f32.mrf.mxu0 }
  0xc4   :  { %v577_v32 = vadd.f32 %v576_v30, %v300_v60  ;;  %v680_v60 = vperm.slane %v5955_v8, 1 }
  0xc6   :  { %v703_v36 = vadd.f32 %v679_v16, %v577_v32  ;;  %v5232_v16 = vld [vmem:[#allocation7 + $0x84] sm:$0xf] }
  0xc7   :  { %v5964_v38 = vpop.f32.mrf.mxu3  ;;  %v3863_v31 = vor.u32 %v5232_v16, %v3860_v17 }
  0xc8   :  { %vm719_vm3 = vcmp.gt.f32.partialorder %v703_v36, 0.0  ;;  %v735_v42 = vmul.f32 0.02, %v703_v36  ;;  %v5966_v44 = vpop.f32.mrf.mxu2 }
  0xc9   :  { %v588_v50 = vpop.f32.mrf.mxu1 }
  0xca   :  { %v751_v49 = vsel %vm719_vm3, %v703_v36, %v735_v42  ;;  %v589_v59 = vadd.f32 %v588_v50, %v5938_v26  ;;  %v4690_v26 = vld [vmem:[#allocation7 + $0x700] sm:$0xf]  ;;  %v5272_v50 = vld [vmem:[#allocation7 + $0x1c4] sm:$0xf] }
  0xcb   :  { %v630_v53 = vpop.f32.mrf.mxu0  ;;  %v5968_v54 = vpack.c.bf16 %v751_v49, %v743_v48  ;;  %v4691_v12 = vor.u32 %v5442_v7, %v4690_v26  ;;  %v3847_v49 = vor.u32 %v5228_v24, %v3844_v34  ;;  %v5220_v7 = vld [vmem:[#allocation7 + $0x24] sm:$0xf]  ;;  %v3988_v24 = vld [vmem:[#allocation7 + $0x190] sm:$0xf0] }
  0xcc   :  { %v631_v63 = vadd.f32 %v630_v53, %v5940_v25  ;;  %v696_v6 = vadd.f32 %v680_v60, %v589_v59  ;;  %v4164_v59 = vld [vmem:[#allocation7 + $0x2f0] sm:$0xf0] }
  0xcd   :  { %2321 = vmatmul.bf16.vlgmr.msrb.gmra.mxu0 %v5968_v54  ;;  %2418 = vmatpush.bf16.msra.mxu3 %v4691_v12  ;;  %v5304_v12 = vld [vmem:[#allocation7 + $0x2c4] sm:$0xf]  ;;  %v4132_v34 = vld [vmem:[#allocation7 + $0x2b0] sm:$0xf0] }
  0xce   :  { %2425 = vmatpush.bf16.msrb.mxu0 %v3911_v51  ;;  %v699_v9 = vadd.f32 %v683_v0, %v631_v63  ;;  %v728_v21 = vmul.f32 0.02, %v696_v6  ;;  %vm712_vm4 = vcmp.gt.f32.partialorder %v696_v6, 0.0  ;;  %v4020_v51 = vld [vmem:[#allocation7 + $0x1d0] sm:$0xf0] }
  0xcf   :  { %v5975_v2 = vpop.f32.mrf.mxu3  ;;  %v4023_v63 = vor.u32 %v5272_v50, %v4020_v51  ;;  %v5296_v51 = vld [vmem:[#allocation7 + $0x284] sm:$0xf] }
  0xd0   :  { %v602_v5 = vpop.f32.mrf.mxu2  ;;  %v731_v29 = vmul.f32 0.02, %v699_v9  ;;  %vm715_vm5 = vcmp.gt.f32.partialorder %v699_v9, 0.0  ;;  %v744_v36 = vsel %vm712_vm4, %v696_v6, %v728_v21  ;;  %v5216_v21 = vld [vmem:[#allocation7 + $0x4] sm:$0xf] }
  0xd1   :  { %v590_v10 = vpop.f32.mrf.mxu1  ;;  %v603_v25 = vadd.f32 %v602_v5, %v5942_v39  ;;  %v4036_v39 = vld [vmem:[#allocation7 + $0x1f0] sm:$0xf0] }
  0xd2   :  { %2426 = vmatpush.bf16.msrb.mxu0 %v3895_v1  ;;  %v591_v14 = vadd.f32 %v590_v10, %v5944_v43  ;;  %v4039_v41 = vor.u32 %v5276_v27, %v4036_v39  ;;  %v747_v42 = vsel %vm715_vm5, %v699_v9, %v731_v29  ;;  %v5268_v1 = vld [vmem:[#allocation7 + $0x1a4] sm:$0xf]  ;;  %v3812_v9 = vld [vmem:[#allocation7 + $0x30] sm:$0xf0] }
  0xd3   :  { %v632_v15 = vpop.f32.mrf.mxu0  ;;  %v697_v32 = vadd.f32 %v681_v13, %v603_v25  ;;  %v4148_v25 = vld [vmem:[#allocation7 + $0x2d0] sm:$0xf0]  ;;  %v5372_v39 = vld [vmem:[#allocation7 + $0x4e4] sm:$0xf] }
  0xd4   :  { %v633_v20 = vadd.f32 %v632_v15, %v5946_v47  ;;  %v704_v22 = vadd.f32 %v680_v60, %v591_v14  ;;  %v685_v14 = vperm.slane %v5955_v8, 6  ;;  %v4007_v15 = vor.u32 %v5268_v1, %v4004_v28  ;;  %v5292_v1 = vld [vmem:[#allocation7 + $0x264] sm:$0xf] }
  0xd5   :  { %v729_v52 = vmul.f32 0.02, %v697_v32  ;;  %vm713_vm8 = vcmp.gt.f32.partialorder %v697_v32, 0.0 }
  0xd6   :  { %v707_v30 = vadd.f32 %v683_v0, %v633_v20  ;;  %2427 = vmatpush.bf16.msrb.mxu0 %v3879_v11  ;;  %vm720_vm6 = vcmp.gt.f32.partialorder %v704_v22, 0.0  ;;  %v736_v43 = vmul.f32 0.02, %v704_v22  ;;  %v3831_v0 = vor.u32 %v5224_v56, %v3828_v57  ;;  %v4116_v56 = vld [vmem:[#allocation7 + $0x290] sm:$0xf0] }
  0xd7   :  { %v5981_v33 = vpop.f32.mrf.mxu3  ;;  %v745_v4 = vsel %vm713_vm8, %v697_v32, %v729_v52  ;;  %v3815_v20 = vor.u32 %v5220_v7, %v3812_v9  ;;  %v4420_v32 = vld [vmem:[#allocation7 + $0x4f0] sm:$0xf0]  ;;  %v5256_v57 = vld [vmem:[#allocation7 + $0x144] sm:$0xf] }
  0xd8   :  { %vm723_vm7 = vcmp.gt.f32.partialorder %v707_v30, 0.0  ;;  %v739_v47 = vmul.f32 0.02, %v707_v30  ;;  %v604_v35 = vpop.f32.mrf.mxu2  ;;  %v752_v37 = vsel %vm720_vm6, %v704_v22, %v736_v43  ;;  %v5264_v22 = vld [vmem:[#allocation7 + $0x184] sm:$0xf] }
  0xd9   :  { %v605_v40 = vadd.f32 %v604_v35, %v5948_v62  ;;  %v644_v46 = vpop.f32.mrf.mxu1  ;;  %v5984_v48 = vpack.c.bf16 %v752_v37, %v744_v36  ;;  %v5308_v62 = vld [vmem:[#allocation7 + $0x2e4] sm:$0xf]  ;;  %v3991_v35 = vor.u32 %v5264_v22, %v3988_v24  ;;  %v3972_v37 = vld [vmem:[#allocation7 + $0x170] sm:$0xf0] }
  0xda   :  { %v755_v45 = vsel %vm723_vm7, %v707_v30, %v739_v47  ;;  %2428 = vmatpush.bf16.msrb.mxu0 %v3863_v31  ;;  %v645_v61 = vadd.f32 %v644_v46, %v5950_v3  ;;  %v4167_v26 = vor.u32 %v5308_v62, %v4164_v59  ;;  %v4151_v30 = vor.u32 %v5304_v12, %v4148_v25  ;;  %v3796_v31 = vld [vmem:[#allocation7 + $0x10] sm:$0xf0]  ;;  %v5300_v43 = vld [vmem:[#allocation7 + $0x2a4] sm:$0xf] }
  0xdb   :  { %v705_v53 = vadd.f32 %v681_v13, %v605_v40  ;;  %v5986_v55 = vpack.c.bf16 %v755_v45, %v747_v42  ;;  %2335 = vmatmul.bf16.vlgmr.msra.gmra.mxu1 %v5984_v48  ;;  %v682_v13 = vperm.slane %v5955_v8, 3  ;;  %v5260_v36 = vld [vmem:[#allocation7 + $0x164] sm:$0xf]  ;;  %v4135_v50 = vor.u32 %v5300_v43, %v4132_v34  ;;  %v4372_v43 = vld [vmem:[#allocation7 + $0x490] sm:$0xf0] }
  0xdc   :  { %2439 = vmatpush.bf16.msra.mxu1 %v4039_v41  ;;  %v700_v3 = vadd.f32 %v684_v58, %v645_v61  ;;  %v3799_v41 = vor.u32 %v5216_v21, %v3796_v31  ;;  %v5368_v42 = vld [vmem:[#allocation7 + $0x4c4] sm:$0xf]  ;;  %v3975_v61 = vor.u32 %v5260_v36, %v3972_v37  ;;  %v3940_v21 = vld [vmem:[#allocation7 + $0x130] sm:$0xf0] }
  0xdd   :  { %vm721_vm9 = vcmp.gt.f32.partialorder %v705_v53, 0.0  ;;  %v737_v60 = vmul.f32 0.02, %v705_v53  ;;  %2377 = vmatmul.bf16.vlgmr.msra.gmra.mxu0 %v5986_v55  ;;  %v5336_v31 = vld [vmem:[#allocation7 + $0x3c4] sm:$0xf] }
  0xde   :  { %2429 = vmatpush.bf16.msrb.mxu0 %v3847_v49  ;;  %vm716_vm10 = vcmp.gt.f32.partialorder %v700_v3, 0.0  ;;  %v5288_v34 = vld [vmem:[#allocation7 + $0x244] sm:$0xf] }
  0xdf   :  { %v753_v5 = vsel %vm721_vm9, %v705_v53, %v737_v60  ;;  %v616_v6 = vpop.f32.mrf.mxu3  ;;  %v5248_v36 = vld [vmem:[#allocation7 + $0x104] sm:$0xf] }
  0xe0   :  { %v658_v10 = vpop.f32.mrf.mxu2  ;;  %v5992_v11 = vpack.c.bf16 %v753_v5, %v745_v4  ;;  %2440 = vmatpush.bf16.msra.mxu1 %v4023_v63  ;;  %v617_v16 = vadd.f32 %v616_v6, %v5958_v18  ;;  %v732_v18 = vmul.f32 0.02, %v700_v3  ;;  %v5364_v63 = vld [vmem:[#allocation7 + $0x4a4] sm:$0xf]  ;;  %v4100_v6 = vld [vmem:[#allocation7 + $0x270] sm:$0xf0] }
  0xe1   :  { %v646_v17 = vpop.f32.mrf.mxu1  ;;  %v659_v27 = vadd.f32 %v658_v10, %v5960_v19  ;;  %v4423_v19 = vor.u32 %v5372_v39, %v4420_v32  ;;  %v4119_v10 = vor.u32 %v5296_v51, %v4116_v56  ;;  %v4276_v39 = vld [vmem:[#allocation7 + $0x3d0] sm:$0xf0]  ;;  %v5284_v51 = vld [vmem:[#allocation7 + $0x224] sm:$0xf] }
  0xe2   :  { %2430 = vmatpush.bf16.msrb.mxu0 %v3831_v0  ;;  %2349 = vmatmul.bf16.vlgmr.msra.gmra.mxu2 %v5992_v11  ;;  %v647_v29 = vadd.f32 %v646_v17, %v5962_v23  ;;  %v698_v40 = vadd.f32 %v682_v13, %v617_v16  ;;  %v4404_v23 = vld [vmem:[#allocation7 + $0x4d0] sm:$0xf0]  ;;  %v748_v62 = vsel %vm716_vm10, %v700_v3, %v732_v18 }
  0xe3   :  { %2453 = vmatpush.bf16.msra.mxu2 %v4167_v26  ;;  %v701_v45 = vadd.f32 %v685_v14, %v659_v27  ;;  %v4388_v0 = vld [vmem:[#allocation7 + $0x4b0] sm:$0xf0]  ;;  %v5340_v26 = vld [vmem:[#allocation7 + $0x3e4] sm:$0xf] }
  0xe4   :  { %v708_v47 = vadd.f32 %v684_v58, %v647_v29  ;;  %2441 = vmatpush.bf16.msra.mxu1 %v4007_v15  ;;  %v3956_v58 = vld [vmem:[#allocation7 + $0x150] sm:$0xf0]  ;;  %v730_v28 = vmul.f32 0.02, %v698_v40  ;;  %vm714_vm12 = vcmp.gt.f32.partialorder %v698_v40, 0.0 }
  0xe5   :  { %v733_v7 = vmul.f32 0.02, %v701_v45  ;;  %vm717_vm13 = vcmp.gt.f32.partialorder %v701_v45, 0.0  ;;  %v3959_v3 = vor.u32 %v5256_v57, %v3956_v58  ;;  %v4084_v18 = vld [vmem:[#allocation7 + $0x250] sm:$0xf0] }
  0xe6   :  { %2431 = vmatpush.bf16.msrb.mxu0 %v3815_v20  ;;  %vm724_vm11 = vcmp.gt.f32.partialorder %v708_v47, 0.0  ;;  %v740_v46 = vmul.f32 0.02, %v708_v47  ;;  %v746_v15 = vsel %vm714_vm12, %v698_v40, %v730_v28  ;;  %v5252_v20 = vld [vmem:[#allocation7 + $0x124] sm:$0xf]  ;;  %v4279_v40 = vor.u32 %v5336_v31, %v4276_v39 }
  0xe7   :  { %2454 = vmatpush.bf16.msra.mxu2 %v4151_v30  ;;  %v618_v49 = vpop.f32.mrf.mxu3  ;;  %v749_v22 = vsel %vm717_vm13, %v701_v45, %v733_v7  ;;  %v5360_v30 = vld [vmem:[#allocation7 + $0x484] sm:$0xf]  ;;  %v4087_v45 = vor.u32 %v5288_v34, %v4084_v18  ;;  %v4676_v7 = vld [vmem:[#allocation7 + $0x6f0] sm:$0xf0] }
  0xe8   :  { %v619_v52 = vadd.f32 %v618_v49, %v5964_v38  ;;  %v660_v53 = vpop.f32.mrf.mxu2  ;;  %v756_v59 = vsel %vm724_vm11, %v708_v47, %v740_v46  ;;  %2442 = vmatpush.bf16.msra.mxu1 %v3991_v35  ;;  %v4407_v38 = vor.u32 %v5368_v42, %v4404_v23  ;;  %v686_v47 = vperm.slane %v5955_v8, 7  ;;  %v5404_v42 = vld [vmem:[#allocation7 + $0x5e4] sm:$0xf]  ;;  %v4548_v46 = vld [vmem:[#allocation7 + $0x5f0] sm:$0xf0] }
  0xe9   :  { %v661_v60 = vadd.f32 %v660_v53, %v5966_v44  ;;  %v6003_v5 = vpack.c.bf16 %v756_v59, %v748_v62  ;;  %v4292_v44 = vld [vmem:[#allocation7 + $0x3f0] sm:$0xf0]  ;;  %v3943_v35 = vor.u32 %v5252_v20, %v3940_v21  ;;  %v4375_v23 = vor.u32 %v5360_v30, %v4372_v43  ;;  %v5332_v8 = vld [vmem:[#allocation7 + $0x3a4] sm:$0xf] }
  0xea   :  { %v706_v4 = vadd.f32 %v682_v13, %v619_v52  ;;  %2432 = vmatpush.bf16.msrb.mxu0 %v3799_v41  ;;  %v4391_v13 = vor.u32 %v5364_v63, %v4388_v0  ;;  %v4295_v17 = vor.u32 %v5340_v26, %v4292_v44  ;;  %v3924_v41 = vld [vmem:[#allocation7 + $0x110] sm:$0xf0]  ;;  %v4551_v56 = vor.u32 %v5404_v42, %v4548_v46  ;;  %v5352_v58 = vld [vmem:[#allocation7 + $0x444] sm:$0xf]  ;;  %v5247_v42 = vld [vmem:[#allocation7 + $0xf4] sm:$0xf0] }
  0xeb   :  { %v709_v9 = vadd.f32 %v685_v14, %v661_v60  ;;  %2455 = vmatpush.bf16.msra.mxu2 %v4135_v50  ;;  %2391 = vmatmul.bf16.vlgmr.msrb.gmra.mxu1 %v6003_v5  ;;  %v4103_v14 = vor.u32 %v5292_v1, %v4100_v6  ;;  %v4260_v49 = vld [vmem:[#allocation7 + $0x3b0] sm:$0xf0]  ;;  %v3927_v53 = vor.u32 %v5248_v36, %v3924_v41  ;;  %v5400_v62 = vld [vmem:[#allocation7 + $0x5c4] sm:$0xf] }
  0xec   :  { %vm722_vm14 = vcmp.gt.f32.partialorder %v706_v4, 0.0  ;;  %v738_v12 = vmul.f32 0.02, %v706_v4  ;;  %2443 = vmatpush.bf16.msra.mxu1 %v3975_v61  ;;  %v4356_v50 = vld [vmem:[#allocation7 + $0x470] sm:$0xf0]  ;;  %v4263_v57 = vor.u32 %v5332_v8, %v4260_v49 }
  0xed   :  { %vm725_vm15 = vcmp.gt.f32.partialorder %v709_v9, 0.0  ;;  %v741_v25 = vmul.f32 0.02, %v709_v9  ;;  %2433 = vmatmul.bf16.vlgmr.msrb.gmra.mxu0 %v5968_v54  ;;  %v4068_v52 = vld [vmem:[#allocation7 + $0x230] sm:$0xf0] }
  0xee   :  { %2481 = vmatpush.bf16.msra.mxu0 %v4423_v19  ;;  %v754_v16 = vsel %vm722_vm14, %v706_v4, %v738_v12  ;;  %v5356_v19 = vld [vmem:[#allocation7 + $0x464] sm:$0xf]  ;;  %v4071_v61 = vor.u32 %v5284_v51, %v4068_v52  ;;  %v4532_v63 = vld [vmem:[#allocation7 + $0x5d0] sm:$0xf0] }
  0xef   :  { %v757_v24 = vsel %vm725_vm15, %v709_v9, %v741_v25  ;;  %2456 = vmatpush.bf16.msra.mxu2 %v4119_v10  ;;  %v672_v27 = vpop.f32.mrf.mxu3  ;;  %v6009_v29 = vpack.c.bf16 %v754_v16, %v746_v15  ;;  %v4359_v60 = vor.u32 %v5356_v19, %v4356_v50  ;;  %v5328_v0 = vld [vmem:[#allocation7 + $0x384] sm:$0xf]  ;;  %v4244_v1 = vld [vmem:[#allocation7 + $0x390] sm:$0xf0]  ;;  %v4535_v44 = vor.u32 %v5400_v62, %v4532_v63  ;;  %v3914_v19 = vld [vmem:[#allocation7 + $0xe8] sm:$0xf] }
  0xf0   :  { %v6011_v32 = vpack.c.bf16 %v757_v24, %v749_v22  ;;  %2444 = vmatpush.bf16.msra.mxu1 %v3959_v3  ;;  %v673_v37 = vadd.f32 %v672_v27, %v5975_v2  ;;  %v4340_v4 = vld [vmem:[#allocation7 + $0x450] sm:$0xf0]  ;;  %v5436_v26 = vld [vmem:[#allocation7 + $0x6e4] sm:$0xf]  ;;  %v4247_v12 = vor.u32 %v5328_v0, %v4244_v1  ;;  %v3915_v52 = vor.u32 %v5247_v42, %v3914_v19 }
  0xf1   :  { %2363 = vmatmul.bf16.vlgmr.msrb.gmra.mxu3 %v6009_v29  ;;  %v4052_v6 = vld [vmem:[#allocation7 + $0x210] sm:$0xf0]  ;;  %v5348_v25 = vld [vmem:[#allocation7 + $0x424] sm:$0xf]  ;;  %v4343_v15 = vor.u32 %v5352_v58, %v4340_v4  ;;  %v4679_v20 = vor.u32 %v5436_v26, %v4676_v7  ;;  %v5243_v58 = vld [vmem:[#allocation7 + $0xd4] sm:$0xf0] }
  0xf2   :  { %2482 = vmatpush.bf16.msra.mxu0 %v4407_v38  ;;  %2405 = vmatmul.bf16.vlgmr.msrb.gmra.mxu2 %v6011_v32  ;;  %v702_v2 = vadd.f32 %v686_v47, %v673_v37  ;;  %v5280_v38 = vld [vmem:[#allocation7 + $0x204] sm:$0xf]  ;;  %v4324_v3 = vld [vmem:[#allocation7 + $0x430] sm:$0xf0]  ;;  %v5239_v26 = vld [vmem:[#allocation7 + $0xb4] sm:$0xf0] }
  0xf3   :  { %2467 = vmatpush.bf16.msrb.mxu3 %v4295_v17  ;;  %2457 = vmatpush.bf16.msra.mxu2 %v4103_v14  ;;  %v4516_v16 = vld [vmem:[#allocation7 + $0x5b0] sm:$0xf0]  ;;  %v5324_v14 = vld [vmem:[#allocation7 + $0x364] sm:$0xf]  ;;  %v4327_v43 = vor.u32 %v5348_v25, %v4324_v3 }
  0xf4   :  { %2445 = vmatpush.bf16.msra.mxu1 %v3943_v35  ;;  %v734_v9 = vmul.f32 0.02, %v702_v2  ;;  %vm718_vm0 = vcmp.gt.f32.partialorder %v702_v2, 0.0  ;;  %v4228_v21 = vld [vmem:[#allocation7 + $0x370] sm:$0xf0] }
  0xf5   :  { %v5432_v22 = vld [vmem:[#allocation7 + $0x6c4] sm:$0xf]  ;;  %v4660_v24 = vld [vmem:[#allocation7 + $0x6d0] sm:$0xf0]  ;;  %v4231_v18 = vor.u32 %v5324_v14, %v4228_v21 }
  0xf6   :  { %2483 = vmatpush.bf16.msra.mxu0 %v4391_v13  ;;  %v5396_v13 = vld [vmem:[#allocation7 + $0x5a4] sm:$0xf]  ;;  %v750_v27 = vsel %vm718_vm0, %v702_v2, %v734_v9  ;;  %v4500_v36 = vld [vmem:[#allocation7 + $0x590] sm:$0xf0]  ;;  %v4663_v37 = vor.u32 %v5432_v22, %v4660_v24 }
  0xf7   :  { %2468 = vmatpush.bf16.msrb.mxu3 %v4279_v40  ;;  %2458 = vmatpush.bf16.msra.mxu2 %v4087_v45  ;;  %v674_v59 = vpop.f32.mrf.mxu3  ;;  %v4519_v31 = vor.u32 %v5396_v13, %v4516_v16  ;;  %v5344_v39 = vld [vmem:[#allocation7 + $0x404] sm:$0xf]  ;;  %v4212_v41 = vld [vmem:[#allocation7 + $0x350] sm:$0xf0]  ;;  %v3866_v16 = vld [vmem:[#allocation7 + $0x88] sm:$0xf] }
  0xf8   :  { %v675_v28 = vadd.f32 %v674_v59, %v5981_v33  ;;  %2446 = vmatpush.bf16.msra.mxu1 %v3927_v53  ;;  %v4055_v33 = vor.u32 %v5280_v38, %v4052_v6  ;;  %v5392_v35 = vld [vmem:[#allocation7 + $0x584] sm:$0xf]  ;;  %v4644_v45 = vld [vmem:[#allocation7 + $0x6b0] sm:$0xf0]  ;;  %v3882_v6 = vld [vmem:[#allocation7 + $0xa8] sm:$0xf] }
  0xf9   :  { %v5320_v40 = vld [vmem:[#allocation7 + $0x344] sm:$0xf]  ;;  %v4503_v46 = vor.u32 %v5392_v35, %v4500_v36  ;;  %v4484_v51 = vld [vmem:[#allocation7 + $0x570] sm:$0xf0]  ;;  %v5279_v35 = vld [vmem:[#allocation7 + $0x1f4] sm:$0xf0] }
  0xfa   :  { %2484 = vmatpush.bf16.msra.mxu0 %v4375_v23  ;;  %v710_v10 = vadd.f32 %v686_v47, %v675_v28  ;;  %v4308_v47 = vld [vmem:[#allocation7 + $0x410] sm:$0xf0]  ;;  %v5428_v23 = vld [vmem:[#allocation7 + $0x6a4] sm:$0xf]  ;;  %v4215_v49 = vor.u32 %v5320_v40, %v4212_v41 }
  0xfb   :  { %2469 = vmatpush.bf16.msrb.mxu3 %v4263_v57  ;;  %2459 = vmatpush.bf16.msra.mxu2 %v4071_v61  ;;  %v4311_v8 = vor.u32 %v5344_v39, %v4308_v47  ;;  %v5388_v50 = vld [vmem:[#allocation7 + $0x564] sm:$0xf]  ;;  %v4647_v53 = vor.u32 %v5428_v23, %v4644_v45  ;;  %v3898_v57 = vld [vmem:[#allocation7 + $0xc8] sm:$0xf]  ;;  %v4628_v59 = vld [vmem:[#allocation7 + $0x690] sm:$0xf0] }
  0xfc   :  { %2495 = vmatpush.bf16.msrb.mxu1 %v4551_v56  ;;  %vm726_vm1 = vcmp.gt.f32.partialorder %v710_v10, 0.0  ;;  %v742_v17 = vmul.f32 0.02, %v710_v10  ;;  %v5316_v2 = vld [vmem:[#allocation7 + $0x324] sm:$0xf]  ;;  %v3899_v1 = vor.u32 %v5243_v58, %v3898_v57 }
  0xfd   :  { %2447 = vmatmul.bf16.vlgmr.msra.gmra.mxu1 %v5984_v48  ;;  %v4196_v56 = vld [vmem:[#allocation7 + $0x330] sm:$0xf0]  ;;  %v5424_v62 = vld [vmem:[#allocation7 + $0x684] sm:$0xf]  ;;  %v4042_v47 = vld [vmem:[#allocation7 + $0x1e8] sm:$0xf] }
  0xfe   :  { %2485 = vmatpush.bf16.msra.mxu0 %v4359_v60  ;;  %v758_v30 = vsel %vm726_vm1, %v710_v10, %v742_v17  ;;  %v4487_v60 = vor.u32 %v5388_v50, %v4484_v51  ;;  %v4199_v61 = vor.u32 %v5316_v2, %v4196_v56  ;;  %v5384_v63 = vld [vmem:[#allocation7 + $0x544] sm:$0xf]  ;;  %v4468_v0 = vld [vmem:[#allocation7 + $0x550] sm:$0xf0]  ;;  %v4631_v28 = vor.u32 %v5424_v62, %v4628_v59  ;;  %v5235_v17 = vld [vmem:[#allocation7 + $0x94] sm:$0xf0] }
  0xff   :  { %2470 = vmatpush.bf16.msrb.mxu3 %v4247_v12  ;;  %2460 = vmatpush.bf16.msra.mxu2 %v4055_v33  ;;  %v6019_v34 = vpack.c.bf16 %v758_v30, %v750_v27  ;;  %v5312_v4 = vld [vmem:[#allocation7 + $0x304] sm:$0xf]  ;;  %v4180_v38 = vld [vmem:[#allocation7 + $0x310] sm:$0xf0]  ;;  %v4471_v10 = vor.u32 %v5384_v63, %v4468_v0  ;;  %v3867_v39 = vor.u32 %v5235_v17, %v3866_v16  ;;  %v5227_v50 = vld [vmem:[#allocation7 + $0x54] sm:$0xf0] }
 0x100   :  { %2496 = vmatpush.bf16.msrb.mxu1 %v4535_v44  ;;  %v5420_v7 = vld [vmem:[#allocation7 + $0x664] sm:$0xf]  ;;  %v4612_v9 = vld [vmem:[#allocation7 + $0x670] sm:$0xf0]  ;;  %v4183_v25 = vor.u32 %v5312_v4, %v4180_v38  ;;  %v4043_v45 = vor.u32 %v5279_v35, %v4042_v47  ;;  %v4026_v51 = vld [vmem:[#allocation7 + $0x1c8] sm:$0xf] }
 0x101   :  { %2419 = vmatmul.bf16.vlgmr.msra.gmra.mxu3 %v6019_v34  ;;  %v5468_v44 = vld [vmem:[#allocation7 + $0x7e4] sm:$0xf]  ;;  %v4804_v12 = vld [vmem:[#allocation7 + $0x7f0] sm:$0xf0]  ;;  %v4615_v33 = vor.u32 %v5420_v7, %v4612_v9  ;;  %v4170_v62 = vld [vmem:[#allocation7 + $0x2e8] sm:$0xf] }
 0x102   :  { %2486 = vmatpush.bf16.msra.mxu0 %v4343_v15  ;;  %2461 = vmatmul.bf16.vlgmr.msra.gmra.mxu2 %v5992_v11  ;;  %v5380_v3 = vld [vmem:[#allocation7 + $0x524] sm:$0xf]  ;;  %v4452_v13 = vld [vmem:[#allocation7 + $0x530] sm:$0xf0]  ;;  %v3883_v15 = vor.u32 %v5239_v26, %v3882_v6  ;;  %v4807_v14 = vor.u32 %v5468_v44, %v4804_v12  ;;  %v5311_v59 = vld [vmem:[#allocation7 + $0x2f4] sm:$0xf0] }
 0x103   :  { %2509 = vmatpush.bf16.msrb.mxu2 %v4679_v20  ;;  %2471 = vmatpush.bf16.msrb.mxu3 %v4231_v18  ;;  %v5416_v20 = vld [vmem:[#allocation7 + $0x644] sm:$0xf]  ;;  %v4596_v21 = vld [vmem:[#allocation7 + $0x650] sm:$0xf0]  ;;  %v4455_v22 = vor.u32 %v5380_v3, %v4452_v13  ;;  %v3850_v18 = vld [vmem:[#allocation7 + $0x68] sm:$0xf]  ;;  %v4171_v4 = vor.u32 %v5311_v59, %v4170_v62 }
 0x104   :  { %2497 = vmatpush.bf16.msrb.mxu1 %v4519_v31  ;;  %v5464_v24 = vld [vmem:[#allocation7 + $0x7c4] sm:$0xf]  ;;  %v4788_v27 = vld [vmem:[#allocation7 + $0x7d0] sm:$0xf0]  ;;  %v4010_v0 = vld [vmem:[#allocation7 + $0x1a8] sm:$0xf] }
 0x105   :  { %v5376_v30 = vld [vmem:[#allocation7 + $0x504] sm:$0xf]  ;;  %v4436_v31 = vld [vmem:[#allocation7 + $0x510] sm:$0xf0]  ;;  %v4791_v36 = vor.u32 %v5464_v24, %v4788_v27  ;;  %v3818_v38 = vld [vmem:[#allocation7 + $0x28] sm:$0xf] }
 0x106   :  { %2487 = vmatpush.bf16.msra.mxu0 %v4327_v43  ;;  %v4599_v43 = vor.u32 %v5416_v20, %v4596_v21  ;;  %v5412_v40 = vld [vmem:[#allocation7 + $0x624] sm:$0xf]  ;;  %v4580_v41 = vld [vmem:[#allocation7 + $0x630] sm:$0xf0]  ;;  %v4439_v19 = vor.u32 %v5376_v30, %v4436_v31  ;;  %v5223_v6 = vld [vmem:[#allocation7 + $0x34] sm:$0xf0] }
 0x107   :  { %2510 = vmatpush.bf16.msrb.mxu2 %v4663_v37  ;;  %2472 = vmatpush.bf16.msrb.mxu3 %v4215_v49  ;;  %v5231_v37 = vld [vmem:[#allocation7 + $0x74] sm:$0xf0]  ;;  %v5460_v42 = vld [vmem:[#allocation7 + $0x7a4] sm:$0xf]  ;;  %v4772_v23 = vld [vmem:[#allocation7 + $0x7b0] sm:$0xf0]  ;;  %v4583_v49 = vor.u32 %v5412_v40, %v4580_v41  ;;  %v3819_v12 = vor.u32 %v5223_v6, %v3818_v38 }
 0x108   :  { %2498 = vmatpush.bf16.msrb.mxu1 %v4503_v46  ;;  %v3834_v46 = vld [vmem:[#allocation7 + $0x48] sm:$0xf]  ;;  %v5408_v2 = vld [vmem:[#allocation7 + $0x604] sm:$0xf]  ;;  %v4564_v56 = vld [vmem:[#allocation7 + $0x610] sm:$0xf0] }
 0x109   :  { %v5456_v57 = vld [vmem:[#allocation7 + $0x784] sm:$0xf]  ;;  %v4756_v58 = vld [vmem:[#allocation7 + $0x790] sm:$0xf0]  ;;  %v4567_v63 = vor.u32 %v5408_v2, %v4564_v56  ;;  %v4154_v9 = vld [vmem:[#allocation7 + $0x2c8] sm:$0xf] }
 0x10a   :  { %2488 = vmatpush.bf16.msra.mxu0 %v4311_v8  ;;  %v3851_v8 = vor.u32 %v5231_v37, %v3850_v18  ;;  %v5452_v26 = vld [vmem:[#allocation7 + $0x764] sm:$0xf]  ;;  %v4740_v7 = vld [vmem:[#allocation7 + $0x770] sm:$0xf0]  ;;  %v5267_v3 = vld [vmem:[#allocation7 + $0x194] sm:$0xf0] }
 0x10b   :  { %2511 = vmatpush.bf16.msrb.mxu2 %v4647_v53  ;;  %2473 = vmatpush.bf16.msrb.mxu3 %v4199_v61  ;;  %v4775_v53 = vor.u32 %v5460_v42, %v4772_v23  ;;  %v3835_v61 = vor.u32 %v5227_v50, %v3834_v46  ;;  %v4743_v13 = vor.u32 %v5452_v26, %v4740_v7  ;;  %v5219_v16 = vld [vmem:[#allocation7 + $0x14] sm:$0xf0]  ;;  %v4724_v17 = vld [vmem:[#allocation7 + $0x750] sm:$0xf0]  ;;  %v4426_v20 = vld [vmem:[#allocation7 + $0x4e8] sm:$0xf] }
 0x10c   :  { %2499 = vmatpush.bf16.msrb.mxu1 %v4487_v60  ;;  %v5375_v21 = vld [vmem:[#allocation7 + $0x4f4] sm:$0xf0]  ;;  %v4138_v24 = vld [vmem:[#allocation7 + $0x2a8] sm:$0xf]  ;;  %v5444_v47 = vld [vmem:[#allocation7 + $0x724] sm:$0xf] }
 0x10d   :  { %2489 = vmatmul.bf16.vlgmr.msra.gmra.mxu0 %v5986_v55  ;;  %v5303_v27 = vld [vmem:[#allocation7 + $0x2b4] sm:$0xf0]  ;;  %v3978_v31 = vld [vmem:[#allocation7 + $0x168] sm:$0xf]  ;;  %v4427_v18 = vor.u32 %v5375_v21, %v4426_v20  ;;  %v4692_v50 = vld [vmem:[#allocation7 + $0x710] sm:$0xf0] }
 0x10e   :  { %2537 = vmatpush.bf16.msrb.mxu0 %v3915_v52  ;;  %v5275_v52 = vld [vmem:[#allocation7 + $0x1d4] sm:$0xf0]  ;;  %v4139_v35 = vor.u32 %v5303_v27, %v4138_v24  ;;  %v4410_v37 = vld [vmem:[#allocation7 + $0x4c8] sm:$0xf] }
 0x10f   :  { %2512 = vmatpush.bf16.msrb.mxu2 %v4631_v28  ;;  %2474 = vmatpush.bf16.msrb.mxu3 %v4183_v25  ;;  %v4027_v60 = vor.u32 %v5275_v52, %v4026_v51  ;;  %v4759_v28 = vor.u32 %v5456_v57, %v4756_v58  ;;  %v3994_v25 = vld [vmem:[#allocation7 + $0x188] sm:$0xf]  ;;  %v5371_v40 = vld [vmem:[#allocation7 + $0x4d4] sm:$0xf0] }
 0x110   :  { %2500 = vmatpush.bf16.msrb.mxu1 %v4471_v10  ;;  %v5307_v10 = vld [vmem:[#allocation7 + $0x2d4] sm:$0xf0]  ;;  %v3962_v23 = vld [vmem:[#allocation7 + $0x148] sm:$0xf] }
 0x111   :  { %v5299_v42 = vld [vmem:[#allocation7 + $0x294] sm:$0xf0]  ;;  %v4394_v52 = vld [vmem:[#allocation7 + $0x4a8] sm:$0xf] }
 0x112   :  { %2538 = vmatpush.bf16.msrb.mxu0 %v3899_v1  ;;  %2475 = vmatmul.bf16.vlgmr.msrb.gmra.mxu3 %v6009_v29  ;;  %v5271_v1 = vld [vmem:[#allocation7 + $0x1b4] sm:$0xf0]  ;;  %v4106_v2 = vld [vmem:[#allocation7 + $0x268] sm:$0xf] }
 0x113   :  { %2513 = vmatpush.bf16.msrb.mxu2 %v4615_v33  ;;  %2523 = vmatpush.bf16.msra.mxu3 %v4807_v14  ;;  %v4011_v44 = vor.u32 %v5271_v1, %v4010_v0  ;;  %v3802_v33 = vld [vmem:[#allocation7 + $0x8] sm:$0xf]  ;;  %v5448_v14 = vld [vmem:[#allocation7 + $0x744] sm:$0xf]  ;;  %v5295_v57 = vld [vmem:[#allocation7 + $0x274] sm:$0xf0] }
 0x114   :  { %2501 = vmatpush.bf16.msrb.mxu1 %v4455_v22  ;;  %v3995_v22 = vor.u32 %v5267_v3, %v3994_v25  ;;  %v3803_v30 = vor.u32 %v5219_v16, %v3802_v33  ;;  %v4298_v58 = vld [vmem:[#allocation7 + $0x3e8] sm:$0xf]  ;;  %v5343_v62 = vld [vmem:[#allocation7 + $0x3f4] sm:$0xf0]  ;;  %v4107_v0 = vor.u32 %v5295_v57, %v4106_v2 }
 0x115   :  { %v3946_v59 = vld [vmem:[#allocation7 + $0x128] sm:$0xf]  ;;  %v4299_v1 = vor.u32 %v5343_v62, %v4298_v58  ;;  %v5291_v26 = vld [vmem:[#allocation7 + $0x254] sm:$0xf0] }
 0x116   :  { %2539 = vmatpush.bf16.msrb.mxu0 %v3883_v15  ;;  %v4155_v15 = vor.u32 %v5307_v10, %v4154_v9  ;;  %v4090_v38 = vld [vmem:[#allocation7 + $0x248] sm:$0xf]  ;;  %v5339_v9 = vld [vmem:[#allocation7 + $0x3d4] sm:$0xf0] }
 0x117   :  { %2514 = vmatpush.bf16.msrb.mxu2 %v4599_v43  ;;  %2524 = vmatpush.bf16.msra.mxu3 %v4791_v36  ;;  %v4727_v43 = vor.u32 %v5448_v14, %v4724_v17  ;;  %v4708_v36 = vld [vmem:[#allocation7 + $0x730] sm:$0xf0]  ;;  %v4282_v7 = vld [vmem:[#allocation7 + $0x3c8] sm:$0xf]  ;;  %v5407_v3 = vld [vmem:[#allocation7 + $0x5f4] sm:$0xf0] }
 0x118   :  { %2502 = vmatpush.bf16.msrb.mxu1 %v4439_v19  ;;  %v4122_v19 = vld [vmem:[#allocation7 + $0x288] sm:$0xf]  ;;  %v4711_v46 = vor.u32 %v5444_v47, %v4708_v36  ;;  %v5359_v16 = vld [vmem:[#allocation7 + $0x474] sm:$0xf0] }
 0x119   :  { %v4123_v51 = vor.u32 %v5299_v42, %v4122_v19  ;;  %v3930_v10 = vld [vmem:[#allocation7 + $0x108] sm:$0xf]  ;;  %v5287_v20 = vld [vmem:[#allocation7 + $0x234] sm:$0xf0] }
 0x11a   :  { %2540 = vmatpush.bf16.msrb.mxu0 %v3867_v39  ;;  %v5263_v39 = vld [vmem:[#allocation7 + $0x174] sm:$0xf0]  ;;  %v4554_v25 = vld [vmem:[#allocation7 + $0x5e8] sm:$0xf] }
 0x11b   :  { %2515 = vmatpush.bf16.msrb.mxu2 %v4583_v49  ;;  %2525 = vmatpush.bf16.msra.mxu3 %v4775_v53  ;;  %v3979_v41 = vor.u32 %v5263_v39, %v3978_v31  ;;  %v5440_v49 = vld [vmem:[#allocation7 + $0x704] sm:$0xf]  ;;  %v5367_v53 = vld [vmem:[#allocation7 + $0x4b4] sm:$0xf0]  ;;  %v4362_v33 = vld [vmem:[#allocation7 + $0x468] sm:$0xf]  ;;  %v4555_v24 = vor.u32 %v5407_v3, %v4554_v25 }
 0x11c   :  { %2551 = vmatpush.bf16.msra.mxu1 %v4043_v45  ;;  %v5259_v45 = vld [vmem:[#allocation7 + $0x154] sm:$0xf0]  ;;  %v4074_v14 = vld [vmem:[#allocation7 + $0x228] sm:$0xf]  ;;  %v4363_v27 = vor.u32 %v5359_v16, %v4362_v33  ;;  %v5241_v16 = vld [vmem:[#allocation7 + $0xcc] sm:$0xf] }
 0x11d   :  { %2503 = vmatmul.bf16.vlgmr.msrb.gmra.mxu1 %v6003_v5  ;;  %v3963_v56 = vor.u32 %v5259_v45, %v3962_v23  ;;  %v4266_v21 = vld [vmem:[#allocation7 + $0x3a8] sm:$0xf]  ;;  %v5403_v31 = vld [vmem:[#allocation7 + $0x5d4] sm:$0xf0]  ;;  %v4075_v39 = vor.u32 %v5287_v20, %v4074_v14  ;;  %v3900_v14 = vld [vmem:[#allocation7 + $0xd8] sm:$0xf0] }
 0x11e   :  { %2541 = vmatpush.bf16.msrb.mxu0 %v3851_v8  ;;  %v4411_v8 = vor.u32 %v5371_v40, %v4410_v37  ;;  %v5355_v47 = vld [vmem:[#allocation7 + $0x454] sm:$0xf0]  ;;  %v4250_v37 = vld [vmem:[#allocation7 + $0x388] sm:$0xf] }
 0x11f   :  { %2516 = vmatpush.bf16.msrb.mxu2 %v4567_v63  ;;  %2526 = vmatpush.bf16.msra.mxu3 %v4759_v28  ;;  %v4395_v63 = vor.u32 %v5367_v53, %v4394_v52  ;;  %v4378_v28 = vld [vmem:[#allocation7 + $0x488] sm:$0xf]  ;;  %v5283_v36 = vld [vmem:[#allocation7 + $0x214] sm:$0xf0] }
 0x120   :  { %2552 = vmatpush.bf16.msra.mxu1 %v4027_v60  ;;  %v5255_v60 = vld [vmem:[#allocation7 + $0x134] sm:$0xf0]  ;;  %v4682_v19 = vld [vmem:[#allocation7 + $0x6e8] sm:$0xf] }
 0x121   :  { %v3947_v6 = vor.u32 %v5255_v60, %v3946_v59  ;;  %v5331_v40 = vld [vmem:[#allocation7 + $0x394] sm:$0xf0]  ;;  %v4522_v45 = vld [vmem:[#allocation7 + $0x5a8] sm:$0xf] }
 0x122   :  { %2542 = vmatpush.bf16.msrb.mxu0 %v3835_v61  ;;  %2517 = vmatmul.bf16.vlgmr.msrb.gmra.mxu2 %v6011_v32  ;;  %v4695_v61 = vor.u32 %v5440_v49, %v4692_v50  ;;  %v5439_v42 = vld [vmem:[#allocation7 + $0x6f4] sm:$0xf0]  ;;  %v4251_v49 = vor.u32 %v5331_v40, %v4250_v37  ;;  %v4330_v50 = vld [vmem:[#allocation7 + $0x428] sm:$0xf] }
 0x123   :  { %2565 = vmatpush.bf16.msra.mxu2 %v4171_v4  ;;  %2527 = vmatpush.bf16.msra.mxu3 %v4743_v13  ;;  %v5363_v4 = vld [vmem:[#allocation7 + $0x494] sm:$0xf0]  ;;  %v4091_v13 = vor.u32 %v5291_v26, %v4090_v38  ;;  %v4683_v52 = vor.u32 %v5439_v42, %v4682_v19  ;;  %v4234_v53 = vld [vmem:[#allocation7 + $0x368] sm:$0xf]  ;;  %v5245_v38 = vld [vmem:[#allocation7 + $0xec] sm:$0xf] }
 0x124   :  { %2553 = vmatpush.bf16.msra.mxu1 %v4011_v44  ;;  %v5251_v44 = vld [vmem:[#allocation7 + $0x114] sm:$0xf0]  ;;  %v4666_v57 = vld [vmem:[#allocation7 + $0x6c8] sm:$0xf] }
 0x125   :  { %v3931_v17 = vor.u32 %v5251_v44, %v3930_v10  ;;  %v5327_v2 = vld [vmem:[#allocation7 + $0x374] sm:$0xf0]  ;;  %v4506_v59 = vld [vmem:[#allocation7 + $0x588] sm:$0xf] }
 0x126   :  { %2543 = vmatpush.bf16.msrb.mxu0 %v3819_v12  ;;  %v4379_v12 = vor.u32 %v5363_v4, %v4378_v28  ;;  %v5435_v58 = vld [vmem:[#allocation7 + $0x6d4] sm:$0xf0]  ;;  %v4490_v44 = vld [vmem:[#allocation7 + $0x568] sm:$0xf] }
 0x127   :  { %2566 = vmatpush.bf16.msra.mxu2 %v4155_v15  ;;  %2528 = vmatpush.bf16.msra.mxu3 %v4727_v43  ;;  %v4283_v15 = vor.u32 %v5339_v9, %v4282_v7  ;;  %v5395_v60 = vld [vmem:[#allocation7 + $0x594] sm:$0xf0]  ;;  %v4667_v28 = vor.u32 %v5435_v58, %v4666_v57  ;;  %v4650_v7 = vld [vmem:[#allocation7 + $0x6a8] sm:$0xf] }
 0x128   :  { %2554 = vmatpush.bf16.msra.mxu1 %v3995_v22  ;;  %v5335_v22 = vld [vmem:[#allocation7 + $0x3b4] sm:$0xf0]  ;;  %v4507_v26 = vor.u32 %v5395_v60, %v4506_v59  ;;  %v4634_v20 = vld [vmem:[#allocation7 + $0x688] sm:$0xf]  ;;  %v5277_v59 = vld [vmem:[#allocation7 + $0x1ec] sm:$0xf] }
 0x129   :  { %v4267_v43 = vor.u32 %v5335_v22, %v4266_v21  ;;  %v5323_v4 = vld [vmem:[#allocation7 + $0x354] sm:$0xf0]  ;;  %v4474_v22 = vld [vmem:[#allocation7 + $0x548] sm:$0xf]  ;;  %v4044_v60 = vld [vmem:[#allocation7 + $0x1f8] sm:$0xf0] }
 0x12a   :  { %2544 = vmatpush.bf16.msrb.mxu0 %v3803_v30  ;;  %v4538_v30 = vld [vmem:[#allocation7 + $0x5c8] sm:$0xf]  ;;  %v5431_v9 = vld [vmem:[#allocation7 + $0x6b4] sm:$0xf0] }
 0x12b   :  { %2567 = vmatpush.bf16.msra.mxu2 %v4139_v35  ;;  %2529 = vmatpush.bf16.msra.mxu3 %v4711_v46  ;;  %v4058_v35 = vld [vmem:[#allocation7 + $0x208] sm:$0xf]  ;;  %v5399_v46 = vld [vmem:[#allocation7 + $0x5b4] sm:$0xf0] }
 0x12c   :  { %2555 = vmatpush.bf16.msra.mxu1 %v3979_v41  ;;  %v4539_v41 = vor.u32 %v5403_v31, %v4538_v30  ;;  %v5319_v33 = vld [vmem:[#allocation7 + $0x334] sm:$0xf0]  ;;  %v3903_v30 = vor.u32 %v5241_v16, %v3900_v14  ;;  %v4186_v31 = vld [vmem:[#allocation7 + $0x308] sm:$0xf] }
 0x12d   :  { %2545 = vmatmul.bf16.vlgmr.msrb.gmra.mxu0 %v5968_v54  ;;  %v5427_v21 = vld [vmem:[#allocation7 + $0x694] sm:$0xf0]  ;;  %v4810_v40 = vld [vmem:[#allocation7 + $0x7e8] sm:$0xf] }
 0x12e   :  { %2593 = vmatpush.bf16.msra.mxu0 %v4427_v18  ;;  %v4346_v18 = vld [vmem:[#allocation7 + $0x448] sm:$0xf]  ;;  %v5423_v37 = vld [vmem:[#allocation7 + $0x674] sm:$0xf0] }
 0x12f   :  { %2568 = vmatpush.bf16.msra.mxu2 %v4123_v51  ;;  %2530 = vmatpush.bf16.msra.mxu3 %v4695_v61  ;;  %v4347_v23 = vor.u32 %v5355_v47, %v4346_v18  ;;  %v5351_v51 = vld [vmem:[#allocation7 + $0x434] sm:$0xf0]  ;;  %v4235_v61 = vor.u32 %v5327_v2, %v4234_v53  ;;  %v5237_v18 = vld [vmem:[#allocation7 + $0xac] sm:$0xf]  ;;  %v3884_v47 = vld [vmem:[#allocation7 + $0xb8] sm:$0xf0] }
 0x130   :  { %2556 = vmatpush.bf16.msra.mxu1 %v3963_v56  ;;  %v4523_v56 = vor.u32 %v5399_v46, %v4522_v45  ;;  %v4331_v62 = vor.u32 %v5351_v51, %v4330_v50  ;;  %v4458_v19 = vld [vmem:[#allocation7 + $0x528] sm:$0xf]  ;;  %v5383_v42 = vld [vmem:[#allocation7 + $0x534] sm:$0xf0]  ;;  %v3887_v45 = vor.u32 %v5237_v18, %v3884_v47  ;;  %v3868_v50 = vld [vmem:[#allocation7 + $0x98] sm:$0xf0] }
 0x131   :  { %v4602_v51 = vld [vmem:[#allocation7 + $0x648] sm:$0xf]  ;;  %v5419_v53 = vld [vmem:[#allocation7 + $0x654] sm:$0xf0] }
 0x132   :  { %2594 = vmatpush.bf16.msra.mxu0 %v4411_v8  ;;  %2531 = vmatmul.bf16.vlgmr.msra.gmra.mxu3 %v6019_v34  ;;  %v4059_v8 = vor.u32 %v5283_v36, %v4058_v35  ;;  %v4618_v35 = vld [vmem:[#allocation7 + $0x668] sm:$0xf]  ;;  %v5379_v58 = vld [vmem:[#allocation7 + $0x514] sm:$0xf0] }
 0x133   :  { %2569 = vmatpush.bf16.msra.mxu2 %v4107_v0  ;;  %2579 = vmatpush.bf16.msrb.mxu3 %v4299_v1  ;;  %v5347_v0 = vld [vmem:[#allocation7 + $0x414] sm:$0xf0]  ;;  %v4218_v1 = vld [vmem:[#allocation7 + $0x348] sm:$0xf]  ;;  %v4619_v46 = vor.u32 %v5423_v37, %v4618_v35  ;;  %v5305_v37 = vld [vmem:[#allocation7 + $0x2cc] sm:$0xf] }
 0x134   :  { %2557 = vmatpush.bf16.msra.mxu1 %v3947_v6  ;;  %v3916_v6 = vld [vmem:[#allocation7 + $0xf8] sm:$0xf0]  ;;  %v4219_v25 = vor.u32 %v5323_v4, %v4218_v1  ;;  %v4794_v2 = vld [vmem:[#allocation7 + $0x7c8] sm:$0xf]  ;;  %v5459_v14 = vld [vmem:[#allocation7 + $0x794] sm:$0xf0] }
 0x135   :  { %v3919_v3 = vor.u32 %v5245_v38, %v3916_v6  ;;  %v4442_v57 = vld [vmem:[#allocation7 + $0x508] sm:$0xf]  ;;  %v3852_v1 = vld [vmem:[#allocation7 + $0x78] sm:$0xf0]  ;;  %v5415_v38 = vld [vmem:[#allocation7 + $0x634] sm:$0xf0] }
 0x136   :  { %2595 = vmatpush.bf16.msra.mxu0 %v4395_v63  ;;  %v4314_v63 = vld [vmem:[#allocation7 + $0x408] sm:$0xf]  ;;  %v4443_v4 = vor.u32 %v5379_v58, %v4442_v57  ;;  %v5455_v35 = vld [vmem:[#allocation7 + $0x774] sm:$0xf0]  ;;  %v5261_v58 = vld [vmem:[#allocation7 + $0x16c] sm:$0xf] }
 0x137   :  { %2570 = vmatpush.bf16.msra.mxu2 %v4091_v13  ;;  %2580 = vmatpush.bf16.msrb.mxu3 %v4283_v15  ;;  %v4315_v10 = vor.u32 %v5347_v0, %v4314_v63  ;;  %v4202_v13 = vld [vmem:[#allocation7 + $0x328] sm:$0xf]  ;;  %v4651_v15 = vor.u32 %v5431_v9, %v4650_v7  ;;  %v5229_v0 = vld [vmem:[#allocation7 + $0x6c] sm:$0xf]  ;;  %v4047_v7 = vor.u32 %v5277_v59, %v4044_v60 }
 0x138   :  { %2558 = vmatpush.bf16.msra.mxu1 %v3931_v17  ;;  %v4778_v6 = vld [vmem:[#allocation7 + $0x7a8] sm:$0xf]  ;;  %v3855_v9 = vor.u32 %v5229_v0, %v3852_v1  ;;  %v5447_v0 = vld [vmem:[#allocation7 + $0x734] sm:$0xf0]  ;;  %v5369_v1 = vld [vmem:[#allocation7 + $0x4cc] sm:$0xf] }
 0x139   :  { %v4762_v16 = vld [vmem:[#allocation7 + $0x788] sm:$0xf] }
 0x13a   :  { %2596 = vmatpush.bf16.msra.mxu0 %v4379_v12  ;;  %v5391_v12 = vld [vmem:[#allocation7 + $0x574] sm:$0xf0]  ;;  %v4746_v47 = vld [vmem:[#allocation7 + $0x768] sm:$0xf] }
 0x13b   :  { %2571 = vmatpush.bf16.msra.mxu2 %v4075_v39  ;;  %2581 = vmatpush.bf16.msrb.mxu3 %v4267_v43  ;;  %v4491_v17 = vor.u32 %v5391_v12, %v4490_v44  ;;  %v5315_v39 = vld [vmem:[#allocation7 + $0x314] sm:$0xf0]  ;;  %v4635_v43 = vor.u32 %v5427_v21, %v4634_v20  ;;  %v4028_v44 = vld [vmem:[#allocation7 + $0x1d8] sm:$0xf0]  ;;  %v5309_v20 = vld [vmem:[#allocation7 + $0x2ec] sm:$0xf] }
 0x13c   :  { %2607 = vmatpush.bf16.msrb.mxu1 %v4555_v24  ;;  %v5387_v24 = vld [vmem:[#allocation7 + $0x554] sm:$0xf0]  ;;  %v4172_v21 = vld [vmem:[#allocation7 + $0x2f8] sm:$0xf0] }
 0x13d   :  { %2559 = vmatmul.bf16.vlgmr.msra.gmra.mxu1 %v5984_v48  ;;  %v4475_v36 = vor.u32 %v5387_v24, %v4474_v22  ;;  %v5269_v24 = vld [vmem:[#allocation7 + $0x1ac] sm:$0xf]  ;;  %v4175_v18 = vor.u32 %v5309_v20, %v4172_v21  ;;  %v3948_v21 = vld [vmem:[#allocation7 + $0x138] sm:$0xf0] }
 0x13e   :  { %2597 = vmatpush.bf16.msra.mxu0 %v4363_v27  ;;  %v4203_v27 = vor.u32 %v5319_v33, %v4202_v13  ;;  %v3836_v13 = vld [vmem:[#allocation7 + $0x58] sm:$0xf0]  ;;  %v5411_v33 = vld [vmem:[#allocation7 + $0x614] sm:$0xf0]  ;;  %v5253_v20 = vld [vmem:[#allocation7 + $0x12c] sm:$0xf] }
 0x13f   :  { %2572 = vmatpush.bf16.msra.mxu2 %v4059_v8  ;;  %2582 = vmatpush.bf16.msrb.mxu3 %v4251_v49  ;;  %v5233_v49 = vld [vmem:[#allocation7 + $0x8c] sm:$0xf] }
 0x140   :  { %2608 = vmatpush.bf16.msrb.mxu1 %v4539_v41  ;;  %v5471_v41 = vld [vmem:[#allocation7 + $0x7f4] sm:$0xf0] }
 0x141   :  { %v4811_v8 = vor.u32 %v5471_v41, %v4810_v40  ;;  %v4156_v40 = vld [vmem:[#allocation7 + $0x2d8] sm:$0xf0] }
 0x142   :  { %2598 = vmatpush.bf16.msra.mxu0 %v4347_v23  ;;  %2573 = vmatmul.bf16.vlgmr.msra.gmra.mxu2 %v5992_v11  ;;  %v4187_v23 = vor.u32 %v5315_v39, %v4186_v31  ;;  %v4763_v31 = vor.u32 %v5459_v14, %v4762_v16  ;;  %v5221_v39 = vld [vmem:[#allocation7 + $0x2c] sm:$0xf]  ;;  %v4108_v16 = vld [vmem:[#allocation7 + $0x278] sm:$0xf0] }
 0x143   :  { %2621 = vmatpush.bf16.msrb.mxu2 %v4683_v52  ;;  %2583 = vmatpush.bf16.msrb.mxu3 %v4235_v61  ;;  %v4459_v52 = vor.u32 %v5383_v42, %v4458_v19  ;;  %v4603_v61 = vor.u32 %v5419_v53, %v4602_v51  ;;  %v5265_v19 = vld [vmem:[#allocation7 + $0x18c] sm:$0xf]  ;;  %v3996_v42 = vld [vmem:[#allocation7 + $0x198] sm:$0xf0] }
 0x144   :  { %2609 = vmatpush.bf16.msrb.mxu1 %v4523_v56  ;;  %v5467_v56 = vld [vmem:[#allocation7 + $0x7d4] sm:$0xf0]  ;;  %v5373_v51 = vld [vmem:[#allocation7 + $0x4ec] sm:$0xf]  ;;  %v3999_v53 = vor.u32 %v5265_v19, %v3996_v42  ;;  %v4556_v42 = vld [vmem:[#allocation7 + $0x5f8] sm:$0xf0] }
 0x145   :  { %v4795_v63 = vor.u32 %v5467_v56, %v4794_v2  ;;  %v5301_v2 = vld [vmem:[#allocation7 + $0x2ac] sm:$0xf]  ;;  %v4140_v56 = vld [vmem:[#allocation7 + $0x2b8] sm:$0xf0] }
 0x146   :  { %2599 = vmatpush.bf16.msra.mxu0 %v4331_v62  ;;  %v3871_v62 = vor.u32 %v5233_v49, %v3868_v50  ;;  %v4159_v49 = vor.u32 %v5305_v37, %v4156_v40  ;;  %v5451_v50 = vld [vmem:[#allocation7 + $0x754] sm:$0xf0]  ;;  %v5341_v14 = vld [vmem:[#allocation7 + $0x3ec] sm:$0xf]  ;;  %v3932_v40 = vld [vmem:[#allocation7 + $0x118] sm:$0xf0] }
 0x147   :  { %2622 = vmatpush.bf16.msrb.mxu2 %v4667_v28  ;;  %2584 = vmatpush.bf16.msrb.mxu3 %v4219_v25  ;;  %v4586_v28 = vld [vmem:[#allocation7 + $0x628] sm:$0xf]  ;;  %v5249_v37 = vld [vmem:[#allocation7 + $0x10c] sm:$0xf] }
 0x148   :  { %2610 = vmatpush.bf16.msrb.mxu1 %v4507_v26  ;;  %v5463_v26 = vld [vmem:[#allocation7 + $0x7b4] sm:$0xf0]  ;;  %v4587_v12 = vor.u32 %v5415_v38, %v4586_v28  ;;  %v4412_v28 = vld [vmem:[#allocation7 + $0x4d8] sm:$0xf0]  ;;  %v5297_v38 = vld [vmem:[#allocation7 + $0x28c] sm:$0xf] }
 0x149   :  { %v4779_v25 = vor.u32 %v5463_v26, %v4778_v6  ;;  %v4124_v6 = vld [vmem:[#allocation7 + $0x298] sm:$0xf0]  ;;  %v5257_v26 = vld [vmem:[#allocation7 + $0x14c] sm:$0xf] }
 0x14a   :  { %2600 = vmatpush.bf16.msra.mxu0 %v4315_v10  ;;  %v5273_v10 = vld [vmem:[#allocation7 + $0x1cc] sm:$0xf] }
 0x14b   :  { %2623 = vmatpush.bf16.msrb.mxu2 %v4651_v15  ;;  %2585 = vmatpush.bf16.msrb.mxu3 %v4203_v27  ;;  %v4570_v15 = vld [vmem:[#allocation7 + $0x608] sm:$0xf]  ;;  %v4012_v27 = vld [vmem:[#allocation7 + $0x1b8] sm:$0xf0]  ;;  %v5405_v19 = vld [vmem:[#allocation7 + $0x5ec] sm:$0xf] }
 0x14c   :  { %2611 = vmatpush.bf16.msrb.mxu1 %v4491_v17  ;;  %v4031_v17 = vor.u32 %v5273_v10, %v4028_v44  ;;  %v4415_v10 = vor.u32 %v5369_v1, %v4412_v28  ;;  %v4698_v44 = vld [vmem:[#allocation7 + $0x708] sm:$0xf]  ;;  %v4060_v28 = vld [vmem:[#allocation7 + $0x218] sm:$0xf0] }
 0x14d   :  { %2601 = vmatmul.bf16.vlgmr.msra.gmra.mxu0 %v5986_v55 }
 0x14e   :  { %2649 = vmatpush.bf16.msrb.mxu0 %v3919_v3  ;;  %v5225_v3 = vld [vmem:[#allocation7 + $0x4c] sm:$0xf] }
 0x14f   :  { %2624 = vmatpush.bf16.msrb.mxu2 %v4635_v43  ;;  %2586 = vmatpush.bf16.msrb.mxu3 %v4187_v23  ;;  %v3839_v22 = vor.u32 %v5225_v3, %v3836_v13  ;;  %v3820_v43 = vld [vmem:[#allocation7 + $0x38] sm:$0xf0]  ;;  %v4747_v23 = vor.u32 %v5455_v35, %v4746_v47  ;;  %v5365_v3 = vld [vmem:[#allocation7 + $0x4ac] sm:$0xf] }
 0x150   :  { %2612 = vmatpush.bf16.msrb.mxu1 %v4475_v36  ;;  %v4015_v36 = vor.u32 %v5269_v24, %v4012_v27  ;;  %v3823_v41 = vor.u32 %v5221_v39, %v3820_v43  ;;  %v4396_v13 = vld [vmem:[#allocation7 + $0x4b8] sm:$0xf0]  ;;  %v5289_v43 = vld [vmem:[#allocation7 + $0x24c] sm:$0xf] }
 0x151   :  { %v4399_v24 = vor.u32 %v5365_v3, %v4396_v13  ;;  %v4380_v39 = vld [vmem:[#allocation7 + $0x498] sm:$0xf0]  ;;  %v5337_v35 = vld [vmem:[#allocation7 + $0x3cc] sm:$0xf] }
 0x152   :  { %2650 = vmatpush.bf16.msrb.mxu0 %v3903_v30  ;;  %2587 = vmatmul.bf16.vlgmr.msrb.gmra.mxu3 %v6009_v29  ;;  %v4571_v30 = vor.u32 %v5411_v33, %v4570_v15  ;;  %v5293_v15 = vld [vmem:[#allocation7 + $0x26c] sm:$0xf]  ;;  %v4092_v47 = vld [vmem:[#allocation7 + $0x258] sm:$0xf0] }
 0x153   :  { %2625 = vmatpush.bf16.msrb.mxu2 %v4619_v46  ;;  %2635 = vmatpush.bf16.msra.mxu3 %v4811_v8  ;;  %v3804_v46 = vld [vmem:[#allocation7 + $0x18] sm:$0xf0]  ;;  %v4730_v8 = vld [vmem:[#allocation7 + $0x748] sm:$0xf]  ;;  %v4111_v27 = vor.u32 %v5293_v15, %v4108_v16  ;;  %v5349_v13 = vld [vmem:[#allocation7 + $0x42c] sm:$0xf] }
 0x154   :  { %2613 = vmatpush.bf16.msrb.mxu1 %v4459_v52  ;;  %v4428_v52 = vld [vmem:[#allocation7 + $0x4f8] sm:$0xf0]  ;;  %v4731_v59 = vor.u32 %v5451_v50, %v4730_v8  ;;  %v5325_v16 = vld [vmem:[#allocation7 + $0x36c] sm:$0xf] }
 0x155   :  { %v4431_v60 = vor.u32 %v5373_v51, %v4428_v52  ;;  %v4364_v8 = vld [vmem:[#allocation7 + $0x478] sm:$0xf0]  ;;  %v3935_v51 = vor.u32 %v5249_v37, %v3932_v40  ;;  %v4874_v37 = vld [vmem:[#allocation10 + $0x70] sm:$0xf] }
 0x156   :  { %2651 = vmatpush.bf16.msrb.mxu0 %v3887_v45  ;;  %v5217_v45 = vld [vmem:[#allocation7 + $0xc] sm:$0xf]  ;;  %v4076_v52 = vld [vmem:[#allocation7 + $0x238] sm:$0xf0] }
 0x157   :  { %2626 = vmatpush.bf16.msrb.mxu2 %v4603_v61  ;;  %2636 = vmatpush.bf16.msra.mxu3 %v4795_v63  ;;  %v3807_v57 = vor.u32 %v5217_v45, %v3804_v46  ;;  %v4714_v61 = vld [vmem:[#allocation7 + $0x728] sm:$0xf]  ;;  %v4143_v63 = vor.u32 %v5301_v2, %v4140_v56  ;;  %v5357_v46 = vld [vmem:[#allocation7 + $0x46c] sm:$0xf]  ;;  %v4268_v2 = vld [vmem:[#allocation7 + $0x3b8] sm:$0xf0]  ;;  %v4559_v56 = vor.u32 %v5405_v19, %v4556_v42 }
 0x158   :  { %2614 = vmatpush.bf16.msrb.mxu1 %v4443_v4  ;;  %v6038_v50 = vpop.f32.mrf.mxu1  ;;  %v4332_v15 = vld [vmem:[#allocation7 + $0x438] sm:$0xf0]  ;;  %v5429_v19 = vld [vmem:[#allocation7 + $0x6ac] sm:$0xf] }
 0x159   :  { %v5487_v40 = vld [vmem:[#allocation10 + $0x74] sm:$0xf0] }
 0x15a   :  { %2652 = vmatpush.bf16.msrb.mxu0 %v3871_v62  ;;  %v3980_v62 = vld [vmem:[#allocation7 + $0x178] sm:$0xf0] }
 0x15b   :  { %2627 = vmatpush.bf16.msrb.mxu2 %v4587_v12  ;;  %2637 = vmatpush.bf16.msra.mxu3 %v4779_v25  ;;  %v3983_v4 = vor.u32 %v5261_v58, %v3980_v62  ;;  %v5443_v12 = vld [vmem:[#allocation7 + $0x714] sm:$0xf0]  ;;  %v4127_v25 = vor.u32 %v5297_v38, %v4124_v6  ;;  %v5401_v58 = vld [vmem:[#allocation7 + $0x5cc] sm:$0xf]  ;;  %v4540_v62 = vld [vmem:[#allocation7 + $0x5d8] sm:$0xf0] }
 0x15c   :  { %2663 = vmatpush.bf16.msra.mxu1 %v4047_v7  ;;  %v3964_v7 = vld [vmem:[#allocation7 + $0x158] sm:$0xf0]  ;;  %v4543_v6 = vor.u32 %v5401_v58, %v4540_v62  ;;  %v4866_v58 = vld [vmem:[#allocation10 + $0x60] sm:$0xf]  ;;  %v5485_v62 = vld [vmem:[#allocation10 + $0x64] sm:$0xf0] }
 0x15d   :  { %2615 = vmatmul.bf16.vlgmr.msrb.gmra.mxu1 %v6003_v5  ;;  %v3967_v33 = vor.u32 %v5257_v26, %v3964_v7  ;;  %v4252_v38 = vld [vmem:[#allocation7 + $0x398] sm:$0xf0]  ;;  %v5437_v26 = vld [vmem:[#allocation7 + $0x6ec] sm:$0xf] }
 0x15e   :  { %2653 = vmatpush.bf16.msrb.mxu0 %v3855_v9  ;;  %v4715_v9 = vor.u32 %v5447_v0, %v4714_v61  ;;  %v5353_v61 = vld [vmem:[#allocation7 + $0x44c] sm:$0xf]  ;;  %v4684_v7 = vld [vmem:[#allocation7 + $0x6f8] sm:$0xf0] }
 0x15f   :  { %2628 = vmatpush.bf16.msrb.mxu2 %v4571_v30  ;;  %2638 = vmatpush.bf16.msra.mxu3 %v4763_v31  ;;  %v5361_v31 = vld [vmem:[#allocation7 + $0x48c] sm:$0xf]  ;;  %v4652_v42 = vld [vmem:[#allocation7 + $0x6b8] sm:$0xf0] }
 0x160   :  { %2664 = vmatpush.bf16.msra.mxu1 %v4031_v17  ;;  %v4300_v17 = vld [vmem:[#allocation7 + $0x3f8] sm:$0xf0]  ;;  %v5281_v0 = vld [vmem:[#allocation7 + $0x20c] sm:$0xf] }
 0x161   :  { %v4303_v30 = vor.u32 %v5341_v14, %v4300_v17  ;;  %v4236_v14 = vld [vmem:[#allocation7 + $0x378] sm:$0xf0] }
 0x162   :  { %2654 = vmatpush.bf16.msrb.mxu0 %v3839_v22  ;;  %2629 = vmatmul.bf16.vlgmr.msrb.gmra.mxu2 %v6011_v32  ;;  %v4699_v22 = vor.u32 %v5443_v12, %v4698_v44  ;;  %v5397_v44 = vld [vmem:[#allocation7 + $0x5ac] sm:$0xf]  ;;  %v4524_v12 = vld [vmem:[#allocation7 + $0x5b8] sm:$0xf0] }
 0x163   :  { %2677 = vmatpush.bf16.msra.mxu2 %v4175_v18  ;;  %2639 = vmatpush.bf16.msra.mxu3 %v4747_v23  ;;  %v6036_v18 = vpop.f32.mrf.mxu0  ;;  %v4095_v23 = vor.u32 %v5289_v43, %v4092_v47  ;;  %v4527_v17 = vor.u32 %v5397_v44, %v4524_v12  ;;  %v4239_v43 = vor.u32 %v5325_v16, %v4236_v14  ;;  %v5321_v47 = vld [vmem:[#allocation7 + $0x34c] sm:$0xf]  ;;  %v4858_v12 = vld [vmem:[#allocation10 + $0x50] sm:$0xf]  ;;  %v4812_v14 = vld [vmem:[#allocation7 + $0x7f8] sm:$0xf0] }
 0x164   :  { %2665 = vmatpush.bf16.msra.mxu1 %v4015_v36  ;;  %v4284_v36 = vld [vmem:[#allocation7 + $0x3d8] sm:$0xf0]  ;;  %v5469_v16 = vld [vmem:[#allocation7 + $0x7ec] sm:$0xf] }
 0x165   :  { %v4287_v45 = vor.u32 %v5337_v35, %v4284_v36  ;;  %v6041_v1 = vpop.f32.mrf.mxu2  ;;  %v4220_v36 = vld [vmem:[#allocation7 + $0x358] sm:$0xf0] }
 0x166   :  { %2655 = vmatpush.bf16.msrb.mxu0 %v3823_v41  ;;  %v4383_v41 = vor.u32 %v5361_v31, %v4380_v39  ;;  %v4508_v31 = vld [vmem:[#allocation7 + $0x598] sm:$0xf0] }
 0x167   :  { %2678 = vmatpush.bf16.msra.mxu2 %v4159_v49  ;;  %2640 = vmatpush.bf16.msra.mxu3 %v4731_v59  ;;  %v5285_v49 = vld [vmem:[#allocation7 + $0x22c] sm:$0xf] }
 0x168   :  { %2666 = vmatpush.bf16.msra.mxu1 %v3999_v53  ;;  %v5333_v53 = vld [vmem:[#allocation7 + $0x3ac] sm:$0xf]  ;;  %v4079_v59 = vor.u32 %v5285_v49, %v4076_v52  ;;  %v4492_v49 = vld [vmem:[#allocation7 + $0x578] sm:$0xf0]  ;;  %v4875_v52 = vor.u32 %v5487_v40, %v4874_v37 }
 0x169   :  { %v5465_v37 = vld [vmem:[#allocation7 + $0x7cc] sm:$0xf]  ;;  %v4796_v40 = vld [vmem:[#allocation7 + $0x7d8] sm:$0xf0] }
 0x16a   :  { %2656 = vmatpush.bf16.msrb.mxu0 %v3807_v57  ;;  %v4367_v57 = vor.u32 %v5357_v46, %v4364_v8  ;;  %v5389_v8 = vld [vmem:[#allocation7 + $0x56c] sm:$0xf] }
 0x16b   :  { %2679 = vmatpush.bf16.msra.mxu2 %v4143_v63  ;;  %2641 = vmatpush.bf16.msra.mxu3 %v4715_v9  ;;  %v4348_v63 = vld [vmem:[#allocation7 + $0x458] sm:$0xf0]  ;;  %v2324_v9 = vpop.f32.mrf.mxu0 }
 0x16c   :  { %2667 = vmatpush.bf16.msra.mxu1 %v3983_v4  ;;  %v5329_v4 = vld [vmem:[#allocation7 + $0x38c] sm:$0xf] }
 0x16d   :  { %2657 = vmatmul.bf16.vlgmr.msrb.gmra.mxu0 %v5968_v54  ;;  %v3951_v54 = vor.u32 %v5253_v20, %v3948_v21  ;;  %v4255_v3 = vor.u32 %v5329_v4, %v4252_v38  ;;  %v5433_v20 = vld [vmem:[#allocation7 + $0x6cc] sm:$0xf]  ;;  %v4668_v21 = vld [vmem:[#allocation7 + $0x6d8] sm:$0xf0] }
 0x16e   :  { %2705 = vmatpush.bf16.msra.mxu0 %v4431_v60  ;;  %v4271_v60 = vor.u32 %v5333_v53, %v4268_v2  ;;  %v4671_v35 = vor.u32 %v5433_v20, %v4668_v21  ;;  %v5317_v53 = vld [vmem:[#allocation7 + $0x32c] sm:$0xf]  ;;  %v4460_v21 = vld [vmem:[#allocation7 + $0x538] sm:$0xf0] }
 0x16f   :  { %2680 = vmatpush.bf16.msra.mxu2 %v4127_v25  ;;  %2642 = vmatpush.bf16.msra.mxu3 %v4699_v22  ;;  %v4063_v25 = vor.u32 %v5281_v0, %v4060_v28  ;;  %v6044_v22 = vld [vmem:[#allocation8] sm:$0xf]  ;;  %v5385_v0 = vld [vmem:[#allocation7 + $0x54c] sm:$0xf]  ;;  %v4476_v28 = vld [vmem:[#allocation7 + $0x558] sm:$0xf0] }
 0x170   :  { %2668 = vmatpush.bf16.msra.mxu1 %v3967_v33  ;;  %v4687_v33 = vor.u32 %v5437_v26, %v4684_v7  ;;  %v4867_v26 = vor.u32 %v5485_v62, %v4866_v58  ;;  %v5313_v7 = vld [vmem:[#allocation7 + $0x30c] sm:$0xf]  ;;  %v4588_v58 = vld [vmem:[#allocation7 + $0x638] sm:$0xf0] }
 0x171   :  { %v5381_v20 = vld [vmem:[#allocation7 + $0x52c] sm:$0xf] }
 0x172   :  { %2706 = vmatpush.bf16.msra.mxu0 %v4415_v10  ;;  %2643 = vmatmul.bf16.vlgmr.msra.gmra.mxu3 %v6019_v34  ;;  %v4351_v10 = vor.u32 %v5353_v61, %v4348_v63  ;;  %v5425_v61 = vld [vmem:[#allocation7 + $0x68c] sm:$0xf] }
 0x173   :  { %2681 = vmatpush.bf16.msra.mxu2 %v4111_v27  ;;  %2691 = vmatpush.bf16.msrb.mxu3 %v4303_v30  ;;  %v4335_v27 = vor.u32 %v5349_v13, %v4332_v15  ;;  %v5393_v30 = vld [vmem:[#allocation7 + $0x58c] sm:$0xf]  ;;  %v6050_v2 = vpop.f32.mrf.mxu0  ;;  %v4479_v15 = vor.u32 %v5385_v0, %v4476_v28  ;;  %v4930_v0 = vld [vmem:[#allocation10 + $0xe0] sm:$0xf] }
 0x174   :  { %2669 = vmatpush.bf16.msra.mxu1 %v3951_v54  ;;  %v6046_v39 = vpop.f32.mrf.mxu3  ;;  %v4316_v54 = vld [vmem:[#allocation7 + $0x418] sm:$0xf0]  ;;  %v5461_v62 = vld [vmem:[#allocation7 + $0x7ac] sm:$0xf] }
 0x175   :  { %v5501_v28 = vld [vmem:[#allocation10 + $0xe4] sm:$0xf0] }
 0x176   :  { %2707 = vmatpush.bf16.msra.mxu0 %v4399_v24  ;;  %v2338_v24 = vpop.f32.mrf.mxu1 }
 0x177   :  { %2682 = vmatpush.bf16.msra.mxu2 %v4095_v23  ;;  %2692 = vmatpush.bf16.msrb.mxu3 %v4287_v45  ;;  %v1025_v23 = vperm.slane %v6044_v22, 0  ;;  %v2352_v45 = vpop.f32.mrf.mxu2 }
 0x178   :  { %2670 = vmatpush.bf16.msra.mxu1 %v3935_v51  ;;  %v4223_v51 = vor.u32 %v5321_v47, %v4220_v36  ;;  %v4604_v36 = vld [vmem:[#allocation7 + $0x658] sm:$0xf0] }
 0x179   :  { %v2323_v63 = vadd.f32 %v6036_v18, %v1025_v23 }
 0x17a   :  { %2708 = vmatpush.bf16.msra.mxu0 %v4383_v41  ;;  %v4511_v41 = vor.u32 %v5393_v30, %v4508_v31 }
 0x17b   :  { %2683 = vmatpush.bf16.msra.mxu2 %v4079_v59  ;;  %2693 = vmatpush.bf16.msrb.mxu3 %v4271_v60  ;;  %v2325_v59 = vadd.f32 %v2324_v9, %v1025_v23  ;;  %v4495_v60 = vor.u32 %v5389_v8, %v4492_v49  ;;  %v2337_v18 = vadd.f32 %v6038_v50, %v2323_v63  ;;  %v5503_v8 = vld [vmem:[#allocation10 + $0xf4] sm:$0xf0] }
 0x17c   :  { %2719 = vmatpush.bf16.msrb.mxu1 %v4559_v56  ;;  %v4655_v56 = vor.u32 %v5429_v19, %v4652_v42  ;;  %v2366_v38 = vpop.f32.mrf.mxu3  ;;  %v4444_v19 = vld [vmem:[#allocation7 + $0x518] sm:$0xf0] }
 0x17d   :  { %2671 = vmatmul.bf16.vlgmr.msra.gmra.mxu1 %v5984_v48  ;;  %v5345_v48 = vld [vmem:[#allocation7 + $0x40c] sm:$0xf]  ;;  %v2339_v4 = vadd.f32 %v2338_v24, %v2325_v59  ;;  %v2351_v24 = vadd.f32 %v6041_v1, %v2337_v18  ;;  %v2380_v1 = vpop.f32.mrf.mxu0  ;;  %v4780_v59 = vld [vmem:[#allocation7 + $0x7b8] sm:$0xf0] }
 0x17e   :  { %2709 = vmatpush.bf16.msra.mxu0 %v4367_v57  ;;  %v4319_v46 = vor.u32 %v5345_v48, %v4316_v54  ;;  %v4204_v57 = vld [vmem:[#allocation7 + $0x338] sm:$0xf0]  ;;  %v6053_v44 = vpop.f32.mrf.mxu1  ;;  %v5481_v48 = vld [vmem:[#allocation10 + $0x44] sm:$0xf0] }
 0x17f   :  { %2684 = vmatpush.bf16.msra.mxu2 %v4063_v25  ;;  %2694 = vmatpush.bf16.msrb.mxu3 %v4255_v3  ;;  %v5483_v25 = vld [vmem:[#allocation10 + $0x54] sm:$0xf0]  ;;  %v5421_v3 = vld [vmem:[#allocation7 + $0x66c] sm:$0xf]  ;;  %v2353_v13 = vadd.f32 %v2352_v45, %v2339_v4  ;;  %v6058_v31 = vpop.f32.mrf.mxu2  ;;  %v2365_v47 = vadd.f32 %v6046_v39, %v2351_v24  ;;  %v4842_v39 = vld [vmem:[#allocation10 + $0x30] sm:$0xf] }
 0x180   :  { %2720 = vmatpush.bf16.msrb.mxu1 %v4543_v6  ;;  %v4207_v6 = vor.u32 %v5317_v53, %v4204_v57  ;;  %v4859_v30 = vor.u32 %v5483_v25, %v4858_v12  ;;  %v5417_v54 = vld [vmem:[#allocation7 + $0x64c] sm:$0xf]  ;;  %v4764_v12 = vld [vmem:[#allocation7 + $0x798] sm:$0xf0]  ;;  %v4931_v25 = vor.u32 %v5501_v28, %v4930_v0  ;;  %v5482_v0 = vld [vmem:[#allocation10 + $0x54] sm:$0xf] }
 0x181   :  { %v4607_v49 = vor.u32 %v5417_v54, %v4604_v36  ;;  %v5413_v53 = vld [vmem:[#allocation7 + $0x62c] sm:$0xf]  ;;  %v4860_v28 = vld [vmem:[#allocation10 + $0x58] sm:$0xf0] }
 0x182   :  { %2710 = vmatpush.bf16.msra.mxu0 %v4351_v10  ;;  %2685 = vmatmul.bf16.vlgmr.msra.gmra.mxu2 %v5992_v11  ;;  %v4636_v11 = vld [vmem:[#allocation7 + $0x698] sm:$0xf0]  ;;  %v4591_v4 = vor.u32 %v5413_v53, %v4588_v58  ;;  %v5453_v24 = vld [vmem:[#allocation7 + $0x76c] sm:$0xf]  ;;  %v4868_v53 = vld [vmem:[#allocation10 + $0x68] sm:$0xf0] }
 0x183   :  { %2733 = vmatpush.bf16.msrb.mxu2 %v4687_v33  ;;  %2695 = vmatpush.bf16.msrb.mxu3 %v4239_v43  ;;  %v4188_v10 = vld [vmem:[#allocation7 + $0x318] sm:$0xf0]  ;;  %v4639_v9 = vor.u32 %v5425_v61, %v4636_v11  ;;  %v4815_v43 = vor.u32 %v5469_v16, %v4812_v14  ;;  %v5497_v54 = vld [vmem:[#allocation10 + $0xc4] sm:$0xf0]  ;;  %v4898_v58 = vld [vmem:[#allocation10 + $0xa0] sm:$0xf] }
 0x184   :  { %2721 = vmatpush.bf16.msrb.mxu1 %v4527_v17  ;;  %v4620_v33 = vld [vmem:[#allocation7 + $0x678] sm:$0xf0]  ;;  %v4191_v17 = vor.u32 %v5313_v7, %v4188_v10  ;;  %v2420_v23 = vpop.f32.mrf.mxu3  ;;  %v5449_v36 = vld [vmem:[#allocation7 + $0x74c] sm:$0xf] }
 0x185   :  { %v4623_v50 = vor.u32 %v5421_v3, %v4620_v33  ;;  %v4572_v10 = vld [vmem:[#allocation7 + $0x618] sm:$0xf0] }
 0x186   :  { %2711 = vmatpush.bf16.msra.mxu0 %v4335_v27  ;;  %v2367_v27 = vadd.f32 %v2366_v38, %v2353_v13  ;;  %v4783_v38 = vor.u32 %v5461_v62, %v4780_v59  ;;  %v5499_v33 = vld [vmem:[#allocation10 + $0xd4] sm:$0xf0] }
 0x187   :  { %2734 = vmatpush.bf16.msrb.mxu2 %v4671_v35  ;;  %2696 = vmatpush.bf16.msrb.mxu3 %v4223_v51  ;;  %v4463_v35 = vor.u32 %v5381_v20, %v4460_v21  ;;  %v4799_v51 = vor.u32 %v5465_v37, %v4796_v40  ;;  %v5475_v20 = vld [vmem:[#allocation10 + $0x14] sm:$0xf0]  ;;  %v5486_v40 = vld [vmem:[#allocation10 + $0x74] sm:$0xf] }
 0x188   :  { %2722 = vmatpush.bf16.msrb.mxu1 %v4511_v41  ;;  %v5377_v41 = vld [vmem:[#allocation7 + $0x50c] sm:$0xf]  ;;  %v2381_v42 = vadd.f32 %v2380_v1, %v2367_v27  ;;  %v4748_v27 = vld [vmem:[#allocation7 + $0x778] sm:$0xf0] }
 0x189   :  { %v4447_v57 = vor.u32 %v5377_v41, %v4444_v19  ;;  %v4732_v37 = vld [vmem:[#allocation7 + $0x758] sm:$0xf0] }
 0x18a   :  { %2712 = vmatpush.bf16.msra.mxu0 %v4319_v46  ;;  %v4938_v46 = vld [vmem:[#allocation10 + $0xf0] sm:$0xf] }
 0x18b   :  { %2735 = vmatpush.bf16.msrb.mxu2 %v4655_v56  ;;  %2697 = vmatpush.bf16.msrb.mxu3 %v4207_v6  ;;  %v2379_v56 = vadd.f32 %v6050_v2, %v2365_v47  ;;  %v4939_v61 = vor.u32 %v5503_v8, %v4938_v46  ;;  %v4834_v6 = vld [vmem:[#allocation10 + $0x20] sm:$0xf]  ;;  %v5477_v2 = vld [vmem:[#allocation10 + $0x24] sm:$0xf0]  ;;  %v4751_v47 = vor.u32 %v5453_v24, %v4748_v27 }
 0x18c   :  { %2723 = vmatpush.bf16.msrb.mxu1 %v4495_v60  ;;  %v2394_v60 = vpop.f32.mrf.mxu1  ;;  %v2422_v18 = vpop.f32.mrf.mxu3  ;;  %v4835_v13 = vor.u32 %v5477_v2, %v4834_v6  ;;  %v5445_v8 = vld [vmem:[#allocation7 + $0x72c] sm:$0xf]  ;;  %v4890_v6 = vld [vmem:[#allocation10 + $0x90] sm:$0xf]  ;;  %v5491_v2 = vld [vmem:[#allocation10 + $0x94] sm:$0xf0] }
 0x18d   :  { %2713 = vmatmul.bf16.vlgmr.msra.gmra.mxu0 %v5986_v55  ;;  %v4850_v55 = vld [vmem:[#allocation10 + $0x40] sm:$0xf]  ;;  %v2395_v11 = vadd.f32 %v2394_v60, %v2381_v42  ;;  %v2393_v7 = vadd.f32 %v6053_v44, %v2379_v56  ;;  %v4906_v42 = vld [vmem:[#allocation10 + $0xb0] sm:$0xf] }
 0x18e   :  { %3179 = vmatpush.bf16.msrb.mxu0 %v4875_v52  ;;  %v4851_v45 = vor.u32 %v5481_v48, %v4850_v55  ;;  %v5479_v52 = vld [vmem:[#allocation10 + $0x34] sm:$0xf0]  ;;  %v4818_v55 = vld [vmem:[#allocation10] sm:$0xf] }
 0x18f   :  { %2736 = vmatpush.bf16.msrb.mxu2 %v4639_v9  ;;  %2698 = vmatpush.bf16.msrb.mxu3 %v4191_v17  ;;  %v4843_v63 = vor.u32 %v5479_v52, %v4842_v39  ;;  %v5457_v9 = vld [vmem:[#allocation7 + $0x78c] sm:$0xf]  ;;  %v4826_v17 = vld [vmem:[#allocation10 + $0x10] sm:$0xf]  ;;  %v2407_v44 = vadd.f32 %v6058_v31, %v2393_v7  ;;  %v4914_v48 = vld [vmem:[#allocation10 + $0xc0] sm:$0xf]  ;;  %v4863_v7 = vor.u32 %v5482_v0, %v4860_v28 }
 0x190   :  { %2724 = vmatpush.bf16.msrb.mxu1 %v4479_v15  ;;  %v4922_v15 = vld [vmem:[#allocation10 + $0xd0] sm:$0xf]  ;;  %v4767_v14 = vor.u32 %v5457_v9, %v4764_v12  ;;  %v4915_v1 = vor.u32 %v5497_v54, %v4914_v48  ;;  %v4716_v39 = vld [vmem:[#allocation7 + $0x738] sm:$0xf0]  ;;  %v5484_v52 = vld [vmem:[#allocation10 + $0x64] sm:$0xf]  ;;  %v4891_v12 = vor.u32 %v5491_v2, %v4890_v6 }
 0x191   :  { %v4719_v59 = vor.u32 %v5445_v8, %v4716_v39  ;;  %v4871_v60 = vor.u32 %v5484_v52, %v4868_v53  ;;  %v4852_v9 = vld [vmem:[#allocation10 + $0x48] sm:$0xf0]  ;;  %v5496_v39 = vld [vmem:[#allocation10 + $0xc4] sm:$0xf]  ;;  %v4994_v28 = vld [vmem:[#allocation10 + $0x160] sm:$0xf] }
 0x192   :  { %3180 = vmatpush.bf16.msrb.mxu0 %v4867_v26  ;;  %2699 = vmatmul.bf16.vlgmr.msrb.gmra.mxu3 %v6009_v29  ;;  %v5409_v26 = vld [vmem:[#allocation7 + $0x60c] sm:$0xf]  ;;  %v2408_v29 = vpop.f32.mrf.mxu2  ;;  %v4836_v48 = vld [vmem:[#allocation10 + $0x28] sm:$0xf0] }
 0x193   :  { %2737 = vmatpush.bf16.msrb.mxu2 %v4623_v50  ;;  %2747 = vmatpush.bf16.msra.mxu3 %v4815_v43  ;;  %v2409_v3 = vadd.f32 %v2408_v29, %v2395_v11  ;;  %v4575_v16 = vor.u32 %v5409_v26, %v4572_v10  ;;  %v2421_v50 = vadd.f32 %v2420_v23, %v2407_v44  ;;  %v5495_v23 = vld [vmem:[#allocation10 + $0xb4] sm:$0xf0]  ;;  %v5480_v10 = vld [vmem:[#allocation10 + $0x44] sm:$0xf]  ;;  %v4916_v52 = vld [vmem:[#allocation10 + $0xc8] sm:$0xf0] }
 0x194   :  { %2725 = vmatpush.bf16.msrb.mxu1 %v4463_v35  ;;  %v4827_v43 = vor.u32 %v5475_v20, %v4826_v17  ;;  %v5473_v35 = vld [vmem:[#allocation10 + $0x4] sm:$0xf0]  ;;  %v4907_v56 = vor.u32 %v5495_v23, %v4906_v42  ;;  %v2448_v11 = vpop.f32.mrf.mxu1  ;;  %v4844_v17 = vld [vmem:[#allocation10 + $0x38] sm:$0xf0]  ;;  %v4820_v53 = vld [vmem:[#allocation10 + $0x8] sm:$0xf0] }
 0x195   :  { %v2423_v21 = vadd.f32 %v2422_v18, %v2409_v3  ;;  %v2769_v41 = vmul.f32 0.02, %v2421_v50  ;;  %v4819_v19 = vor.u32 %v5473_v35, %v4818_v55  ;;  %vm2761_vm3 = vcmp.gt.f32.partialorder %v2421_v50, 0.0  ;;  %v5489_v3 = vld [vmem:[#allocation10 + $0x84] sm:$0xf0]  ;;  %v2476_v18 = vpop.f32.mrf.mxu3 }
 0x196   :  { %3181 = vmatpush.bf16.msrb.mxu0 %v4859_v30  ;;  %v4923_v30 = vor.u32 %v5499_v33, %v4922_v15  ;;  %v5502_v15 = vld [vmem:[#allocation10 + $0xf4] sm:$0xf]  ;;  %v4940_v33 = vld [vmem:[#allocation10 + $0xf8] sm:$0xf0]  ;;  %v5476_v55 = vld [vmem:[#allocation10 + $0x24] sm:$0xf] }
 0x197   :  { %2738 = vmatpush.bf16.msrb.mxu2 %v4607_v49  ;;  %2748 = vmatpush.bf16.msra.mxu3 %v4799_v51  ;;  %v2773_v31 = vmul.f32 0.02, %v2423_v21  ;;  %vm2765_vm2 = vcmp.gt.f32.partialorder %v2423_v21, 0.0  ;;  %v2434_v49 = vpop.f32.mrf.mxu0 }
 0x198   :  { %2726 = vmatpush.bf16.msrb.mxu1 %v4447_v57  ;;  %v2777_v57 = vsel %vm2761_vm3, %v2421_v50, %v2769_v41  ;;  %v4932_v50 = vld [vmem:[#allocation10 + $0xe8] sm:$0xf0] }
 0x199   :  { %v2781_v51 = vsel %vm2765_vm2, %v2423_v21, %v2773_v31  ;;  %v4943_v21 = vor.u32 %v5502_v15, %v4940_v33  ;;  %v5498_v31 = vld [vmem:[#allocation10 + $0xd4] sm:$0xf] }
 0x19a   :  { %3182 = vmatpush.bf16.msrb.mxu0 %v4851_v45  ;;  %v4735_v45 = vor.u32 %v5449_v36, %v4732_v37  ;;  %v6067_v62 = vpack.c.bf16 %v2781_v51, %v2777_v57  ;;  %v4839_v37 = vor.u32 %v5476_v55, %v4836_v48  ;;  %v5472_v51 = vld [vmem:[#allocation10 + $0x4] sm:$0xf]  ;;  %v5519_v57 = vld [vmem:[#allocation10 + $0x174] sm:$0xf0]  ;;  %v4884_v48 = vld [vmem:[#allocation10 + $0x88] sm:$0xf0] }
 0x19b   :  { %2739 = vmatpush.bf16.msrb.mxu2 %v4591_v4  ;;  %2749 = vmatpush.bf16.msra.mxu3 %v4783_v38  ;;  %v2462_v4 = vpop.f32.mrf.mxu2  ;;  %v5488_v55 = vld [vmem:[#allocation10 + $0x84] sm:$0xf] }
 0x19c   :  { %3193 = vmatpush.bf16.msra.mxu1 %v4939_v61  ;;  %v5441_v61 = vld [vmem:[#allocation7 + $0x70c] sm:$0xf]  ;;  %v2450_v44 = vpop.f32.mrf.mxu1 }
 0x19d   :  { %2727 = vmatmul.bf16.vlgmr.msrb.gmra.mxu1 %v6003_v5  ;;  %v4876_v5 = vld [vmem:[#allocation10 + $0x78] sm:$0xf0] }
 0x19e   :  { %3183 = vmatpush.bf16.msrb.mxu0 %v4843_v63  ;;  %v4879_v46 = vor.u32 %v5486_v40, %v4876_v5  ;;  %v4700_v63 = vld [vmem:[#allocation7 + $0x718] sm:$0xf0]  ;;  %v4924_v40 = vld [vmem:[#allocation10 + $0xd8] sm:$0xf0]  ;;  %v5474_v5 = vld [vmem:[#allocation10 + $0x14] sm:$0xf] }
 0x19f   :  { %2740 = vmatpush.bf16.msrb.mxu2 %v4575_v16  ;;  %2750 = vmatpush.bf16.msra.mxu3 %v4767_v14  ;;  %v4703_v26 = vor.u32 %v5441_v61, %v4700_v63  ;;  %v2436_v29 = vpop.f32.mrf.mxu0  ;;  %v1026_v16 = vperm.slane %v6044_v22, 1  ;;  %v5478_v14 = vld [vmem:[#allocation10 + $0x34] sm:$0xf]  ;;  %v4823_v61 = vor.u32 %v5472_v51, %v4820_v53  ;;  %v4908_v63 = vld [vmem:[#allocation10 + $0xb8] sm:$0xf0] }
 0x1a0   :  { %3194 = vmatpush.bf16.msra.mxu1 %v4931_v25  ;;  %v4882_v25 = vld [vmem:[#allocation10 + $0x80] sm:$0xf]  ;;  %v4847_v27 = vor.u32 %v5478_v14, %v4844_v17  ;;  %v5490_v14 = vld [vmem:[#allocation10 + $0x94] sm:$0xf]  ;;  %v4892_v17 = vld [vmem:[#allocation10 + $0x98] sm:$0xf0] }
 0x1a1   :  { %v4883_v20 = vor.u32 %v5489_v3, %v4882_v25  ;;  %v2437_v36 = vadd.f32 %v2436_v29, %v1026_v16  ;;  %v4986_v25 = vld [vmem:[#allocation10 + $0x150] sm:$0xf] }
 0x1a2   :  { %3184 = vmatpush.bf16.msrb.mxu0 %v4835_v13  ;;  %2741 = vmatmul.bf16.vlgmr.msrb.gmra.mxu2 %v6011_v32  ;;  %v5493_v32 = vld [vmem:[#allocation10 + $0xa4] sm:$0xf0]  ;;  %v4855_v13 = vor.u32 %v5480_v10, %v4852_v9  ;;  %v5492_v10 = vld [vmem:[#allocation10 + $0xa4] sm:$0xf]  ;;  %v4900_v9 = vld [vmem:[#allocation10 + $0xa8] sm:$0xf0] }
 0x1a3   :  { %2751 = vmatpush.bf16.msra.mxu3 %v4751_v47  ;;  %v4899_v38 = vor.u32 %v5493_v32, %v4898_v58  ;;  %v2464_v24 = vpop.f32.mrf.mxu2  ;;  %v2451_v41 = vadd.f32 %v2450_v44, %v2437_v36  ;;  %v4903_v33 = vor.u32 %v5492_v10, %v4900_v9  ;;  %v4978_v44 = vld [vmem:[#allocation10 + $0x140] sm:$0xf]  ;;  %v5508_v10 = vld [vmem:[#allocation10 + $0x124] sm:$0xf]  ;;  %v4964_v9 = vld [vmem:[#allocation10 + $0x128] sm:$0xf0] }
 0x1a4   :  { %3195 = vmatpush.bf16.msra.mxu1 %v4923_v30  ;;  %v5500_v30 = vld [vmem:[#allocation10 + $0xe4] sm:$0xf]  ;;  %v2504_v23 = vpop.f32.mrf.mxu1 }
 0x1a5   :  { %v4935_v35 = vor.u32 %v5500_v30, %v4932_v50 }
 0x1a6   :  { %3185 = vmatpush.bf16.msrb.mxu0 %v4827_v43  ;;  %v2435_v43 = vadd.f32 %v2434_v49, %v1026_v16 }
 0x1a7   :  { %2752 = vmatpush.bf16.msra.mxu3 %v4735_v45  ;;  %v2490_v47 = vpop.f32.mrf.mxu0  ;;  %v4927_v45 = vor.u32 %v5498_v31, %v4924_v40 }
 0x1a8   :  { %3196 = vmatpush.bf16.msra.mxu1 %v4915_v1  ;;  %v2449_v54 = vadd.f32 %v2448_v11, %v2435_v43  ;;  %v4828_v1 = vld [vmem:[#allocation10 + $0x18] sm:$0xf0]  ;;  %v5494_v11 = vld [vmem:[#allocation10 + $0xb4] sm:$0xf]  ;;  %v4895_v43 = vor.u32 %v5490_v14, %v4892_v17 }
 0x1a9   :  { %v4831_v49 = vor.u32 %v5474_v5, %v4828_v1  ;;  %v5509_v5 = vld [vmem:[#allocation10 + $0x124] sm:$0xf0] }
 0x1aa   :  { %3186 = vmatpush.bf16.msrb.mxu0 %v4819_v19  ;;  %v2478_v19 = vpop.f32.mrf.mxu3 }
 0x1ab   :  { %2753 = vmatpush.bf16.msra.mxu3 %v4719_v59  ;;  %v2518_v8 = vpop.f32.mrf.mxu2 }
 0x1ac   :  { %3197 = vmatpush.bf16.msra.mxu1 %v4907_v56  ;;  %v5002_v56 = vld [vmem:[#allocation10 + $0x170] sm:$0xf] }
 0x1ad   :  { %3187 = vmatmul.bf16.vlgmr.msrb.gmra.mxu0 %v6067_v62  ;;  %v5003_v32 = vor.u32 %v5519_v57, %v5002_v56  ;;  %v5514_v57 = vld [vmem:[#allocation10 + $0x154] sm:$0xf] }
 0x1ae   :  { %3235 = vmatpush.bf16.msra.mxu0 %v4879_v46  ;;  %v2465_v46 = vadd.f32 %v2464_v24, %v2451_v41  ;;  %v4954_v41 = vld [vmem:[#allocation10 + $0x110] sm:$0xf] }
 0x1af   :  { %2754 = vmatpush.bf16.msra.mxu3 %v4703_v26  ;;  %3207 = vmatpush.bf16.msra.mxu2 %v5003_v32  ;;  %v2492_v0 = vpop.f32.mrf.mxu0 }
 0x1b0   :  { %3198 = vmatpush.bf16.msra.mxu1 %v4899_v38  ;;  %v2479_v58 = vadd.f32 %v2478_v19, %v2465_v46  ;;  %v5507_v19 = vld [vmem:[#allocation10 + $0x114] sm:$0xf0] }
 0x1b2   :  { %3236 = vmatpush.bf16.msra.mxu0 %v4871_v60  ;;  %2755 = vmatmul.bf16.vlgmr.msra.gmra.mxu3 %v6019_v34  ;;  %v2463_v34 = vadd.f32 %v2462_v4, %v2449_v54  ;;  %v4919_v60 = vor.u32 %v5496_v39, %v4916_v52  ;;  %v5517_v4 = vld [vmem:[#allocation10 + $0x164] sm:$0xf0]  ;;  %v2493_v38 = vadd.f32 %v2492_v0, %v2479_v58  ;;  %v4970_v54 = vld [vmem:[#allocation10 + $0x130] sm:$0xf]  ;;  %v5516_v39 = vld [vmem:[#allocation10 + $0x164] sm:$0xf] }
 0x1b3   :  { %v4995_v2 = vor.u32 %v5517_v4, %v4994_v28  ;;  %v4996_v52 = vld [vmem:[#allocation10 + $0x168] sm:$0xf0]  ;;  %v4988_v58 = vld [vmem:[#allocation10 + $0x158] sm:$0xf0]  ;;  %v5510_v4 = vld [vmem:[#allocation10 + $0x134] sm:$0xf] }
 0x1b4   :  { %3199 = vmatpush.bf16.msra.mxu1 %v4891_v12  ;;  %v2477_v42 = vadd.f32 %v2476_v18, %v2463_v34  ;;  %v2506_v12 = vpop.f32.mrf.mxu1  ;;  %v2520_v18 = vpop.f32.mrf.mxu2  ;;  %v4962_v34 = vld [vmem:[#allocation10 + $0x120] sm:$0xf]  ;;  %v4999_v53 = vor.u32 %v5516_v39, %v4996_v52  ;;  %v4991_v32 = vor.u32 %v5514_v57, %v4988_v58  ;;  %v5034_v58 = vld [vmem:[#allocation10 + $0x1b0] sm:$0xf] }
 0x1b5   :  { %v2532_v6 = vpop.f32.mrf.mxu3  ;;  %3208 = vmatpush.bf16.msra.mxu2 %v4995_v2  ;;  %v2507_v3 = vadd.f32 %v2506_v12, %v2493_v38  ;;  %v4963_v1 = vor.u32 %v5509_v5, %v4962_v34  ;;  %v4972_v38 = vld [vmem:[#allocation10 + $0x138] sm:$0xf0] }
 0x1b6   :  { %3237 = vmatpush.bf16.msra.mxu0 %v4863_v7  ;;  %v2491_v59 = vadd.f32 %v2490_v47, %v2477_v42  ;;  %v4911_v7 = vor.u32 %v5494_v11, %v4908_v63  ;;  %v5511_v47 = vld [vmem:[#allocation10 + $0x134] sm:$0xf0]  ;;  %v4955_v42 = vor.u32 %v5507_v19, %v4954_v41  ;;  %v4980_v11 = vld [vmem:[#allocation10 + $0x148] sm:$0xf0]  ;;  %v4975_v2 = vor.u32 %v5510_v4, %v4972_v38  ;;  %v5018_v4 = vld [vmem:[#allocation10 + $0x190] sm:$0xf] }
 0x1b7   :  { %v4971_v31 = vor.u32 %v5511_v47, %v4970_v54  ;;  %v2546_v56 = vpop.f32.mrf.mxu0  ;;  %v5058_v47 = vld [vmem:[#allocation10 + $0x1e0] sm:$0xf]  ;;  %v5523_v38 = vld [vmem:[#allocation10 + $0x194] sm:$0xf0] }
 0x1b8   :  { %3200 = vmatpush.bf16.msra.mxu1 %v4883_v20  ;;  %v2505_v26 = vadd.f32 %v2504_v23, %v2491_v59  ;;  %v2521_v20 = vadd.f32 %v2520_v18, %v2507_v3  ;;  %v4946_v23 = vld [vmem:[#allocation10 + $0x100] sm:$0xf]  ;;  %v5506_v18 = vld [vmem:[#allocation10 + $0x114] sm:$0xf] }
 0x1ba   :  { %3238 = vmatpush.bf16.msra.mxu0 %v4855_v13  ;;  %v2519_v29 = vadd.f32 %v2518_v8, %v2505_v26  ;;  %v5515_v13 = vld [vmem:[#allocation10 + $0x154] sm:$0xf0]  ;;  %v5518_v8 = vld [vmem:[#allocation10 + $0x174] sm:$0xf] }
 0x1bb   :  { %v4987_v16 = vor.u32 %v5515_v13, %v4986_v25  ;;  %v4956_v13 = vld [vmem:[#allocation10 + $0x118] sm:$0xf0] }
 0x1bc   :  { %3249 = vmatpush.bf16.msrb.mxu1 %v4943_v21  ;;  %v2533_v15 = vadd.f32 %v2532_v6, %v2519_v29  ;;  %v5513_v21 = vld [vmem:[#allocation10 + $0x144] sm:$0xf0]  ;;  %v2560_v59 = vpop.f32.mrf.mxu1  ;;  %v1027_v6 = vperm.slane %v6044_v22, 2  ;;  %v4967_v29 = vor.u32 %v5508_v10, %v4964_v9  ;;  %v5534_v10 = vld [vmem:[#allocation10 + $0x1f4] sm:$0xf] }
 0x1bd   :  { %3209 = vmatpush.bf16.msra.mxu2 %v4987_v16  ;;  %v2534_v24 = vpop.f32.mrf.mxu3  ;;  %v4959_v16 = vor.u32 %v5506_v18, %v4956_v13  ;;  %v5068_v9 = vld [vmem:[#allocation10 + $0x1f8] sm:$0xf0]  ;;  %v5530_v13 = vld [vmem:[#allocation10 + $0x1d4] sm:$0xf] }
 0x1be   :  { %3239 = vmatpush.bf16.msra.mxu0 %v4847_v27  ;;  %v4979_v27 = vor.u32 %v5513_v21, %v4978_v44  ;;  %v2770_v30 = vmul.f32 0.02, %v2533_v15  ;;  %v2535_v50 = vadd.f32 %v2534_v24, %v2521_v20  ;;  %vm2762_vm4 = vcmp.gt.f32.partialorder %v2533_v15, 0.0  ;;  %v5504_v24 = vld [vmem:[#allocation10 + $0x104] sm:$0xf] }
 0x1bf   :  { %v2548_v0 = vpop.f32.mrf.mxu0  ;;  %v2547_v12 = vadd.f32 %v2546_v56, %v1027_v6 }
 0x1c0   :  { %3250 = vmatpush.bf16.msrb.mxu1 %v4935_v35  ;;  %vm2766_vm5 = vcmp.gt.f32.partialorder %v2535_v50, 0.0  ;;  %v2778_v35 = vsel %vm2762_vm4, %v2533_v15, %v2770_v30  ;;  %v2549_v15 = vadd.f32 %v2548_v0, %v1027_v6  ;;  %v5525_v0 = vld [vmem:[#allocation10 + $0x1a4] sm:$0xf0]  ;;  %v5019_v6 = vor.u32 %v5523_v38, %v5018_v4 }
 0x1c1   :  { %3210 = vmatpush.bf16.msra.mxu2 %v4979_v27  ;;  %v2561_v25 = vadd.f32 %v2560_v59, %v2547_v12  ;;  %v4948_v27 = vld [vmem:[#allocation10 + $0x108] sm:$0xf0]  ;;  %v5071_v12 = vor.u32 %v5534_v10, %v5068_v9  ;;  %v5540_v9 = vld [vmem:[#allocation11 + $0x20] sm:$0xff] }
 0x1c2   :  { %3240 = vmatpush.bf16.msra.mxu0 %v4839_v37  ;;  %v4887_v37 = vor.u32 %v5488_v55, %v4884_v48  ;;  %v5535_v55 = vld [vmem:[#allocation10 + $0x1f4] sm:$0xf0]  ;;  %v5541_v10 = vld [vmem:[#allocation11 + $0x28] sm:$0xff] }
 0x1c4   :  { %3251 = vmatpush.bf16.msrb.mxu1 %v4927_v45  ;;  %v5505_v45 = vld [vmem:[#allocation10 + $0x104] sm:$0xf0]  ;;  %v2562_v26 = vpop.f32.mrf.mxu1 }
 0x1c5   :  { %3211 = vmatpush.bf16.msra.mxu2 %v4971_v31  ;;  %v4947_v46 = vor.u32 %v5505_v45, %v4946_v23  ;;  %v2563_v17 = vadd.f32 %v2562_v26, %v2549_v15  ;;  %v5521_v26 = vld [vmem:[#allocation10 + $0x184] sm:$0xf0]  ;;  %v5052_v15 = vld [vmem:[#allocation10 + $0x1d8] sm:$0xf0] }
 0x1c6   :  { %3241 = vmatpush.bf16.msra.mxu0 %v4831_v49  ;;  %v5004_v49 = vld [vmem:[#allocation10 + $0x178] sm:$0xf0] }
 0x1c7   :  { %v5007_v51 = vor.u32 %v5518_v8, %v5004_v49  ;;  %v5042_v49 = vld [vmem:[#allocation10 + $0x1c0] sm:$0xf] }
 0x1c8   :  { %3252 = vmatpush.bf16.msrb.mxu1 %v4919_v60  ;;  %v2574_v60 = vpop.f32.mrf.mxu2 }
 0x1c9   :  { %3212 = vmatpush.bf16.msra.mxu2 %v4963_v1  ;;  %v5050_v1 = vld [vmem:[#allocation10 + $0x1d0] sm:$0xf] }
 0x1ca   :  { %3242 = vmatpush.bf16.msra.mxu0 %v4823_v61  ;;  %v5512_v61 = vld [vmem:[#allocation10 + $0x144] sm:$0xf]  ;;  %v2602_v3 = vpop.f32.mrf.mxu0 }
 0x1cb   :  { %v4983_v63 = vor.u32 %v5512_v61, %v4980_v11 }
 0x1cc   :  { %3253 = vmatpush.bf16.msrb.mxu1 %v4911_v7 }
 0x1cd   :  { %3243 = vmatmul.bf16.vlgmr.msra.gmra.mxu0 %v6067_v62  ;;  %v2774_v62 = vmul.f32 0.02, %v2535_v50  ;;  %3213 = vmatpush.bf16.msra.mxu2 %v4955_v42  ;;  %v5531_v42 = vld [vmem:[#allocation10 + $0x1d4] sm:$0xf0] }
 0x1cf   :  { %v2782_v36 = vsel %vm2766_vm5, %v2535_v50, %v2774_v62  ;;  %v4951_v50 = vor.u32 %v5504_v24, %v4948_v27  ;;  %v5526_v27 = vld [vmem:[#allocation10 + $0x1b4] sm:$0xf] }
 0x1d0   :  { %3254 = vmatpush.bf16.msrb.mxu1 %v4903_v33  ;;  %v2786_v40 = vpack.c.bf16 %v2782_v36, %v2778_v35  ;;  %v2576_v7 = vpop.f32.mrf.mxu2  ;;  %v2575_v33 = vadd.f32 %v2574_v60, %v2561_v25  ;;  %v5533_v35 = vld [vmem:[#allocation10 + $0x1e4] sm:$0xf0]  ;;  %v5060_v25 = vld [vmem:[#allocation10 + $0x1e8] sm:$0xf0] }
 0x1d1   :  { %3214 = vmatpush.bf16.msra.mxu2 %v4947_v46  ;;  %v2577_v30 = vadd.f32 %v2576_v7, %v2563_v17  ;;  %v5059_v31 = vor.u32 %v5533_v35, %v5058_v47  ;;  %v5051_v46 = vor.u32 %v5531_v42, %v5050_v1  ;;  %v5528_v17 = vld [vmem:[#allocation10 + $0x1c4] sm:$0xf] }
 0x1d2   :  { %3201 = vmatmul.bf16.vlgmr.msra.gmra.mxu1 %v2786_v40  ;;  %v2604_v36 = vpop.f32.mrf.mxu0 }
 0x1d4   :  { %3255 = vmatpush.bf16.msrb.mxu1 %v4895_v43  ;;  %v5066_v43 = vld [vmem:[#allocation10 + $0x1f0] sm:$0xf] }
 0x1d5   :  { %3263 = vmatpush.bf16.msrb.mxu2 %v5007_v51  ;;  %v2588_v28 = vpop.f32.mrf.mxu3  ;;  %v5067_v48 = vor.u32 %v5535_v55, %v5066_v43  ;;  %v5529_v51 = vld [vmem:[#allocation10 + $0x1c4] sm:$0xf0]  ;;  %v5524_v55 = vld [vmem:[#allocation10 + $0x1a4] sm:$0xf] }
 0x1d6   :  { %v2589_v20 = vadd.f32 %v2588_v28, %v2575_v33  ;;  %v5043_v52 = vor.u32 %v5529_v51, %v5042_v49  ;;  %v5055_v33 = vor.u32 %v5530_v13, %v5052_v15  ;;  %v5549_v13 = vld [vmem:[#allocation11 + $0x68] sm:$0xff]  ;;  %v5536_v15 = vld [vmem:[#allocation11] sm:$0xff] }
 0x1d7   :  { %3221 = vmatpush.bf16.msrb.mxu3 %v5067_v48  ;;  %v5028_v48 = vld [vmem:[#allocation10 + $0x1a8] sm:$0xf0] }
 0x1d8   :  { %3256 = vmatpush.bf16.msrb.mxu1 %v4887_v37  ;;  %v2603_v62 = vadd.f32 %v2602_v3, %v2589_v20  ;;  %v5044_v20 = vld [vmem:[#allocation10 + $0x1c8] sm:$0xf0]  ;;  %v5031_v47 = vor.u32 %v5524_v55, %v5028_v48 }
 0x1d9   :  { %3264 = vmatpush.bf16.msrb.mxu2 %v4999_v53 }
 0x1da   :  { %v2616_v44 = vpop.f32.mrf.mxu1 }
 0x1db   :  { %3222 = vmatpush.bf16.msrb.mxu3 %v5059_v31  ;;  %v5522_v31 = vld [vmem:[#allocation10 + $0x194] sm:$0xf] }
 0x1dd   :  { %3265 = vmatpush.bf16.msrb.mxu2 %v4991_v32  ;;  %v2590_v14 = vpop.f32.mrf.mxu3  ;;  %v5527_v32 = vld [vmem:[#allocation10 + $0x1b4] sm:$0xf0] }
 0x1de   :  { %v2591_v54 = vadd.f32 %v2590_v14, %v2577_v30  ;;  %v5035_v61 = vor.u32 %v5527_v32, %v5034_v58  ;;  %v5036_v30 = vld [vmem:[#allocation10 + $0x1b8] sm:$0xf0] }
 0x1df   :  { %3223 = vmatpush.bf16.msrb.mxu3 %v5051_v46  ;;  %v5039_v43 = vor.u32 %v5526_v27, %v5036_v30  ;;  %v5012_v46 = vld [vmem:[#allocation10 + $0x188] sm:$0xf0]  ;;  %v5544_v30 = vld [vmem:[#allocation11 + $0x40] sm:$0xff] }
 0x1e0   :  { %v2605_v34 = vadd.f32 %v2604_v36, %v2591_v54 }
 0x1e1   :  { %3266 = vmatpush.bf16.msrb.mxu2 %v4983_v63  ;;  %v5026_v63 = vld [vmem:[#allocation10 + $0x1a0] sm:$0xf] }
 0x1e2   :  { %3257 = vmatmul.bf16.vlgmr.msrb.gmra.mxu1 %v2786_v40  ;;  %v2617_v40 = vadd.f32 %v2616_v44, %v2603_v62  ;;  %v2618_v41 = vpop.f32.mrf.mxu1  ;;  %v5027_v28 = vor.u32 %v5525_v0, %v5026_v63  ;;  %v5047_v44 = vor.u32 %v5528_v17, %v5044_v20 }
 0x1e3   :  { %v2619_v23 = vadd.f32 %v2618_v41, %v2605_v34  ;;  %3224 = vmatpush.bf16.msrb.mxu3 %v5043_v52 }
 0x1e5   :  { %3267 = vmatpush.bf16.msrb.mxu2 %v4975_v2  ;;  %v2630_v21 = vpop.f32.mrf.mxu2  ;;  %v5010_v2 = vld [vmem:[#allocation10 + $0x180] sm:$0xf] }
 0x1e6   :  { %v2631_v5 = vadd.f32 %v2630_v21, %v2617_v40  ;;  %v5011_v7 = vor.u32 %v5521_v26, %v5010_v2  ;;  %v5020_v40 = vld [vmem:[#allocation10 + $0x198] sm:$0xf0] }
 0x1e7   :  { %3225 = vmatpush.bf16.msrb.mxu3 %v5035_v61  ;;  %v5023_v1 = vor.u32 %v5522_v31, %v5020_v40  ;;  %v5543_v26 = vld [vmem:[#allocation11 + $0x38] sm:$0xff] }
 0x1e8   :  { %3437 = vmatpush.bf16.msrb.mxu0 %v5543_v26  ;;  %v5556_v26 = vld [vmem:[%s6122_s11 + $0x20] sm:$0xff] }
 0x1e9   :  { %3268 = vmatpush.bf16.msrb.mxu2 %v4967_v29  ;;  %v5532_v29 = vld [vmem:[#allocation10 + $0x1e4] sm:$0xf] }
 0x1ea   :  { %v5063_v3 = vor.u32 %v5532_v29, %v5060_v25  ;;  %v2658_v18 = vpop.f32.mrf.mxu0  ;;  %v5551_v29 = vld [vmem:[#allocation11 + $0x78] sm:$0xff]  ;;  %v5538_v25 = vld [vmem:[#allocation11 + $0x10] sm:$0xff] }
 0x1eb   :  { %3226 = vmatpush.bf16.msrb.mxu3 %v5027_v28  ;;  %3451 = vmatpush.bf16.msra.mxu1 %v5551_v29 }
 0x1ed   :  { %3269 = vmatpush.bf16.msrb.mxu2 %v4959_v16  ;;  %v2632_v19 = vpop.f32.mrf.mxu2 }
 0x1ee   :  { %v2633_v8 = vadd.f32 %v2632_v19, %v2619_v23 }
 0x1ef   :  { %3227 = vmatpush.bf16.msrb.mxu3 %v5019_v6 }
 0x1f1   :  { %3270 = vmatpush.bf16.msrb.mxu2 %v4951_v50  ;;  %v1028_v50 = vperm.slane %v6044_v22, 3 }
 0x1f2   :  { %v2660_v21 = vpop.f32.mrf.mxu0 }
 0x1f3   :  { %3228 = vmatpush.bf16.msrb.mxu3 %v5011_v7  ;;  %v2659_v35 = vadd.f32 %v2658_v18, %v1028_v50  ;;  %v2661_v34 = vadd.f32 %v2660_v21, %v1028_v50  ;;  %v5542_v7 = vld [vmem:[#allocation11 + $0x30] sm:$0xff]  ;;  %v5537_v18 = vld [vmem:[#allocation11 + $0x8] sm:$0xff] }
 0x1f4   :  { %3438 = vmatpush.bf16.msrb.mxu0 %v5542_v7  ;;  %v5545_v21 = vld [vmem:[#allocation11 + $0x48] sm:$0xff]  ;;  %v5555_v7 = vld [vmem:[%s6122_s11 + $0x18] sm:$0xff] }
 0x1f5   :  { %v2644_v37 = vpop.f32.mrf.mxu3 }
 0x1f6   :  { %v2645_v45 = vadd.f32 %v2644_v37, %v2631_v5 }
 0x1f7   :  { %3277 = vmatpush.bf16.msra.mxu3 %v5071_v12  ;;  %v5539_v12 = vld [vmem:[#allocation11 + $0x18] sm:$0xff] }
 0x1f8   :  { %v2771_v53 = vmul.f32 0.02, %v2645_v45  ;;  %vm2763_vm6 = vcmp.gt.f32.partialorder %v2645_v45, 0.0  ;;  %3439 = vmatpush.bf16.msrb.mxu0 %v5541_v10  ;;  %v5554_v10 = vld [vmem:[%s6122_s11 + $0x10] sm:$0xff] }
 0x1fa   :  { %v2779_v59 = vsel %vm2763_vm6, %v2645_v45, %v2771_v53  ;;  %v2672_v16 = vpop.f32.mrf.mxu1  ;;  %v5520_v45 = vld [vmem:[#allocation10 + $0x184] sm:$0xf] }
 0x1fb   :  { %3278 = vmatpush.bf16.msra.mxu3 %v5063_v3  ;;  %v2673_v36 = vadd.f32 %v2672_v16, %v2659_v35  ;;  %v5015_v49 = vor.u32 %v5520_v45, %v5012_v46  ;;  %v5550_v3 = vld [vmem:[#allocation11 + $0x70] sm:$0xff]  ;;  %v5547_v16 = vld [vmem:[#allocation11 + $0x58] sm:$0xff] }
 0x1fc   :  { %3440 = vmatpush.bf16.msrb.mxu0 %v5540_v9  ;;  %3452 = vmatpush.bf16.msra.mxu1 %v5550_v3  ;;  %v5553_v9 = vld [vmem:[%s6122_s11 + $0x8] sm:$0xff] }
 0x1fd   :  { %v2646_v39 = vpop.f32.mrf.mxu3 }
 0x1fe   :  { %v2647_v56 = vadd.f32 %v2646_v39, %v2633_v8 }
 0x1ff   :  { %3279 = vmatpush.bf16.msra.mxu3 %v5055_v33  ;;  %v5548_v33 = vld [vmem:[#allocation11 + $0x60] sm:$0xff] }
 0x200   :  { %vm2767_vm7 = vcmp.gt.f32.partialorder %v2647_v56, 0.0  ;;  %v2775_v57 = vmul.f32 0.02, %v2647_v56  ;;  %3441 = vmatpush.bf16.msrb.mxu0 %v5539_v12  ;;  %3453 = vmatpush.bf16.msra.mxu1 %v5549_v13  ;;  %v5552_v12 = vld [vmem:[%s6122_s11] sm:$0xff] }
 0x202   :  { %v2783_v60 = vsel %vm2767_vm7, %v2647_v56, %v2775_v57  ;;  %v2674_v62 = vpop.f32.mrf.mxu1 }
 0x203   :  { %v2787_v11 = vpack.c.bf16 %v2783_v60, %v2779_v59  ;;  %3280 = vmatpush.bf16.msra.mxu3 %v5047_v44  ;;  %v2675_v19 = vadd.f32 %v2674_v62, %v2661_v34 }
 0x204   :  { %3442 = vmatpush.bf16.msrb.mxu0 %v5538_v25  ;;  %3454 = vmatpush.bf16.msra.mxu1 %v5548_v33  ;;  %v5576_v25 = vld [vmem:[#allocation13] ss:$0 sm:$0xff] }
 0x205   :  { %3215 = vmatmul.bf16.vlgmr.msra.gmra.mxu2 %v2787_v11  ;;  %v2686_v14 = vpop.f32.mrf.mxu2 }
 0x206   :  { %v2687_v5 = vadd.f32 %v2686_v14, %v2673_v36  ;;  %v5546_v14 = vld [vmem:[#allocation11 + $0x50] sm:$0xff] }
 0x207   :  { %3281 = vmatpush.bf16.msra.mxu3 %v5039_v43 }
 0x208   :  { %3443 = vmatpush.bf16.msrb.mxu0 %v5537_v18  ;;  %3455 = vmatpush.bf16.msra.mxu1 %v5547_v16 }
 0x20a   :  { %v2714_v37 = vpop.f32.mrf.mxu0 }
 0x20b   :  { %3282 = vmatpush.bf16.msra.mxu3 %v5031_v47 }
 0x20c   :  { %3444 = vmatpush.bf16.msrb.mxu0 %v5536_v15  ;;  %3456 = vmatpush.bf16.msra.mxu1 %v5546_v14 }
 0x20d   :  { %v2688_v54 = vpop.f32.mrf.mxu2 }
 0x20e   :  { %v2689_v8 = vadd.f32 %v2688_v54, %v2675_v19 }
 0x20f   :  { %3283 = vmatpush.bf16.msra.mxu3 %v5023_v1 }
 0x210   :  { %3457 = vmatpush.bf16.msra.mxu1 %v5545_v21 }
 0x212   :  { %v2716_v52 = vpop.f32.mrf.mxu0 }
 0x213   :  { %3284 = vmatpush.bf16.msra.mxu3 %v5015_v49 }
 0x214   :  { %3458 = vmatpush.bf16.msra.mxu1 %v5544_v30 }
 0x215   :  { %3271 = vmatmul.bf16.vlgmr.msrb.gmra.mxu2 %v2787_v11  ;;  %v2700_v24 = vpop.f32.mrf.mxu3 }
 0x216   :  { %v2701_v42 = vadd.f32 %v2700_v24, %v2687_v5  ;;  %v2853_v24 = vld [vmem:[%s6119_s8] sm:$0x3] }
 0x217   :  { %v2855_v27 = vperm.slane %v2853_v24, 0 }
 0x218   :  { %v2715_v51 = vadd.f32 %v2714_v37, %v2701_v42  ;;  %v2856_v42 = vperm.slane %v2853_v24, 1 }
 0x21a   :  { %v2728_v22 = vpop.f32.mrf.mxu1 }
 0x21b   :  { %v2729_v56 = vadd.f32 %v2728_v22, %v2715_v51 }
 0x21d   :  { %v2702_v41 = vpop.f32.mrf.mxu3 }
 0x21e   :  { %v2703_v39 = vadd.f32 %v2702_v41, %v2689_v8 }
 0x220   :  { %v2717_v57 = vadd.f32 %v2716_v52, %v2703_v39 }
 0x222   :  { %v2730_v32 = vpop.f32.mrf.mxu1 }
 0x223   :  { %v2731_v60 = vadd.f32 %v2730_v32, %v2717_v57 }
 0x225   :  { %v2742_v23 = vpop.f32.mrf.mxu2 }
 0x226   :  { %v2743_v58 = vadd.f32 %v2742_v23, %v2729_v56 }
 0x22a   :  { %v3188_v17 = vpop.f32.mrf.mxu0 }
 0x22b   :  { %v3189_v55 = vadd.f32 %v3188_v17, %v2855_v27 }
 0x22d   :  { %v2744_v59 = vpop.f32.mrf.mxu2 }
 0x22e   :  { %v2745_v11 = vadd.f32 %v2744_v59, %v2731_v60 }
 0x232   :  { %v3190_v50 = vpop.f32.mrf.mxu0 }
 0x233   :  { %v3191_v47 = vadd.f32 %v3190_v50, %v2855_v27  ;;  %v5577_v27 = vld [vmem:[%s6123_s12] ss:$0 sm:$0xff] }
 0x235   :  { %v2756_v53 = vpop.f32.mrf.mxu3 }
 0x236   :  { %v2757_v61 = vadd.f32 %v2756_v53, %v2743_v58 }
 0x238   :  { %v2772_v0 = vmul.f32 0.02, %v2757_v61  ;;  %vm2764_vm8 = vcmp.gt.f32.partialorder %v2757_v61, 0.0 }
 0x23a   :  { %v2780_v38 = vsel %vm2764_vm8, %v2757_v61, %v2772_v0 }
 0x23d   :  { %v2758_v63 = vpop.f32.mrf.mxu3 }
 0x23e   :  { %v2759_v28 = vadd.f32 %v2758_v63, %v2745_v11 }
 0x240   :  { %vm2768_vm9 = vcmp.gt.f32.partialorder %v2759_v28, 0.0  ;;  %v2776_v4 = vmul.f32 0.02, %v2759_v28 }
 0x242   :  { %v2784_v6 = vsel %vm2768_vm9, %v2759_v28, %v2776_v4 }
 0x243   :  { %v2788_v2 = vpack.c.bf16 %v2784_v6, %v2780_v38  ;;  %v5559_v38 = vld [vmem:[%s6122_s11 + $0x38] sm:$0xff]  ;;  %v5558_v6 = vld [vmem:[%s6122_s11 + $0x30] sm:$0xff] }
 0x244   :  { %3540 = vmatpush.bf16.msra.mxu2 %v5559_v38 }
 0x245   :  { %3229 = vmatmul.bf16.vlgmr.msrb.gmra.mxu3 %v2788_v2 }
 0x248   :  { %3541 = vmatpush.bf16.msra.mxu2 %v5558_v6 }
 0x24a   :  { %v3244_v31 = vpop.f32.mrf.mxu0 }
 0x24b   :  { %v3245_v8 = vadd.f32 %v3244_v31, %v2856_v42 }
 0x24f   :  { %v3202_v20 = vpop.f32.mrf.mxu1 }
 0x250   :  { %v3203_v54 = vadd.f32 %v3202_v20, %v3189_v55 }
 0x252   :  { %v3246_v49 = vpop.f32.mrf.mxu0 }
 0x253   :  { %v3247_v53 = vadd.f32 %v3246_v49, %v2856_v42 }
 0x255   :  { %3285 = vmatmul.bf16.vlgmr.msra.gmra.mxu3 %v2788_v2  ;;  %v5557_v2 = vld [vmem:[%s6122_s11 + $0x28] sm:$0xff] }
 0x256   :  { %3542 = vmatpush.bf16.msra.mxu2 %v5557_v2 }
 0x257   :  { %v3204_v43 = vpop.f32.mrf.mxu1 }
 0x258   :  { %v3205_v36 = vadd.f32 %v3204_v43, %v3191_v47 }
 0x25a   :  { %3543 = vmatpush.bf16.msra.mxu2 %v5556_v26 }
 0x25e   :  { %3544 = vmatpush.bf16.msra.mxu2 %v5555_v7 }
 0x25f   :  { %v3258_v34 = vpop.f32.mrf.mxu1 }
 0x260   :  { %v3259_v39 = vadd.f32 %v3258_v34, %v3245_v8 }
 0x262   :  { %3545 = vmatpush.bf16.msra.mxu2 %v5554_v10 }
 0x266   :  { %3546 = vmatpush.bf16.msra.mxu2 %v5553_v9 }
 0x267   :  { %v3260_v52 = vpop.f32.mrf.mxu1 }
 0x268   :  { %v3261_v58 = vadd.f32 %v3260_v52, %v3247_v53 }
 0x26a   :  { %3547 = vmatpush.bf16.msra.mxu2 %v5552_v12 }
 0x288   :  { %v3216_v44 = vpop.f32.mrf.mxu2 }
 0x289   :  { %v3217_v35 = vadd.f32 %v3216_v44, %v3203_v54 }
 0x290   :  { %v3218_v48 = vpop.f32.mrf.mxu2 }
 0x291   :  { %v3219_v40 = vadd.f32 %v3218_v48, %v3205_v36 }
 0x298   :  { %v3272_v19 = vpop.f32.mrf.mxu2 }
 0x299   :  { %v3273_v56 = vadd.f32 %v3272_v19, %v3259_v39 }
 0x2a0   :  { %v3274_v57 = vpop.f32.mrf.mxu2 }
 0x2a1   :  { %v3275_v59 = vadd.f32 %v3274_v57, %v3261_v58 }
 0x2c8   :  { %v3230_v62 = vpop.f32.mrf.mxu3 }
 0x2c9   :  { %v3231_v37 = vadd.f32 %v3230_v62, %v3217_v35 }
 0x2cb   :  { %v3295_v1 = vmul.f32 0.02, %v3231_v37  ;;  %vm3291_vm10 = vcmp.gt.f32.partialorder %v3231_v37, 0.0 }
 0x2cd   :  { %v3299_v23 = vsel %vm3291_vm10, %v3231_v37, %v3295_v1 }
 0x2d0   :  { %v3232_v5 = vpop.f32.mrf.mxu3 }
 0x2d1   :  { %v3233_v41 = vadd.f32 %v3232_v5, %v3219_v40 }
 0x2d3   :  { %vm3293_vm11 = vcmp.gt.f32.partialorder %v3233_v41, 0.0  ;;  %v3297_v22 = vmul.f32 0.02, %v3233_v41 }
 0x2d5   :  { %v3301_v45 = vsel %vm3293_vm11, %v3233_v41, %v3297_v22 }
 0x2d6   :  { %v3303_v46 = vpack.c.bf16 %v3301_v45, %v3299_v23 }
 0x2d8   :  { %v3286_v51 = vpop.f32.mrf.mxu3  ;;  %3445 = vmatmul.bf16.vlgmr.msrb.gmra.mxu0 %v3303_v46 }
 0x2d9   :  { %v3287_v32 = vadd.f32 %v3286_v51, %v3273_v56 }
 0x2db   :  { %v3296_v61 = vmul.f32 0.02, %v3287_v32  ;;  %vm3292_vm12 = vcmp.gt.f32.partialorder %v3287_v32, 0.0 }
 0x2dd   :  { %v3300_v0 = vsel %vm3292_vm12, %v3287_v32, %v3296_v61 }
 0x2e0   :  { %v3288_v60 = vpop.f32.mrf.mxu3 }
 0x2e1   :  { %v3289_v11 = vadd.f32 %v3288_v60, %v3275_v59 }
 0x2e3   :  { %vm3294_vm13 = vcmp.gt.f32.partialorder %v3289_v11, 0.0  ;;  %v3298_v63 = vmul.f32 0.02, %v3289_v11 }
 0x2e5   :  { %v3302_v28 = vsel %vm3294_vm13, %v3289_v11, %v3298_v63 }
 0x2e6   :  { %v3304_v4 = vpack.c.bf16 %v3302_v28, %v3300_v0 }
 0x2e8   :  { %3459 = vmatmul.bf16.vlgmr.msra.gmra.mxu1 %v3304_v4 }
 0x355   :  { %v3446_v29 = vpop.f32.mrf.mxu0 }
 0x356   :  { %v3447_v18 = vadd.f32 %v5576_v25, %v3446_v29 }
 0x35d   :  { %v3448_v13 = vpop.f32.mrf.mxu0 }
 0x35e   :  { %v3449_v33 = vadd.f32 %v5576_v25, %v3448_v13 }
 0x365   :  { %v3460_v3 = vpop.f32.mrf.mxu1 }
 0x366   :  { %v3461_v15 = vadd.f32 %v3460_v3, %v3447_v18 }
 0x368   :  { %v3467_v14 = vmul.f32 0.2, %v3461_v15  ;;  %vm3465_vm14 = vcmp.gt.f32.partialorder %v3461_v15, 0.0 }
 0x36a   :  { %v3469_v44 = vsel %vm3465_vm14, %v3461_v15, %v3467_v14 }
 0x36d   :  { %v3462_v16 = vpop.f32.mrf.mxu1 }
 0x36e   :  { %v3463_v17 = vadd.f32 %v3462_v16, %v3449_v33 }
 0x370   :  { %vm3466_vm15 = vcmp.gt.f32.partialorder %v3463_v17, 0.0  ;;  %v3468_v20 = vmul.f32 0.2, %v3463_v17 }
 0x372   :  { %v3470_v21 = vsel %vm3466_vm15, %v3463_v17, %v3468_v20 }
 0x373   :  { %v3471_v24 = vpack.c.bf16 %v3470_v21, %v3469_v44 }
 0x375   :  { %3548 = vmatmul.bf16.vlgmr.msra.gmra.mxu2 %v3471_v24 }
 0x3f8   :  { %v3549_v30 = vpop.f32.mrf.mxu2 }
 0x3f9   :  { %v3550_v50 = vadd.f32 %v5577_v27, %v3549_v30 }
 0x3fb   :  { %vm3554_vm0 = vcmp.gt.f32.partialorder %v3550_v50, 0.0  ;;  %v3556_v43 = vmul.f32 0.2, %v3550_v50 }
 0x3fd   :  { %v3558_v55 = vsel %vm3554_vm0, %v3550_v50, %v3556_v43 }
 0x3fe   :  { %3560 = vst [vmem:[#allocation14] sm:$0xff] %v3558_v55 }
 0x400   :  { %v3551_v48 = vpop.f32.mrf.mxu2 }
 0x401   :  { %v3552_v62 = vadd.f32 %v5577_v27, %v3551_v48 }
 0x403   :  { %vm3555_vm1 = vcmp.gt.f32.partialorder %v3552_v62, 0.0  ;;  %v3557_v54 = vmul.f32 0.2, %v3552_v62 }
 0x405   :  { %v3559_v47 = vsel %vm3555_vm1, %v3552_v62, %v3557_v54 }
 0x406   :  { %3561 = vst [vmem:[#allocation14 + $0x8] sm:$0xff] %v3559_v47 }
 0x407   :  { %3574 = dma.vmem_to_hbm [thread:$0]  %s3567_s1, 256, %s3569_s14, [#allocation4], %s5792_s24, %s5792_s24, %s5793_s25  }
 0x408   :  { %5778 = dma.done.wait [#allocation4], 256  }
 0x409   :  { %5779 = vsyncadd [#allocation4], 4294967040 }
 0x40a   :  { %3579 = vsyncpa [#allocation3], 1 }
 0x40b   :  { %3580 = vsyncpa [#allocation6], 1 }
 0x40c   :  { %3581 = vsyncpa [#allocation9], 1 }
 0x40d   :  { %3582 = vsyncpa [#allocation12], 1 }
 0x40e   :  { %3583 = vsyncpa [#allocation4], 1 }

</bundles_post_ra>
